<compile_context>
chip_gen: v7x
topology: tpu7x:2x2x1
jax: 0.10.0
libtpu: 0.0.40
codegen_flags: <defaults>
</compile_context>

<pallas_src>
import jax
import jax.numpy as jnp
from jax.experimental import pallas as pl
from jax.experimental.pallas import tpu as pltpu


def _pick_row_tile(h, w, cin, cout, vmem_budget_bytes=16 * 1024 * 1024):
    """Largest row tile TH dividing H that keeps the kernel VMEM footprint small.

    Approximate fp32 per-output-row cost: double-buffered input rows, the 3*Cin
    im2col widening, the fp32 accumulator and double-buffered output rows.
    Re-derive the budget per generation (v7x: 64 MiB/TC; v5e/v6e: 128 MiB).
    """
    per_row = 4 * w * (2 * cin + 4 * cin + cout + 2 * cout)
    th = max(1, min(h, vmem_budget_bytes // max(per_row, 1)))
    # Keep several grid steps per image so the pipeline actually overlaps.
    th = min(th, max(8, h // 4), 256)
    while h % th:          # exact tiling, no ragged last block
        th -= 1
    return th


def _relu_conv3x3_kernel(x_top_ref, x_mid_ref, x_bot_ref, w_ref, b_ref,
                         o_ref, acc_ref):
    """Fused ReLU + 3x3 stride-1 conv on one row tile with in-kernel halo.

    x_top_ref: (1, 1,  W, Cin)   row just above the tile (clamped fetch)
    x_mid_ref: (1, TH, W, Cin)   the TH rows this grid step produces
    x_bot_ref: (1, 1,  W, Cin)   row just below the tile (clamped fetch)
    w_ref:     (3, 3*Cin, Cout)  taps regrouped per dy, K = 3*Cin
    b_ref:     (1, Cout)         bias
    o_ref:     (1, TH, W, Cout)  output tile
    acc_ref:   (TH*W, Cout) f32  VMEM scratch accumulator
    """
    j = pl.program_id(1)
    nj = pl.num_programs(1)
    _, th, w, cin = x_mid_ref.shape
    cout = o_ref.shape[3]
    dt = x_mid_ref.dtype

    # Halo rows: real neighbor rows inside the image, zeros at the image border
    # (the BlockSpec clamps the fetch in-bounds; mask the clamped duplicates).
    top = x_top_ref[0] * (j > 0).astype(dt)           # (1, W, Cin)
    bot = x_bot_ref[0] * (j < nj - 1).astype(dt)      # (1, W, Cin)
    x = jnp.concatenate([top, x_mid_ref[0], bot], axis=0)   # (TH+2, W, Cin)
    x = jnp.maximum(x, 0.0)                                  # fused ReLU; ReLU(0)=0

    # W zero-halo + fat-K im2col over dx.  Channel groups ordered [dx=0,1,2];
    # the shifted views are built once here rather than once per tap.
    zcol = jnp.zeros((th + 2, 1, cin), dt)
    xw = jnp.concatenate([zcol, x, zcol], axis=1)            # (TH+2, W+2, Cin)
    xs = jnp.concatenate([xw[:, 0:w], xw[:, 1:w + 1], xw[:, 2:w + 2]],
                         axis=2)                             # (TH+2, W, 3*Cin)
    xs = xs.reshape((th + 2) * w, 3 * cin)

    # Bias folded into the accumulator init; fp32 accumulation in VMEM scratch.
    acc_ref[...] = jnp.broadcast_to(b_ref[...], (th * w, cout)).astype(jnp.float32)
    for dy in range(3):                                      # 3 MXU dots, K = 3*Cin
        acc_ref[...] += jnp.dot(xs[dy * w:(dy + th) * w], w_ref[dy],
                                preferred_element_type=jnp.float32)

    # TODO(synk): Cout is lane-sparse at small widths; a transposed (Cout, TH*W)
    # output layout would make this store lane-dense but needs downstream changes.
    o_ref[0] = acc_ref[...].reshape(th, w, cout).astype(o_ref.dtype)


def relu_conv3x3(x_nhwc, w_oihw, b, row_tile=None):
    """act() -> Conv2d(k=3, stride=1, pad=1) on unpadded NHWC input, OIHW weights."""
    n, h, w, cin = x_nhwc.shape
    cout = w_oihw.shape[0]
    th = _pick_row_tile(h, w, cin, cout) if row_tile is None else row_tile
    nj = h // th

    # PyTorch (O, I, kh, kw) -> (kh, kw, I, O) -> (3, 3*Cin, Cout); the flattened
    # axis is ordered (dx, cin), matching the in-kernel channel-group concat.
    w_k = jnp.transpose(w_oihw, (2, 3, 1, 0)).reshape(3, 3 * cin, cout)
    b_k = b.reshape(1, cout)

    # Halo rows are fetched by two extra 1-row BlockSpecs on the *unpadded*
    # input (block height 1 => block index == row index), clamped in-bounds.
    top_map = lambda bi, j: (bi, jnp.maximum(j * th - 1, 0), 0, 0)
    mid_map = lambda bi, j: (bi, j, 0, 0)
    bot_map = lambda bi, j: (bi, jnp.minimum(j * th + th, h - 1), 0, 0)

    return pl.pallas_call(
        _relu_conv3x3_kernel,
        out_shape=jax.ShapeDtypeStruct((n, h, w, cout), x_nhwc.dtype),
        grid_spec=pltpu.PrefetchScalarGridSpec(
            num_scalar_prefetch=0,
            grid=(n, nj),
            in_specs=[
                pl.BlockSpec((1, 1, w, cin), top_map),
                pl.BlockSpec((1, th, w, cin), mid_map),
                pl.BlockSpec((1, 1, w, cin), bot_map),
                pl.BlockSpec((3, 3 * cin, cout), lambda bi, j: (0, 0, 0)),
                pl.BlockSpec((1, cout), lambda bi, j: (0, 0)),
            ],
            out_specs=pl.BlockSpec((1, th, w, cout), lambda bi, j: (bi, j, 0, 0)),
            scratch_shapes=[pltpu.VMEM((th * w, cout), jnp.float32)],
        ),
        compiler_params=pltpu.CompilerParams(
            dimension_semantics=("parallel", "parallel"),
            vmem_limit_bytes=48 * 1024 * 1024,   # above 32 MiB default, safe on v7x
        ),
    )(x_nhwc, x_nhwc, x_nhwc, w_k, b_k)


def bilinear_up2x(x_nhwc):
    """2x bilinear upsample, align_corners=False (PyTorch semantics), NHWC.

    # TODO(synk): fuse this upsample (and the layout fix) into the first conv
    # kernel to avoid materializing the 4x-larger activation in HBM; kept as
    # plain-JAX glue for now — the ReLU/conv hot path runs in Pallas.
    """
    n, h, w, c = x_nhwc.shape

    def idx(size):
        o = jnp.arange(2 * size, dtype=jnp.float32)
        src = jnp.maximum((o + 0.5) * 0.5 - 0.5, 0.0)
        i0f = jnp.floor(src)
        frac = src - i0f
        i0 = jnp.clip(i0f.astype(jnp.int32), 0, size - 1)
        i1 = jnp.minimum(i0 + 1, size - 1)
        return i0, i1, frac

    i0h, i1h, fh = idx(h)
    i0w, i1w, fw = idx(w)
    xh = (x_nhwc[:, i0h, :, :] * (1.0 - fh)[None, :, None, None]
          + x_nhwc[:, i1h, :, :] * fh[None, :, None, None])
    xw = (xh[:, :, i0w, :] * (1.0 - fw)[None, None, :, None]
          + xh[:, :, i1w, :] * fw[None, None, :, None])
    return xw


def upblock_forward(x_nchw, params):
    """UpBlock.forward: NCHW in -> NCHW out (channels = out_dim, spatial x2)."""
    x = jnp.transpose(x_nchw, (0, 2, 3, 1))           # NCHW -> NHWC
    x = bilinear_up2x(x)                              # (N, 2H, 2W, Cin)
    x = relu_conv3x3(x, params["w1"], params["b1"])   # ReLU + Conv1 (Pallas)
    x = relu_conv3x3(x, params["w2"], params["b2"])   # ReLU + Conv2 (Pallas)
    return jnp.transpose(x, (0, 3, 1, 2))             # NHWC -> NCHW


def init_params(key, in_dim, out_dim):
    """Deterministic Conv2d-style uniform init (PyTorch OIHW weight layout)."""
    k1, k2, k3, k4 = jax.random.split(key, 4)
    b1 = 1.0 / jnp.sqrt(jnp.float32(in_dim * 9))
    b2 = 1.0 / jnp.sqrt(jnp.float32(out_dim * 9))
    return {
        "w1": jax.random.uniform(k1, (out_dim, in_dim, 3, 3), jnp.float32, -b1, b1),
        "b1": jax.random.uniform(k2, (out_dim,), jnp.float32, -b1, b1),
        "w2": jax.random.uniform(k3, (out_dim, out_dim, 3, 3), jnp.float32, -b2, b2),
        "b2": jax.random.uniform(k4, (out_dim,), jnp.float32, -b2, b2),
    }


def _reference(x_nchw, params):
    """Pure-JAX reference of the same forward (for correctness check)."""
    x = jnp.transpose(x_nchw, (0, 2, 3, 1))
    x = bilinear_up2x(x)

    def conv(v, w_oihw, b):
        v = jax.nn.relu(v)
        y = jax.lax.conv_general_dilated(
            v, jnp.transpose(w_oihw, (2, 3, 1, 0)),
            window_strides=(1, 1), padding="SAME",
            dimension_numbers=("NHWC", "HWIO", "NHWC"))
        return y + b

    x = conv(x, params["w1"], params["b1"])
    x = conv(x, params["w2"], params["b2"])
    return jnp.transpose(x, (0, 3, 1, 2))


if __name__ == "__main__":
    in_dim, out_dim = 4, 8
    key = jax.random.PRNGKey(0)
    kx, kp = jax.random.split(key)
    x = jax.random.normal(kx, (2, in_dim, 16, 16), jnp.float32)   # NCHW
    params = init_params(kp, in_dim, out_dim)

    out = jax.jit(upblock_forward)(x, params)
    jax.block_until_ready(out)

    assert out.shape == (2, out_dim, 32, 32), out.shape
    ref = _reference(x, params)
    if not bool(jnp.allclose(out, ref, rtol=2e-4, atol=2e-4)):
        raise AssertionError("Pallas UpBlock output does not match reference")

    print("KERNEL_OK")
</pallas_src>

<mosaic_0001>
module attributes {stable_mosaic.version = 11 : i64} {
  func.func @_relu_conv3x3_kernel(%arg0: i32, %arg1: i32, %arg2: memref<1x1x32x4xf32, #tpu.memory_space<vmem>>, %arg3: memref<1x8x32x4xf32, #tpu.memory_space<vmem>>, %arg4: memref<1x1x32x4xf32, #tpu.memory_space<vmem>>, %arg5: memref<3x12x8xf32, #tpu.memory_space<vmem>>, %arg6: memref<1x8xf32, #tpu.memory_space<vmem>>, %arg7: memref<1x8x32x8xf32, #tpu.memory_space<vmem>>, %arg8: memref<256x8xf32, #tpu.memory_space<vmem>>) attributes {dimension_semantics = [#tpu.dimension_semantics<parallel>, #tpu.dimension_semantics<parallel>], iteration_bounds = array<i64: 2, 4>, scalar_prefetch = 0 : i64, scratch_operands = 1 : i64, tpu.core_type = #tpu.core_type<tc>, window_params = [{transform_indices = @transform_0, window_bounds = array<i64: 1, 1, 32, 4>}, {transform_indices = @transform_1, window_bounds = array<i64: 1, 8, 32, 4>}, {transform_indices = @transform_2, window_bounds = array<i64: 1, 1, 32, 4>}, {pipeline_mode = #tpu.pipeline_mode<synchronous>, transform_indices = @transform_3, window_bounds = array<i64: 3, 12, 8>}, {pipeline_mode = #tpu.pipeline_mode<synchronous>, transform_indices = @transform_4, window_bounds = array<i64: 1, 8>}, {transform_indices = @transform_5, window_bounds = array<i64: 1, 8, 32, 8>}]} {
    %c0 = arith.constant 0 : index
    %c0_0 = arith.constant 0 : index
    %c0_1 = arith.constant 0 : index
    %c0_2 = arith.constant 0 : index
    %0 = vector.load %arg2[%c0, %c0_0, %c0_1, %c0_2] : memref<1x1x32x4xf32, #tpu.memory_space<vmem>>, vector<1x1x32x4xf32>
    %1 = vector.shape_cast %0 : vector<1x1x32x4xf32> to vector<1x32x4xf32>
    %c0_i32 = arith.constant 0 : i32
    %2 = arith.cmpi sgt, %arg1, %c0_i32 : i32
    %3 = arith.extui %2 : i1 to i32
    %4 = arith.sitofp %3 : i32 to f32
    %5 = vector.broadcast %4 : f32 to vector<1x32x4xf32>
    %6 = arith.mulf %1, %5 : vector<1x32x4xf32>
    %c0_3 = arith.constant 0 : index
    %c0_4 = arith.constant 0 : index
    %c0_5 = arith.constant 0 : index
    %c0_6 = arith.constant 0 : index
    %7 = vector.load %arg4[%c0_3, %c0_4, %c0_5, %c0_6] : memref<1x1x32x4xf32, #tpu.memory_space<vmem>>, vector<1x1x32x4xf32>
    %8 = vector.shape_cast %7 : vector<1x1x32x4xf32> to vector<1x32x4xf32>
    %c3_i32 = arith.constant 3 : i32
    %9 = arith.cmpi slt, %arg1, %c3_i32 : i32
    %10 = arith.extui %9 : i1 to i32
    %11 = arith.sitofp %10 : i32 to f32
    %12 = vector.broadcast %11 : f32 to vector<1x32x4xf32>
    %13 = arith.mulf %8, %12 : vector<1x32x4xf32>
    %c0_7 = arith.constant 0 : index
    %c0_8 = arith.constant 0 : index
    %c0_9 = arith.constant 0 : index
    %c0_10 = arith.constant 0 : index
    %14 = vector.load %arg3[%c0_7, %c0_8, %c0_9, %c0_10] : memref<1x8x32x4xf32, #tpu.memory_space<vmem>>, vector<1x8x32x4xf32>
    %15 = vector.shape_cast %14 : vector<1x8x32x4xf32> to vector<8x32x4xf32>
    %16 = tpu.concatenate %6, %15, %13 in 0 : vector<1x32x4xf32>, vector<8x32x4xf32>, vector<1x32x4xf32> -> vector<10x32x4xf32>
    %cst = arith.constant 0.000000e+00 : f32
    %17 = vector.broadcast %cst : f32 to vector<10x32x4xf32>
    %18 = arith.maximumf %16, %17 : vector<10x32x4xf32>
    %cst_11 = arith.constant 0.000000e+00 : f32
    %19 = vector.broadcast %cst_11 : f32 to vector<10x1x4xf32>
    %20 = tpu.concatenate %19, %18, %19 in 1 : vector<10x1x4xf32>, vector<10x32x4xf32>, vector<10x1x4xf32> -> vector<10x34x4xf32>
    %21 = vector.extract_strided_slice %20 {offsets = [0, 0, 0], sizes = [10, 32, 4], strides = [1, 1, 1]} : vector<10x34x4xf32> to vector<10x32x4xf32>
    %22 = vector.extract_strided_slice %20 {offsets = [0, 1, 0], sizes = [10, 32, 4], strides = [1, 1, 1]} : vector<10x34x4xf32> to vector<10x32x4xf32>
    %23 = vector.extract_strided_slice %20 {offsets = [0, 2, 0], sizes = [10, 32, 4], strides = [1, 1, 1]} : vector<10x34x4xf32> to vector<10x32x4xf32>
    %24 = tpu.concatenate %21, %22, %23 in 2 : vector<10x32x4xf32>, vector<10x32x4xf32>, vector<10x32x4xf32> -> vector<10x32x12xf32>
    %25 = vector.shape_cast %24 : vector<10x32x12xf32> to vector<320x12xf32>
    %c0_12 = arith.constant 0 : index
    %c0_13 = arith.constant 0 : index
    %26 = vector.load %arg6[%c0_12, %c0_13] : memref<1x8xf32, #tpu.memory_space<vmem>>, vector<1x8xf32>
    %27 = vector.shape_cast %26 : vector<1x8xf32> to vector<1x8xf32>
    %28 = vector.broadcast %27 : vector<1x8xf32> to vector<256x8xf32>
    %c0_14 = arith.constant 0 : index
    %c0_15 = arith.constant 0 : index
    %29 = vector.load %arg8[%c0_14, %c0_15] : memref<256x8xf32, #tpu.memory_space<vmem>>, vector<256x8xf32>
    tpu.vector_store %arg8[%c0_14, %c0_15], %28 {strides = array<i32>} : memref<256x8xf32, #tpu.memory_space<vmem>>, vector<256x8xf32>,
    %c0_16 = arith.constant 0 : index
    %c0_17 = arith.constant 0 : index
    %30 = vector.load %arg8[%c0_16, %c0_17] : memref<256x8xf32, #tpu.memory_space<vmem>>, vector<256x8xf32>
    %31 = vector.extract_strided_slice %25 {offsets = [0, 0], sizes = [256, 12], strides = [1, 1]} : vector<320x12xf32> to vector<256x12xf32>
    %c0_18 = arith.constant 0 : index
    %c0_19 = arith.constant 0 : index
    %c0_20 = arith.constant 0 : index
    %32 = vector.load %arg5[%c0_18, %c0_19, %c0_20] : memref<3x12x8xf32, #tpu.memory_space<vmem>>, vector<1x12x8xf32>
    %33 = vector.shape_cast %32 : vector<1x12x8xf32> to vector<12x8xf32>
    %cst_21 = arith.constant dense<0.000000e+00> : vector<256x8xf32>
    %34 = tpu.matmul %31, %33, %cst_21 {dimension_numbers = #tpu.dot_dimension_numbers<[1], [0], [0], [1], [0, 0, 1, 1], [], []>} : vector<256x12xf32>, vector<12x8xf32>, vector<256x8xf32> -> vector<256x8xf32>
    %35 = arith.addf %30, %34 : vector<256x8xf32>
    %c0_22 = arith.constant 0 : index
    %c0_23 = arith.constant 0 : index
    %36 = vector.load %arg8[%c0_22, %c0_23] : memref<256x8xf32, #tpu.memory_space<vmem>>, vector<256x8xf32>
    tpu.vector_store %arg8[%c0_22, %c0_23], %35 {strides = array<i32>} : memref<256x8xf32, #tpu.memory_space<vmem>>, vector<256x8xf32>,
    %c0_24 = arith.constant 0 : index
    %c0_25 = arith.constant 0 : index
    %37 = vector.load %arg8[%c0_24, %c0_25] : memref<256x8xf32, #tpu.memory_space<vmem>>, vector<256x8xf32>
    %38 = vector.extract_strided_slice %25 {offsets = [32, 0], sizes = [256, 12], strides = [1, 1]} : vector<320x12xf32> to vector<256x12xf32>
    %c1 = arith.constant 1 : index
    %c0_26 = arith.constant 0 : index
    %c0_27 = arith.constant 0 : index
    %39 = vector.load %arg5[%c1, %c0_26, %c0_27] : memref<3x12x8xf32, #tpu.memory_space<vmem>>, vector<1x12x8xf32>
    %40 = vector.shape_cast %39 : vector<1x12x8xf32> to vector<12x8xf32>
    %cst_28 = arith.constant dense<0.000000e+00> : vector<256x8xf32>
    %41 = tpu.matmul %38, %40, %cst_28 {dimension_numbers = #tpu.dot_dimension_numbers<[1], [0], [0], [1], [0, 0, 1, 1], [], []>} : vector<256x12xf32>, vector<12x8xf32>, vector<256x8xf32> -> vector<256x8xf32>
    %42 = arith.addf %37, %41 : vector<256x8xf32>
    %c0_29 = arith.constant 0 : index
    %c0_30 = arith.constant 0 : index
    %43 = vector.load %arg8[%c0_29, %c0_30] : memref<256x8xf32, #tpu.memory_space<vmem>>, vector<256x8xf32>
    tpu.vector_store %arg8[%c0_29, %c0_30], %42 {strides = array<i32>} : memref<256x8xf32, #tpu.memory_space<vmem>>, vector<256x8xf32>,
    %c0_31 = arith.constant 0 : index
    %c0_32 = arith.constant 0 : index
    %44 = vector.load %arg8[%c0_31, %c0_32] : memref<256x8xf32, #tpu.memory_space<vmem>>, vector<256x8xf32>
    %45 = vector.extract_strided_slice %25 {offsets = [64, 0], sizes = [256, 12], strides = [1, 1]} : vector<320x12xf32> to vector<256x12xf32>
    %c2 = arith.constant 2 : index
    %c0_33 = arith.constant 0 : index
    %c0_34 = arith.constant 0 : index
    %46 = vector.load %arg5[%c2, %c0_33, %c0_34] : memref<3x12x8xf32, #tpu.memory_space<vmem>>, vector<1x12x8xf32>
    %47 = vector.shape_cast %46 : vector<1x12x8xf32> to vector<12x8xf32>
    %cst_35 = arith.constant dense<0.000000e+00> : vector<256x8xf32>
    %48 = tpu.matmul %45, %47, %cst_35 {dimension_numbers = #tpu.dot_dimension_numbers<[1], [0], [0], [1], [0, 0, 1, 1], [], []>} : vector<256x12xf32>, vector<12x8xf32>, vector<256x8xf32> -> vector<256x8xf32>
    %49 = arith.addf %44, %48 : vector<256x8xf32>
    %c0_36 = arith.constant 0 : index
    %c0_37 = arith.constant 0 : index
    %50 = vector.load %arg8[%c0_36, %c0_37] : memref<256x8xf32, #tpu.memory_space<vmem>>, vector<256x8xf32>
    tpu.vector_store %arg8[%c0_36, %c0_37], %49 {strides = array<i32>} : memref<256x8xf32, #tpu.memory_space<vmem>>, vector<256x8xf32>,
    %c0_38 = arith.constant 0 : index
    %c0_39 = arith.constant 0 : index
    %51 = vector.load %arg8[%c0_38, %c0_39] : memref<256x8xf32, #tpu.memory_space<vmem>>, vector<256x8xf32>
    %52 = vector.shape_cast %51 : vector<256x8xf32> to vector<8x32x8xf32>
    %c0_40 = arith.constant 0 : index
    %c0_41 = arith.constant 0 : index
    %c0_42 = arith.constant 0 : index
    %c0_43 = arith.constant 0 : index
    %53 = vector.load %arg7[%c0_40, %c0_41, %c0_42, %c0_43] : memref<1x8x32x8xf32, #tpu.memory_space<vmem>>, vector<1x8x32x8xf32>
    %54 = vector.shape_cast %53 : vector<1x8x32x8xf32> to vector<8x32x8xf32>
    %55 = vector.shape_cast %52 : vector<8x32x8xf32> to vector<1x8x32x8xf32>
    tpu.vector_store %arg7[%c0_40, %c0_41, %c0_42, %c0_43], %55 {strides = array<i32>} : memref<1x8x32x8xf32, #tpu.memory_space<vmem>>, vector<1x8x32x8xf32>,
    return
  }
  func.func @transform_0(%arg0: i32, %arg1: i32) -> (i32, i32, i32, i32) {
    %c8_i32 = arith.constant 8 : i32
    %0 = arith.muli %arg1, %c8_i32 : i32
    %c1_i32 = arith.constant 1 : i32
    %1 = arith.subi %0, %c1_i32 : i32
    %c0_i32 = arith.constant 0 : i32
    %2 = arith.maxsi %1, %c0_i32 : i32
    %c0_i32_0 = arith.constant 0 : i32
    %c0_i32_1 = arith.constant 0 : i32
    %c0_i32_2 = arith.constant 0 : i32
    return %arg0, %2, %c0_i32_0, %c0_i32_1 : i32, i32, i32, i32
  }
  func.func @transform_1(%arg0: i32, %arg1: i32) -> (i32, i32, i32, i32) {
    %c0_i32 = arith.constant 0 : i32
    %c0_i32_0 = arith.constant 0 : i32
    %c0_i32_1 = arith.constant 0 : i32
    return %arg0, %arg1, %c0_i32, %c0_i32_0 : i32, i32, i32, i32
  }
  func.func @transform_2(%arg0: i32, %arg1: i32) -> (i32, i32, i32, i32) {
    %c8_i32 = arith.constant 8 : i32
    %0 = arith.muli %arg1, %c8_i32 : i32
    %c8_i32_0 = arith.constant 8 : i32
    %1 = arith.addi %0, %c8_i32_0 : i32
    %c31_i32 = arith.constant 31 : i32
    %2 = arith.minsi %1, %c31_i32 : i32
    %c0_i32 = arith.constant 0 : i32
    %c0_i32_1 = arith.constant 0 : i32
    %c0_i32_2 = arith.constant 0 : i32
    return %arg0, %2, %c0_i32, %c0_i32_1 : i32, i32, i32, i32
  }
  func.func @transform_3(%arg0: i32, %arg1: i32) -> (i32, i32, i32) {
    %c0_i32 = arith.constant 0 : i32
    %c0_i32_0 = arith.constant 0 : i32
    %c0_i32_1 = arith.constant 0 : i32
    %c0_i32_2 = arith.constant 0 : i32
    return %c0_i32, %c0_i32_0, %c0_i32_1 : i32, i32, i32
  }
  func.func @transform_4(%arg0: i32, %arg1: i32) -> (i32, i32) {
    %c0_i32 = arith.constant 0 : i32
    %c0_i32_0 = arith.constant 0 : i32
    %c0_i32_1 = arith.constant 0 : i32
    return %c0_i32, %c0_i32_0 : i32, i32
  }
  func.func @transform_5(%arg0: i32, %arg1: i32) -> (i32, i32, i32, i32) {
    %c0_i32 = arith.constant 0 : i32
    %c0_i32_0 = arith.constant 0 : i32
    %c0_i32_1 = arith.constant 0 : i32
    return %arg0, %arg1, %c0_i32, %c0_i32_0 : i32, i32, i32, i32
  }
}

module attributes {stable_mosaic.version = 11 : i64} {
  func.func @_relu_conv3x3_kernel(%arg0: i32, %arg1: i32, %arg2: memref<1x1x32x8xf32, #tpu.memory_space<vmem>>, %arg3: memref<1x8x32x8xf32, #tpu.memory_space<vmem>>, %arg4: memref<1x1x32x8xf32, #tpu.memory_space<vmem>>, %arg5: memref<3x24x8xf32, #tpu.memory_space<vmem>>, %arg6: memref<1x8xf32, #tpu.memory_space<vmem>>, %arg7: memref<1x8x32x8xf32, #tpu.memory_space<vmem>>, %arg8: memref<256x8xf32, #tpu.memory_space<vmem>>) attributes {dimension_semantics = [#tpu.dimension_semantics<parallel>, #tpu.dimension_semantics<parallel>], iteration_bounds = array<i64: 2, 4>, scalar_prefetch = 0 : i64, scratch_operands = 1 : i64, tpu.core_type = #tpu.core_type<tc>, window_params = [{transform_indices = @transform_0, window_bounds = array<i64: 1, 1, 32, 8>}, {transform_indices = @transform_1, window_bounds = array<i64: 1, 8, 32, 8>}, {transform_indices = @transform_2, window_bounds = array<i64: 1, 1, 32, 8>}, {pipeline_mode = #tpu.pipeline_mode<synchronous>, transform_indices = @transform_3, window_bounds = array<i64: 3, 24, 8>}, {pipeline_mode = #tpu.pipeline_mode<synchronous>, transform_indices = @transform_4, window_bounds = array<i64: 1, 8>}, {transform_indices = @transform_5, window_bounds = array<i64: 1, 8, 32, 8>}]} {
    %c0 = arith.constant 0 : index
    %c0_0 = arith.constant 0 : index
    %c0_1 = arith.constant 0 : index
    %c0_2 = arith.constant 0 : index
    %0 = vector.load %arg2[%c0, %c0_0, %c0_1, %c0_2] : memref<1x1x32x8xf32, #tpu.memory_space<vmem>>, vector<1x1x32x8xf32>
    %1 = vector.shape_cast %0 : vector<1x1x32x8xf32> to vector<1x32x8xf32>
    %c0_i32 = arith.constant 0 : i32
    %2 = arith.cmpi sgt, %arg1, %c0_i32 : i32
    %3 = arith.extui %2 : i1 to i32
    %4 = arith.sitofp %3 : i32 to f32
    %5 = vector.broadcast %4 : f32 to vector<1x32x8xf32>
    %6 = arith.mulf %1, %5 : vector<1x32x8xf32>
    %c0_3 = arith.constant 0 : index
    %c0_4 = arith.constant 0 : index
    %c0_5 = arith.constant 0 : index
    %c0_6 = arith.constant 0 : index
    %7 = vector.load %arg4[%c0_3, %c0_4, %c0_5, %c0_6] : memref<1x1x32x8xf32, #tpu.memory_space<vmem>>, vector<1x1x32x8xf32>
    %8 = vector.shape_cast %7 : vector<1x1x32x8xf32> to vector<1x32x8xf32>
    %c3_i32 = arith.constant 3 : i32
    %9 = arith.cmpi slt, %arg1, %c3_i32 : i32
    %10 = arith.extui %9 : i1 to i32
    %11 = arith.sitofp %10 : i32 to f32
    %12 = vector.broadcast %11 : f32 to vector<1x32x8xf32>
    %13 = arith.mulf %8, %12 : vector<1x32x8xf32>
    %c0_7 = arith.constant 0 : index
    %c0_8 = arith.constant 0 : index
    %c0_9 = arith.constant 0 : index
    %c0_10 = arith.constant 0 : index
    %14 = vector.load %arg3[%c0_7, %c0_8, %c0_9, %c0_10] : memref<1x8x32x8xf32, #tpu.memory_space<vmem>>, vector<1x8x32x8xf32>
    %15 = vector.shape_cast %14 : vector<1x8x32x8xf32> to vector<8x32x8xf32>
    %16 = tpu.concatenate %6, %15, %13 in 0 : vector<1x32x8xf32>, vector<8x32x8xf32>, vector<1x32x8xf32> -> vector<10x32x8xf32>
    %cst = arith.constant 0.000000e+00 : f32
    %17 = vector.broadcast %cst : f32 to vector<10x32x8xf32>
    %18 = arith.maximumf %16, %17 : vector<10x32x8xf32>
    %cst_11 = arith.constant 0.000000e+00 : f32
    %19 = vector.broadcast %cst_11 : f32 to vector<10x1x8xf32>
    %20 = tpu.concatenate %19, %18, %19 in 1 : vector<10x1x8xf32>, vector<10x32x8xf32>, vector<10x1x8xf32> -> vector<10x34x8xf32>
    %21 = vector.extract_strided_slice %20 {offsets = [0, 0, 0], sizes = [10, 32, 8], strides = [1, 1, 1]} : vector<10x34x8xf32> to vector<10x32x8xf32>
    %22 = vector.extract_strided_slice %20 {offsets = [0, 1, 0], sizes = [10, 32, 8], strides = [1, 1, 1]} : vector<10x34x8xf32> to vector<10x32x8xf32>
    %23 = vector.extract_strided_slice %20 {offsets = [0, 2, 0], sizes = [10, 32, 8], strides = [1, 1, 1]} : vector<10x34x8xf32> to vector<10x32x8xf32>
    %24 = tpu.concatenate %21, %22, %23 in 2 : vector<10x32x8xf32>, vector<10x32x8xf32>, vector<10x32x8xf32> -> vector<10x32x24xf32>
    %25 = vector.shape_cast %24 : vector<10x32x24xf32> to vector<320x24xf32>
    %c0_12 = arith.constant 0 : index
    %c0_13 = arith.constant 0 : index
    %26 = vector.load %arg6[%c0_12, %c0_13] : memref<1x8xf32, #tpu.memory_space<vmem>>, vector<1x8xf32>
    %27 = vector.shape_cast %26 : vector<1x8xf32> to vector<1x8xf32>
    %28 = vector.broadcast %27 : vector<1x8xf32> to vector<256x8xf32>
    %c0_14 = arith.constant 0 : index
    %c0_15 = arith.constant 0 : index
    %29 = vector.load %arg8[%c0_14, %c0_15] : memref<256x8xf32, #tpu.memory_space<vmem>>, vector<256x8xf32>
    tpu.vector_store %arg8[%c0_14, %c0_15], %28 {strides = array<i32>} : memref<256x8xf32, #tpu.memory_space<vmem>>, vector<256x8xf32>,
    %c0_16 = arith.constant 0 : index
    %c0_17 = arith.constant 0 : index
    %30 = vector.load %arg8[%c0_16, %c0_17] : memref<256x8xf32, #tpu.memory_space<vmem>>, vector<256x8xf32>
    %31 = vector.extract_strided_slice %25 {offsets = [0, 0], sizes = [256, 24], strides = [1, 1]} : vector<320x24xf32> to vector<256x24xf32>
    %c0_18 = arith.constant 0 : index
    %c0_19 = arith.constant 0 : index
    %c0_20 = arith.constant 0 : index
    %32 = vector.load %arg5[%c0_18, %c0_19, %c0_20] : memref<3x24x8xf32, #tpu.memory_space<vmem>>, vector<1x24x8xf32>
    %33 = vector.shape_cast %32 : vector<1x24x8xf32> to vector<24x8xf32>
    %cst_21 = arith.constant dense<0.000000e+00> : vector<256x8xf32>
    %34 = tpu.matmul %31, %33, %cst_21 {dimension_numbers = #tpu.dot_dimension_numbers<[1], [0], [0], [1], [0, 0, 1, 1], [], []>} : vector<256x24xf32>, vector<24x8xf32>, vector<256x8xf32> -> vector<256x8xf32>
    %35 = arith.addf %30, %34 : vector<256x8xf32>
    %c0_22 = arith.constant 0 : index
    %c0_23 = arith.constant 0 : index
    %36 = vector.load %arg8[%c0_22, %c0_23] : memref<256x8xf32, #tpu.memory_space<vmem>>, vector<256x8xf32>
    tpu.vector_store %arg8[%c0_22, %c0_23], %35 {strides = array<i32>} : memref<256x8xf32, #tpu.memory_space<vmem>>, vector<256x8xf32>,
    %c0_24 = arith.constant 0 : index
    %c0_25 = arith.constant 0 : index
    %37 = vector.load %arg8[%c0_24, %c0_25] : memref<256x8xf32, #tpu.memory_space<vmem>>, vector<256x8xf32>
    %38 = vector.extract_strided_slice %25 {offsets = [32, 0], sizes = [256, 24], strides = [1, 1]} : vector<320x24xf32> to vector<256x24xf32>
    %c1 = arith.constant 1 : index
    %c0_26 = arith.constant 0 : index
    %c0_27 = arith.constant 0 : index
    %39 = vector.load %arg5[%c1, %c0_26, %c0_27] : memref<3x24x8xf32, #tpu.memory_space<vmem>>, vector<1x24x8xf32>
    %40 = vector.shape_cast %39 : vector<1x24x8xf32> to vector<24x8xf32>
    %cst_28 = arith.constant dense<0.000000e+00> : vector<256x8xf32>
    %41 = tpu.matmul %38, %40, %cst_28 {dimension_numbers = #tpu.dot_dimension_numbers<[1], [0], [0], [1], [0, 0, 1, 1], [], []>} : vector<256x24xf32>, vector<24x8xf32>, vector<256x8xf32> -> vector<256x8xf32>
    %42 = arith.addf %37, %41 : vector<256x8xf32>
    %c0_29 = arith.constant 0 : index
    %c0_30 = arith.constant 0 : index
    %43 = vector.load %arg8[%c0_29, %c0_30] : memref<256x8xf32, #tpu.memory_space<vmem>>, vector<256x8xf32>
    tpu.vector_store %arg8[%c0_29, %c0_30], %42 {strides = array<i32>} : memref<256x8xf32, #tpu.memory_space<vmem>>, vector<256x8xf32>,
    %c0_31 = arith.constant 0 : index
    %c0_32 = arith.constant 0 : index
    %44 = vector.load %arg8[%c0_31, %c0_32] : memref<256x8xf32, #tpu.memory_space<vmem>>, vector<256x8xf32>
    %45 = vector.extract_strided_slice %25 {offsets = [64, 0], sizes = [256, 24], strides = [1, 1]} : vector<320x24xf32> to vector<256x24xf32>
    %c2 = arith.constant 2 : index
    %c0_33 = arith.constant 0 : index
    %c0_34 = arith.constant 0 : index
    %46 = vector.load %arg5[%c2, %c0_33, %c0_34] : memref<3x24x8xf32, #tpu.memory_space<vmem>>, vector<1x24x8xf32>
    %47 = vector.shape_cast %46 : vector<1x24x8xf32> to vector<24x8xf32>
    %cst_35 = arith.constant dense<0.000000e+00> : vector<256x8xf32>
    %48 = tpu.matmul %45, %47, %cst_35 {dimension_numbers = #tpu.dot_dimension_numbers<[1], [0], [0], [1], [0, 0, 1, 1], [], []>} : vector<256x24xf32>, vector<24x8xf32>, vector<256x8xf32> -> vector<256x8xf32>
    %49 = arith.addf %44, %48 : vector<256x8xf32>
    %c0_36 = arith.constant 0 : index
    %c0_37 = arith.constant 0 : index
    %50 = vector.load %arg8[%c0_36, %c0_37] : memref<256x8xf32, #tpu.memory_space<vmem>>, vector<256x8xf32>
    tpu.vector_store %arg8[%c0_36, %c0_37], %49 {strides = array<i32>} : memref<256x8xf32, #tpu.memory_space<vmem>>, vector<256x8xf32>,
    %c0_38 = arith.constant 0 : index
    %c0_39 = arith.constant 0 : index
    %51 = vector.load %arg8[%c0_38, %c0_39] : memref<256x8xf32, #tpu.memory_space<vmem>>, vector<256x8xf32>
    %52 = vector.shape_cast %51 : vector<256x8xf32> to vector<8x32x8xf32>
    %c0_40 = arith.constant 0 : index
    %c0_41 = arith.constant 0 : index
    %c0_42 = arith.constant 0 : index
    %c0_43 = arith.constant 0 : index
    %53 = vector.load %arg7[%c0_40, %c0_41, %c0_42, %c0_43] : memref<1x8x32x8xf32, #tpu.memory_space<vmem>>, vector<1x8x32x8xf32>
    %54 = vector.shape_cast %53 : vector<1x8x32x8xf32> to vector<8x32x8xf32>
    %55 = vector.shape_cast %52 : vector<8x32x8xf32> to vector<1x8x32x8xf32>
    tpu.vector_store %arg7[%c0_40, %c0_41, %c0_42, %c0_43], %55 {strides = array<i32>} : memref<1x8x32x8xf32, #tpu.memory_space<vmem>>, vector<1x8x32x8xf32>,
    return
  }
  func.func @transform_0(%arg0: i32, %arg1: i32) -> (i32, i32, i32, i32) {
    %c8_i32 = arith.constant 8 : i32
    %0 = arith.muli %arg1, %c8_i32 : i32
    %c1_i32 = arith.constant 1 : i32
    %1 = arith.subi %0, %c1_i32 : i32
    %c0_i32 = arith.constant 0 : i32
    %2 = arith.maxsi %1, %c0_i32 : i32
    %c0_i32_0 = arith.constant 0 : i32
    %c0_i32_1 = arith.constant 0 : i32
    %c0_i32_2 = arith.constant 0 : i32
    return %arg0, %2, %c0_i32_0, %c0_i32_1 : i32, i32, i32, i32
  }
  func.func @transform_1(%arg0: i32, %arg1: i32) -> (i32, i32, i32, i32) {
    %c0_i32 = arith.constant 0 : i32
    %c0_i32_0 = arith.constant 0 : i32
    %c0_i32_1 = arith.constant 0 : i32
    return %arg0, %arg1, %c0_i32, %c0_i32_0 : i32, i32, i32, i32
  }
  func.func @transform_2(%arg0: i32, %arg1: i32) -> (i32, i32, i32, i32) {
    %c8_i32 = arith.constant 8 : i32
    %0 = arith.muli %arg1, %c8_i32 : i32
    %c8_i32_0 = arith.constant 8 : i32
    %1 = arith.addi %0, %c8_i32_0 : i32
    %c31_i32 = arith.constant 31 : i32
    %2 = arith.minsi %1, %c31_i32 : i32
    %c0_i32 = arith.constant 0 : i32
    %c0_i32_1 = arith.constant 0 : i32
    %c0_i32_2 = arith.constant 0 : i32
    return %arg0, %2, %c0_i32, %c0_i32_1 : i32, i32, i32, i32
  }
  func.func @transform_3(%arg0: i32, %arg1: i32) -> (i32, i32, i32) {
    %c0_i32 = arith.constant 0 : i32
    %c0_i32_0 = arith.constant 0 : i32
    %c0_i32_1 = arith.constant 0 : i32
    %c0_i32_2 = arith.constant 0 : i32
    return %c0_i32, %c0_i32_0, %c0_i32_1 : i32, i32, i32
  }
  func.func @transform_4(%arg0: i32, %arg1: i32) -> (i32, i32) {
    %c0_i32 = arith.constant 0 : i32
    %c0_i32_0 = arith.constant 0 : i32
    %c0_i32_1 = arith.constant 0 : i32
    return %c0_i32, %c0_i32_0 : i32, i32
  }
  func.func @transform_5(%arg0: i32, %arg1: i32) -> (i32, i32, i32, i32) {
    %c0_i32 = arith.constant 0 : i32
    %c0_i32_0 = arith.constant 0 : i32
    %c0_i32_1 = arith.constant 0 : i32
    return %arg0, %arg1, %c0_i32, %c0_i32_0 : i32, i32, i32, i32
  }
}

</mosaic_0001>

<bundles_post_ra>
// kernel: upblock_forward.3
= control target key start
LH: loop header
LB: loop body
LE: loop exit
PB: predicated region body
PF: predicated region fallthrough
CT: control target
= control target key end

     0   :  { %s3073_s18 = smov 0   ;;  %s3075_s19 = smov 0   ;;  %s4121_s0 = inlined_call_operand.vmem [shape: f32[2,32,32,8], index: 0, kind: input, shape index: {}, may-alias: {0,1,2}]   ;;  %s4122_s1 = inlined_call_operand.vmem [shape: f32[2,32,32,8], index: 1, kind: input, shape index: {}, may-alias: {0,1,2}]   ;;  %s4123_s2 = inlined_call_operand.vmem [shape: f32[2,32,32,8], index: 2, kind: input, shape index: {}, may-alias: {0,1,2}]   ;;  %s4124_s3 = inlined_call_operand.vmem [shape: f32[3,24,8], index: 3, kind: input, shape index: {}]   ;;  %s4125_s4 = inlined_call_operand.vmem [shape: f32[1,8], index: 4, kind: input, shape index: {}]   ;;  %s4126_s5 = inlined_call_operand.vmem [shape: f32[2,32,32,8], index: 5, kind: output, shape index: {}]  }
   0x1   :  { %s3077_s20 = smov 0   ;;  %s3079_s21 = smov 0  }
   0x2   :  { %s3081_s22 = smov 0  }
   0x3 LB: > { %s24_s23 = sadd.s32 1, %s3031_s20  ;;  %s27_s24 = sadd.s32 1, %s3035_s21  ;;  %s3039_s22 = sphi %s3081_s22, %s15_s22   ;;  %s3035_s21 = sphi %s3079_s21, %s4131_s21   ;;  %s3031_s20 = sphi %s3077_s20, %s4130_s20   ;;  %s3027_s19 = sphi %s3075_s19, %s4129_s19   ;;  %s3023_s18 = sphi %s3073_s18, %s4128_s18  }
   0x4   : > { %p25_p0 = scmp.ge.s32.totalorder %s24_s23, 4  ;;  %p2543_p1 = scmp.ge.s32.totalorder %s3039_s22, 1 }
   0x5   : > { %p273_p2 = scmp.lt.s32.totalorder %s3039_s22, 9 }
   0x6   : > { %s4133_s23 = smov (%p25_p0, %s24_s23), 0  ;;  %s4135_s24 = smov (!%p25_p0, %s27_s24), %s3035_s21 }
   0x7   : > { %p274_p3 = pnand %p2543_p1, %p273_p2  ;;  %p29_p4 = scmp.ge.s32.totalorder %s4135_s24, 2 }
   0x8   : > { %s3106_s25 = sshll.u32 (!%p274_p3), %s3023_s18, 3  ;;  %p341_p5 = scmp.lt.s32.totalorder (!%p274_p3), %s3027_s19, 1  ;;  %v1265_v0 = vld [vmem:[%s4124_s3] sm:$0xff] (!%p274_p3)  ;;  %v1266_v1 = vld [vmem:[%s4124_s3 + $0x8] sm:$0xff] (!%p274_p3)  ;;  %v1267_v3 = vld [vmem:[%s4124_s3 + $0x10] sm:$0xff] (!%p274_p3)  ;;  %vm529_vm0 = vcmask (!%p274_p3), 1040384  }
   0x9   : > { %s4137_s24 = smov (%p29_p4, %s4135_s24), 0  ;;  %277 = sbr.rel (%p274_p3) target bundleno = 561 (0x231), region = 40 }
   0xa   : > { %p357_p6 = scmp.lt.s32.totalorder (!%p274_p3), %s3106_s25, 31  ;;  %v2943_v2 = vpack.c.bf16 (!%p274_p3), %v1266_v1, %v1265_v0  ;;  %s2545_s8 = sadd.s32 (!%p274_p3), 4294967295, %s3106_s25  ;;  %vm901_vm1 = vcmask (!%p274_p3), 1045504   ;;  %vm690_vm2 = vcmask (!%p274_p3), 1046528   ;;  %vm1112_vm3 = vcmask (!%p274_p3), 64512  }
   0xb   : > { %p339_p7 = scmp.gt.s32.totalorder (!%p274_p3), %s2545_s8, 0  ;;  %p2546_p8 = scmp.lt.s32.totalorder (!%p274_p3), %s2545_s8, 31  ;;  %vm1153_vm4 = vcmask (!%p274_p3), 130048   ;;  %vm1268_vm5 = vcmask (!%p274_p3), 195584  }
   0xc   : > { %2955 = vmatprep.subr.bf16.mxu1 (!%p274_p3), %v2943_v2  ;;  %2944 = vmatprep.subr.bf16.mxu0 (!%p274_p3), %v2943_v2  ;;  %p397_p9 = scmp.gt.s32.totalorder (!%p274_p3), %s3023_s18, 0  ;;  %s366_s12 = sadd.s32 (!%p274_p3), 8, %s3106_s25 }
   0xd   : > { %2957 = vmatpush3.bf16.msra.mxu1 (!%p274_p3), %v2943_v2  ;;  %2946 = vmatpush3.bf16.msra.mxu0 (!%p274_p3), %v2943_v2  ;;  %p3242_p10 = scmp.lt.s32.totalorder (!%p274_p3), %s366_s12, 31  ;;  %p409_p11 = scmp.lt.s32.totalorder (!%p274_p3), %s3023_s18, 3 }
   0xe   : > { %2956 = vmatprep.subr.mxu1 (!%p274_p3), %v1267_v3  ;;  %2785 = vmatprep.subr.mxu0 (!%p274_p3), %v1267_v3 }
  0x10   : > { %s4139_s19 = smov (!%p341_p5, %s3027_s19), 1  ;;  %s4143_s12 = smov (!%p3242_p10, %s366_s12), 31 }
  0x11   : > { %s358_s30 = scalar_select %p357_p6, %s3106_s25, 31  ;;  %2958 = vmatpush3.msra.mxu1 %v1267_v3  ;;  %2786 = vmatpush3.msra.mxu0 %v1267_v3 }
  0x12   : > { %s3116_s6 = sshll.u32 %s4139_s19, 7  ;;  %s4145_s12 = smov (!%p3242_p10, %s4143_s12), 31 }
  0x13   : > { %s2555_s7 = sshll.u32 %s358_s30, 2  ;;  %s3263_s25 = sshll.u32 %s4145_s12, 2 }
  0x14   : > { %s3120_s9 = sadd.s32 %s2555_s7, %s3116_s6  ;;  %s3041_s7 = smov 16  }
  0x15   : > { %s2557_s10 = sshll.u32 %s3120_s9, 3  ;;  %s375_s15 = sadd.s32 %s3263_s25, %s3116_s6 }
  0x16   : > { %s3128_s13 = scalar_lea.vmem %s4122_s1, %s2557_s10  ;;  %s3993_s27 = scalar_lea.vmem %s4126_s5, %s2557_s10 }
  0x17   : > { %v429_v4 = vld [vmem:[%s3128_s13 + $0x60] sm:$0xff]  ;;  %v430_v5 = vld [vmem:[%s3128_s13 + $0x68] sm:$0xff]  ;;  %v431_v6 = vld [vmem:[%s3128_s13 + $0x70] sm:$0xff]  ;;  %s340_s16 = scalar_select %p339_p7, %s2545_s8, 0 }
  0x18   : > { %v465_v7 = vmax.f32 %v429_v4, 0.0  ;;  %v466_v8 = vmax.f32 %v430_v5, 0.0  ;;  %v467_v9 = vmax.f32 %v431_v6, 0.0  ;;  %v432_v10 = vld [vmem:[%s3128_s13 + $0x78] sm:$0xff]  ;;  %v433_v11 = vld [vmem:[%s3128_s13 + $0x80] sm:$0xff]  ;;  %v434_v12 = vld [vmem:[%s3128_s13 + $0x88] sm:$0xff] }
  0x19   : > { %v468_v13 = vmax.f32 %v432_v10, 0.0  ;;  %v435_v14 = vld [vmem:[%s3128_s13 + $0x90] sm:$0xff]  ;;  %s4141_s16 = smov (!%p2546_p8, %s340_s16), 31  ;;  %v469_v19 = vmax.f32 %v433_v11, 0.0  ;;  %v470_v20 = vmax.f32 %v434_v12, 0.0  ;;  %s3042_s8 = smov 8  }
  0x1a   : > { %v558_v15 = vrot.slane %v465_v7, 7  ;;  %v559_v16 = vrot.slane %v466_v8, 7  ;;  %v561_v17 = vrot.slane %v467_v9, 7  ;;  %s2551_s17 = sshll.u32 %s4141_s16, 2  ;;  %v471_v24 = vmax.f32 %v435_v14, 0.0  ;;  %v436_v55 = vld [vmem:[%s3128_s13 + $0x98] sm:$0xff] }
  0x1b   : > { %v563_v18 = vrot.slane %v468_v13, 7  ;;  %s347_s19 = sadd.s32 %s3116_s6, %s2551_s17  ;;  %v565_v37 = vrot.slane %v469_v19, 7  ;;  %v566_v40 = vrot.slane %v470_v20, 7  ;;  %v472_v63 = vmax.f32 %v436_v55, 0.0  ;;  %v418_v55 = vld [vmem:[%s3128_s13 + $0x8] sm:$0xff] }
  0x1c   : > { %v3143_v21 = vsel %vm529_vm0, %v558_v15, %v559_v16  ;;  %v3146_v22 = vsel %vm529_vm0, 0.0, %v558_v15  ;;  %v3149_v23 = vsel %vm529_vm0, %v559_v16, %v561_v17  ;;  %s2553_s26 = sshll.u32 %s347_s19, 3  ;;  %v568_v41 = vrot.slane %v471_v24, 7 }
  0x1d   : > { %v938_v25 = vrot.slane %v3146_v22, 2  ;;  %v939_v26 = vrot.slane %v3143_v21, 2  ;;  %v727_v27 = vrot.slane %v3146_v22, 1  ;;  %v728_v28 = vrot.slane %v3143_v21, 1  ;;  %s3165_s29 = scalar_lea.vmem %s4121_s0, %s2553_s26 }
  0x1e   : > { %v941_v29 = vrot.slane %v3149_v23, 2  ;;  %v730_v30 = vrot.slane %v3149_v23, 1  ;;  %v3159_v31 = vsel %vm529_vm0, %v561_v17, %v563_v18  ;;  %v664_v32 = vsel %vm529_vm0, %v563_v18, 0.0  ;;  %s398_s30 = scalar_select %p397_p9, 1, 0  ;;  %v393_v42 = vld [vmem:[%s3165_s29] sm:$0xff] }
  0x1f   : > { %v940_v33 = vsel %vm901_vm1, %v938_v25, %v939_v26  ;;  %v729_v34 = vsel %vm690_vm2, %v727_v27, %v728_v28  ;;  %v732_v35 = vrot.slane %v3159_v31, 1  ;;  %v734_v36 = vrot.slane %v664_v32, 1  ;;  %v394_v43 = vld [vmem:[%s3165_s29 + $0x8] sm:$0xff]  ;;  %v395_v44 = vld [vmem:[%s3165_s29 + $0x10] sm:$0xff]  ;;  %v396_v7 = vld [vmem:[%s3165_s29 + $0x18] sm:$0xff] }
  0x20   : > { %1024 = vrot.lane.b32.xlu1 %v940_v33, %s3041_s7  ;;  %813 = vrot.lane.b32.xlu0 %v729_v34, %s3042_s8  ;;  %v942_v38 = vsel %vm901_vm1, %v939_v26, %v941_v29  ;;  %v731_v39 = vsel %vm690_vm2, %v728_v28, %v730_v30  ;;  %s399_s11 = scvt.s32.f32 %s398_s30  ;;  %v943_v45 = vrot.slane %v3159_v31, 2  ;;  %v945_v49 = vrot.slane %v664_v32, 2  ;;  %v437_v34 = vld [vmem:[%s3128_s13 + $0xa0] sm:$0xff] }
  0x21   : > { %v735_v47 = vsel %vm690_vm2, %v732_v35, %v734_v36  ;;  %v733_v48 = vsel %vm690_vm2, %v730_v30, %v732_v35  ;;  %v3185_v51 = vsel %vm529_vm0, %v565_v37, %v566_v40  ;;  %v3188_v52 = vsel %vm529_vm0, %v566_v40, %v568_v41  ;;  %v438_v35 = vld [vmem:[%s3128_s13 + $0xa8] sm:$0xff]  ;;  %s3490_s18 = scalar_select %p409_p11, 1, 0 }
  0x22   : > { %v400_v46 = vstv %s399_s11  ;;  %v3192_v56 = vsel %vm529_vm0, 0.0, %v565_v37  ;;  %v737_v60 = vrot.slane %v3185_v51, 1  ;;  %v739_v61 = vrot.slane %v3188_v52, 1  ;;  %s2564_s11 = sshll.u32 %s375_s15, 3 }
  0x23   : > { %v401_v50 = vmul.f32 %v400_v46, %v393_v42  ;;  %v402_v53 = vmul.f32 %v400_v46, %v394_v43  ;;  %v403_v54 = vmul.f32 %v400_v46, %v395_v44  ;;  %v946_v0 = vsel %vm901_vm1, %v943_v45, %v945_v49  ;;  %v439_v43 = vld [vmem:[%s3128_s13 + $0xb0] sm:$0xff]  ;;  %s411_s12 = scvt.s32.f32 %s3490_s18 }
  0x24   : > { %1026 = vrot.lane.b32.xlu1 %v942_v38, %s3041_s7  ;;  %815 = vrot.lane.b32.xlu0 %v731_v39, %s3042_s8  ;;  %v944_v1 = vsel %vm901_vm1, %v941_v29, %v943_v45  ;;  %v736_v2 = vrot.slane %v3192_v56, 1  ;;  %v740_v8 = vsel %vm690_vm2, %v737_v60, %v739_v61  ;;  %v947_v9 = vrot.slane %v3192_v56, 2 }
  0x25   : > { %v449_v57 = vmax.f32 %v401_v50, 0.0  ;;  %v450_v58 = vmax.f32 %v402_v53, 0.0  ;;  %v451_v59 = vmax.f32 %v403_v54, 0.0  ;;  %v948_v10 = vrot.slane %v3185_v51, 2  ;;  %v417_v54 = vld [vmem:[%s3128_s13] sm:$0xff] }
  0x26   : > { %v738_v11 = vsel %vm690_vm2, %v736_v2, %v737_v60  ;;  %v570_v14 = vrot.slane %v472_v63, 7  ;;  %v404_v16 = vmul.f32 %v400_v46, %v396_v7  ;;  %v950_v17 = vrot.slane %v3188_v52, 2  ;;  %v419_v2 = vld [vmem:[%s3128_s13 + $0x10] sm:$0xff] }
  0x27   : > { %v530_v62 = vrot.slane %v449_v57, 7  ;;  %v531_v3 = vrot.slane %v450_v58, 7  ;;  %v533_v5 = vrot.slane %v451_v59, 7  ;;  %v949_v18 = vsel %vm901_vm1, %v947_v9, %v948_v10 }
  0x28   : > { %819 = vrot.lane.b32.xlu1 %v735_v47, %s3042_s8  ;;  %817 = vrot.lane.b32.xlu0 %v733_v48, %s3042_s8  ;;  %v3226_v24 = vsel %vm529_vm0, %v568_v41, %v570_v14  ;;  %v452_v25 = vmax.f32 %v404_v16, 0.0  ;;  %v951_v26 = vsel %vm901_vm1, %v948_v10, %v950_v17  ;;  %v665_v32 = vsel %vm529_vm0, %v570_v14, 0.0  ;;  %v440_v14 = vld [vmem:[%s3128_s13 + $0xb8] sm:$0xff] }
  0x29   : > { %v3202_v4 = vsel %vm529_vm0, 0.0, %v530_v62  ;;  %v3205_v6 = vsel %vm529_vm0, %v530_v62, %v531_v3  ;;  %v3217_v15 = vsel %vm529_vm0, %v531_v3, %v533_v5  ;;  %v741_v27 = vrot.slane %v3226_v24, 1 }
  0x2a   : > { %v691_v12 = vrot.slane %v3202_v4, 1  ;;  %v692_v13 = vrot.slane %v3205_v6, 1  ;;  %v694_v20 = vrot.slane %v3217_v15, 1  ;;  %v902_v29 = vrot.slane %v3202_v4, 2 }
  0x2b   : > { %v903_v30 = vrot.slane %v3205_v6, 2  ;;  %v535_v33 = vrot.slane %v452_v25, 7  ;;  %v742_v36 = vsel %vm690_vm2, %v739_v61, %v741_v27  ;;  %v743_v37 = vrot.slane %v665_v32, 1 }
  0x2c   : > { %1030 = vrot.lane.b32.xlu1 %v946_v0, %s3041_s7  ;;  %1028 = vrot.lane.b32.xlu0 %v944_v1, %s3041_s7  ;;  %v693_v19 = vsel %vm690_vm2, %v691_v12, %v692_v13  ;;  %v695_v28 = vsel %vm690_vm2, %v692_v13, %v694_v20  ;;  %v905_v39 = vrot.slane %v3217_v15, 2  ;;  %v473_v40 = vmax.f32 %v437_v34, 0.0 }
  0x2d   : > { %v904_v38 = vsel %vm901_vm1, %v902_v29, %v903_v30  ;;  %v474_v41 = vmax.f32 %v438_v35, 0.0  ;;  %v3249_v42 = vsel %vm529_vm0, %v533_v5, %v535_v33  ;;  %v744_v44 = vsel %vm690_vm2, %v741_v27, %v743_v37  ;;  %v420_v37 = vld [vmem:[%s3128_s13 + $0x18] sm:$0xff] }
  0x2e   : > { %v952_v45 = vrot.slane %v3226_v24, 2  ;;  %v906_v46 = vsel %vm901_vm1, %v903_v30, %v905_v39  ;;  %v696_v47 = vrot.slane %v3249_v42, 1  ;;  %v572_v48 = vrot.slane %v473_v40, 7 }
  0x2f   : > { %v573_v49 = vrot.slane %v474_v41, 7  ;;  %v660_v50 = vsel %vm529_vm0, %v535_v33, 0.0  ;;  %v475_v53 = vmax.f32 %v439_v43, 0.0  ;;  %v954_v57 = vrot.slane %v665_v32, 2 }
  0x30   : > { %823 = vrot.lane.b32.xlu1 %v740_v8, %s3042_s8  ;;  %821 = vrot.lane.b32.xlu0 %v738_v11, %s3042_s8  ;;  %v953_v58 = vsel %vm901_vm1, %v950_v17, %v952_v45  ;;  %v697_v59 = vsel %vm690_vm2, %v694_v20, %v696_v47  ;;  %v698_v60 = vrot.slane %v660_v50, 1  ;;  %v3277_v62 = vsel %vm529_vm0, 0.0, %v572_v48 }
  0x31   : > { %v3274_v61 = vsel %vm529_vm0, %v572_v48, %v573_v49  ;;  %v575_v63 = vrot.slane %v475_v53, 7  ;;  %v453_v0 = vmax.f32 %v417_v54, 0.0  ;;  %v454_v1 = vmax.f32 %v418_v55, 0.0  ;;  %v441_v54 = vld [vmem:[%s3128_s13 + $0xc0] sm:$0xff]  ;;  %v442_v55 = vld [vmem:[%s3128_s13 + $0xc8] sm:$0xff] }
  0x32   : > { %v955_v3 = vsel %vm901_vm1, %v952_v45, %v954_v57  ;;  %v699_v5 = vsel %vm690_vm2, %v696_v47, %v698_v60  ;;  %v907_v7 = vrot.slane %v3249_v42, 2  ;;  %v745_v8 = vrot.slane %v3277_v62, 1 }
  0x33   : > { %v746_v9 = vrot.slane %v3274_v61, 1  ;;  %v3288_v10 = vsel %vm529_vm0, %v573_v49, %v575_v63  ;;  %v537_v11 = vrot.slane %v453_v0, 7  ;;  %v538_v12 = vrot.slane %v454_v1, 7 }
  0x34   : > { %1032 = vrot.lane.b32.xlu0 %v949_v18, %s3041_s7  ;;  %781 = vrot.lane.b32.xlu1 %v693_v19, %s3042_s8  ;;  %v455_v13 = vmax.f32 %v419_v2, 0.0  ;;  %v909_v16 = vrot.slane %v660_v50, 2  ;;  %v908_v17 = vsel %vm901_vm1, %v905_v39, %v907_v7  ;;  %v748_v19 = vrot.slane %v3288_v10, 1  ;;  %v443_v2 = vld [vmem:[%s3128_s13 + $0xd0] sm:$0xff] }
  0x35   : > { %v747_v18 = vsel %vm690_vm2, %v745_v8, %v746_v9  ;;  %v3297_v20 = vsel %vm529_vm0, %v537_v11, %v538_v12  ;;  %v3300_v25 = vsel %vm529_vm0, 0.0, %v537_v11  ;;  %v476_v27 = vmax.f32 %v440_v14, 0.0  ;;  %v421_v14 = vld [vmem:[%s3128_s13 + $0x20] sm:$0xff] }
  0x36   : > { %v956_v29 = vrot.slane %v3277_v62, 2  ;;  %v749_v30 = vsel %vm690_vm2, %v746_v9, %v748_v19  ;;  %v957_v32 = vrot.slane %v3274_v61, 2  ;;  %v700_v33 = vrot.slane %v3300_v25, 1 }
  0x37   : > { %v701_v34 = vrot.slane %v3297_v20, 1  ;;  %v959_v40 = vrot.slane %v3288_v10, 2  ;;  %v911_v45 = vrot.slane %v3300_v25, 2  ;;  %v912_v48 = vrot.slane %v3297_v20, 2 }
  0x38   : > { %1034 = vrot.lane.b32.xlu0 %v951_v26, %s3041_s7  ;;  %783 = vrot.lane.b32.xlu1 %v695_v28, %s3042_s8  ;;  %v540_v26 = vrot.slane %v455_v13, 7  ;;  %v910_v28 = vsel %vm901_vm1, %v907_v7, %v909_v16  ;;  %v477_v0 = vmax.f32 %v441_v54, 0.0  ;;  %v478_v1 = vmax.f32 %v442_v55, 0.0  ;;  %v422_v16 = vld [vmem:[%s3128_s13 + $0x28] sm:$0xff] }
  0x39   : > { %v702_v39 = vsel %vm690_vm2, %v700_v33, %v701_v34  ;;  %v913_v57 = vsel %vm901_vm1, %v911_v45, %v912_v48  ;;  %v479_v13 = vmax.f32 %v443_v2, 0.0  ;;  %v423_v33 = vld [vmem:[%s3128_s13 + $0x30] sm:$0xff] }
  0x3a   : > { %v3311_v35 = vsel %vm529_vm0, %v538_v12, %v540_v26  ;;  %v579_v11 = vrot.slane %v477_v0, 7  ;;  %v580_v12 = vrot.slane %v478_v1, 7  ;;  %v459_v45 = vmax.f32 %v423_v33, 0.0 }
  0x3b   : > { %v703_v41 = vrot.slane %v3311_v35, 1 }
  0x3c   : > { %992 = vrot.lane.b32.xlu0 %v904_v38, %s3041_s7  ;;  %825 = vrot.lane.b32.xlu1 %v742_v36, %s3042_s8  ;;  %v577_v36 = vrot.slane %v476_v27, 7  ;;  %v958_v38 = vsel %vm901_vm1, %v956_v29, %v957_v32  ;;  %v457_v27 = vmax.f32 %v421_v14, 0.0  ;;  %v3359_v29 = vsel %vm529_vm0, 0.0, %v579_v11 }
  0x3d   : > { %v704_v47 = vsel %vm690_vm2, %v701_v34, %v703_v41  ;;  %v965_v1 = vrot.slane %v3359_v29, 2 }
  0x3e   : > { %v3321_v43 = vsel %vm529_vm0, %v575_v63, %v577_v36  ;;  %v666_v50 = vsel %vm529_vm0, %v577_v36, 0.0 }
  0x3f   : > { %v750_v49 = vrot.slane %v3321_v43, 1  ;;  %v752_v60 = vrot.slane %v666_v50, 1  ;;  %v961_v7 = vrot.slane %v3321_v43, 2 }
  0x40   : > { %994 = vrot.lane.b32.xlu0 %v906_v46, %s3041_s7  ;;  %827 = vrot.lane.b32.xlu1 %v744_v44, %s3042_s8  ;;  %v456_v44 = vmax.f32 %v420_v37, 0.0  ;;  %v960_v46 = vsel %vm901_vm1, %v957_v32, %v959_v40  ;;  %v458_v32 = vmax.f32 %v422_v16, 0.0 }
  0x42   : > { %v542_v53 = vrot.slane %v456_v44, 7  ;;  %v545_v44 = vrot.slane %v458_v32, 7  ;;  %v2638_v32 = vld [vmem:[%s4124_s3 + $0x38] sm:$0xff] }
  0x44   : > { %1036 = vrot.lane.b32.xlu0 %v953_v58, %s3041_s7  ;;  %785 = vrot.lane.b32.xlu1 %v697_v59, %s3042_s8  ;;  %v751_v58 = vsel %vm690_vm2, %v748_v19, %v750_v49  ;;  %v914_v59 = vrot.slane %v3311_v35, 2  ;;  %v3339_v63 = vsel %vm529_vm0, %v540_v26, %v542_v53  ;;  %v661_v9 = vsel %vm529_vm0, %v542_v53, 0.0 }
  0x45   : > { %v705_v8 = vrot.slane %v3339_v63, 1  ;;  %v707_v26 = vrot.slane %v661_v9, 1  ;;  %v916_v34 = vrot.slane %v3339_v63, 2 }
  0x47   : > { %v706_v19 = vsel %vm690_vm2, %v703_v41, %v705_v8  ;;  %v708_v37 = vsel %vm690_vm2, %v705_v8, %v707_v26  ;;  %v544_v41 = vrot.slane %v457_v27, 7  ;;  %v2637_v27 = vld [vmem:[%s4124_s3 + $0x30] sm:$0xff] }
  0x48   : > { %1038 = vrot.lane.b32.xlu0 %v955_v3, %s3041_s7  ;;  %787 = vrot.lane.b32.xlu1 %v699_v5, %s3042_s8  ;;  %v915_v3 = vsel %vm901_vm1, %v912_v48, %v914_v59  ;;  %v753_v5 = vsel %vm690_vm2, %v750_v49, %v752_v60  ;;  %v2602_v48 = vld [vmem:[%s4124_s3 + $0x18] sm:$0xff]  ;;  %v2603_v49 = vld [vmem:[%s4124_s3 + $0x20] sm:$0xff]  ;;  %v547_v60 = vrot.slane %v459_v45, 7 }
  0x49   : > { %v3384_v55 = vpack.c.bf16 %v2603_v49, %v2602_v48  ;;  %v426_v48 = vld [vmem:[%s3128_s13 + $0x48] sm:$0xff]  ;;  %v427_v49 = vld [vmem:[%s3128_s13 + $0x50] sm:$0xff] }
  0x4a   : > { %v3402_v8 = vsel %vm529_vm0, %v545_v44, %v547_v60 }
  0x4b   : > { %2948 = vmatprep.subr.bf16.mxu1 %v3384_v55  ;;  %v712_v16 = vrot.slane %v3402_v8, 1 }
  0x4c   : > { %996 = vrot.lane.b32.xlu0 %v908_v17, %s3041_s7  ;;  %829 = vrot.lane.b32.xlu1 %v747_v18, %s3042_s8  ;;  %v963_v17 = vrot.slane %v666_v50, 2  ;;  %v962_v18 = vsel %vm901_vm1, %v959_v40, %v961_v7  ;;  %v917_v50 = vsel %vm901_vm1, %v914_v59, %v916_v34 }
  0x4e   : > { %v964_v36 = vsel %vm901_vm1, %v961_v7, %v963_v17 }
  0x50   : > { %998 = vrot.lane.b32.xlu0 %v910_v28, %s3041_s7  ;;  %831 = vrot.lane.b32.xlu1 %v749_v30, %s3042_s8  ;;  %v3356_v28 = vsel %vm529_vm0, %v579_v11, %v580_v12  ;;  %v582_v30 = vrot.slane %v479_v13, 7  ;;  %v424_v11 = vld [vmem:[%s3128_s13 + $0x38] sm:$0xff] }
  0x52   : > { %v3370_v40 = vsel %vm529_vm0, %v580_v12, %v582_v30 }
  0x53   : > { %v757_v54 = vrot.slane %v3370_v40, 1  ;;  %v968_v12 = vrot.slane %v3370_v40, 2 }
  0x54   : > { %1040 = vrot.lane.b32.xlu0 %v958_v38, %s3041_s7  ;;  %789 = vrot.lane.b32.xlu1 %v702_v39, %s3042_s8  ;;  %v754_v38 = vrot.slane %v3359_v29, 1  ;;  %v755_v39 = vrot.slane %v3356_v28, 1 }
  0x56   : > { %v756_v53 = vsel %vm690_vm2, %v754_v38, %v755_v39  ;;  %v758_v2 = vsel %vm690_vm2, %v755_v39, %v757_v54 }
  0x58   : > { %1042 = vrot.lane.b32.xlu0 %v960_v46, %s3041_s7  ;;  %791 = vrot.lane.b32.xlu1 %v704_v47, %s3042_s8  ;;  %v444_v46 = vld [vmem:[%s3128_s13 + $0xd8] sm:$0xff]  ;;  %v918_v47 = vrot.slane %v661_v9, 2 }
  0x59   : > { %v480_v0 = vmax.f32 %v444_v46, 0.0 }
  0x5a   : > { %v919_v59 = vsel %vm901_vm1, %v916_v34, %v918_v47  ;;  %v425_v47 = vld [vmem:[%s3128_s13 + $0x40] sm:$0xff] }
  0x5b   : > { %v584_v9 = vrot.slane %v480_v0, 7 }
  0x5c   : > { %1000 = vrot.lane.b32.xlu0 %v913_v57, %s3041_s7  ;;  %833 = vrot.lane.b32.xlu1 %v751_v58, %s3042_s8  ;;  %v3387_v57 = vsel %vm529_vm0, %v544_v41, %v545_v44  ;;  %v3390_v58 = vsel %vm529_vm0, 0.0, %v544_v41  ;;  %v923_v44 = vrot.slane %v3402_v8, 2 }
  0x5d   : > { %v710_v7 = vrot.slane %v3387_v57, 1  ;;  %v3412_v17 = vsel %vm529_vm0, %v582_v30, %v584_v9  ;;  %v920_v26 = vrot.slane %v3390_v58, 2  ;;  %v921_v33 = vrot.slane %v3387_v57, 2 }
  0x5e   : > { %v759_v34 = vrot.slane %v3412_v17, 1 }
  0x5f   : > { %v713_v30 = vsel %vm690_vm2, %v710_v7, %v712_v16  ;;  %v922_v39 = vsel %vm901_vm1, %v920_v26, %v921_v33 }
  0x60   : > { %1002 = vrot.lane.b32.xlu0 %v915_v3, %s3041_s7  ;;  %835 = vrot.lane.b32.xlu1 %v753_v5, %s3042_s8  ;;  %v966_v3 = vrot.slane %v3356_v28, 2  ;;  %v709_v5 = vrot.slane %v3390_v58, 1  ;;  %v760_v41 = vsel %vm690_vm2, %v757_v54, %v759_v34  ;;  %v970_v54 = vrot.slane %v3412_v17, 2 }
  0x62   : > { %v967_v13 = vsel %vm901_vm1, %v965_v1, %v966_v3  ;;  %v711_v14 = vsel %vm690_vm2, %v709_v5, %v710_v7  ;;  %v462_v1 = vmax.f32 %v426_v48, 0.0  ;;  %v446_v48 = vld [vmem:[%s3128_s13 + $0xe8] sm:$0xff] }
  0x64   : > { %1044 = vrot.lane.b32.xlu0 %v962_v18, %s3041_s7  ;;  %793 = vrot.lane.b32.xlu1 %v706_v19, %s3042_s8  ;;  %v460_v18 = vmax.f32 %v424_v11, 0.0  ;;  %v969_v19 = vsel %vm901_vm1, %v966_v3, %v968_v12  ;;  %v971_v3 = vsel %vm901_vm1, %v968_v12, %v970_v54 }
  0x66   : > { %v549_v38 = vrot.slane %v460_v18, 7  ;;  %v428_v18 = vld [vmem:[%s3128_s13 + $0x58] sm:$0xff] }
  0x68   : > { %1046 = vrot.lane.b32.xlu0 %v964_v36, %s3041_s7  ;;  %795 = vrot.lane.b32.xlu1 %v708_v37, %s3042_s8  ;;  %v3427_v36 = vpack.c.bf16 %v2638_v32, %v2637_v27  ;;  %v667_v37 = vsel %vm529_vm0, %v584_v9, 0.0  ;;  %v3437_v46 = vsel %vm529_vm0, %v547_v60, %v549_v38  ;;  %v461_v60 = vmax.f32 %v425_v47, 0.0 }
  0x69   : > { %v761_v45 = vrot.slane %v667_v37, 1  ;;  %v714_v0 = vrot.slane %v3437_v46, 1  ;;  %v972_v7 = vrot.slane %v667_v37, 2 }
  0x6a   : > { %2952 = vmatprep.subr.bf16.mxu0 %v3427_v36  ;;  %v551_v11 = vrot.slane %v461_v60, 7  ;;  %v482_v60 = vmax.f32 %v446_v48, 0.0 }
  0x6b   : > { %v715_v5 = vsel %vm690_vm2, %v712_v16, %v714_v0  ;;  %v973_v26 = vsel %vm901_vm1, %v970_v54, %v972_v7 }
  0x6c   : > { %1004 = vrot.lane.b32.xlu0 %v917_v50, %s3041_s7  ;;  %837 = vrot.lane.b32.xlu1 %v756_v53, %s3042_s8  ;;  %v924_v50 = vsel %vm901_vm1, %v921_v33, %v923_v44  ;;  %v762_v53 = vsel %vm690_vm2, %v759_v34, %v761_v45  ;;  %v3463_v32 = vsel %vm529_vm0, 0.0, %v551_v11  ;;  %v464_v33 = vmax.f32 %v428_v18, 0.0  ;;  %v445_v45 = vld [vmem:[%s3128_s13 + $0xe0] sm:$0xff] }
  0x6e   : > { %v556_v47 = vrot.slane %v464_v33, 7 }
  0x70   : > { %1006 = vrot.lane.b32.xlu0 %v919_v59, %s3041_s7  ;;  %839 = vrot.lane.b32.xlu1 %v758_v2, %s3042_s8  ;;  %v662_v59 = vsel %vm529_vm0, %v549_v38, 0.0  ;;  %v463_v2 = vmax.f32 %v427_v49, 0.0  ;;  %v718_v38 = vrot.slane %v3463_v32, 1  ;;  %v447_v49 = vld [vmem:[%s3128_s13 + $0xf0] sm:$0xff] }
  0x71   : > { %v716_v9 = vrot.slane %v662_v59, 1  ;;  %v927_v16 = vrot.slane %v662_v59, 2 }
  0x73   : > { %v717_v12 = vsel %vm690_vm2, %v714_v0, %v716_v9 }
  0x74   : > { %1048 = vrot.lane.b32.xlu0 %v967_v13, %s3041_s7  ;;  %797 = vrot.lane.b32.xlu1 %v711_v14, %s3042_s8  ;;  %v552_v13 = vrot.slane %v462_v1, 7  ;;  %v554_v14 = vrot.slane %v463_v2, 7  ;;  %v663_v2 = vsel %vm529_vm0, %v556_v47, 0.0 }
  0x76   : > { %v3460_v27 = vsel %vm529_vm0, %v551_v11, %v552_v13  ;;  %v3487_v1 = vsel %vm529_vm0, %v554_v14, %v556_v47 }
  0x77   : > { %v723_v11 = vrot.slane %v3487_v1, 1 }
  0x78   : > { %1050 = vrot.lane.b32.xlu0 %v969_v19, %s3041_s7  ;;  %799 = vrot.lane.b32.xlu1 %v713_v30, %s3042_s8  ;;  %v925_v19 = vrot.slane %v3437_v46, 2  ;;  %v3466_v30 = vsel %vm529_vm0, %v552_v13, %v554_v14  ;;  %v725_v13 = vrot.slane %v663_v2, 1  ;;  %v587_v14 = vrot.slane %v482_v60, 7 }
  0x79   : > { %v932_v59 = vrot.slane %v3466_v30, 2 }
  0x7a   : > { %v926_v34 = vsel %vm901_vm1, %v923_v44, %v925_v19  ;;  %v928_v37 = vsel %vm901_vm1, %v925_v19, %v927_v16  ;;  %v930_v44 = vrot.slane %v3460_v27, 2 }
  0x7c   : > { %1008 = vrot.lane.b32.xlu0 %v922_v39, %s3041_s7  ;;  %841 = vrot.lane.b32.xlu1 %v760_v41, %s3042_s8  ;;  %v719_v39 = vrot.slane %v3460_v27, 1  ;;  %v721_v41 = vrot.slane %v3466_v30, 1  ;;  %v933_v9 = vsel %vm901_vm1, %v930_v44, %v932_v59 }
  0x7e   : > { %v720_v54 = vsel %vm690_vm2, %v718_v38, %v719_v39  ;;  %v722_v0 = vsel %vm690_vm2, %v719_v39, %v721_v41  ;;  %v726_v39 = vsel %vm690_vm2, %v723_v11, %v725_v13 }
  0x80   : > { %1010 = vrot.lane.b32.xlu0 %v924_v50, %s3041_s7  ;;  %843 = vrot.lane.b32.xlu1 %v762_v53, %s3042_s8  ;;  %v929_v50 = vrot.slane %v3463_v32, 2  ;;  %v481_v53 = vmax.f32 %v445_v45, 0.0 }
  0x82   : > { %v586_v7 = vrot.slane %v481_v53, 7 }
  0x84   : > { %1052 = vrot.lane.b32.xlu0 %v971_v3, %s3041_s7  ;;  %801 = vrot.lane.b32.xlu1 %v715_v5, %s3042_s8  ;;  %v483_v3 = vmax.f32 %v447_v49, 0.0  ;;  %v931_v5 = vsel %vm901_vm1, %v929_v50, %v930_v44  ;;  %v3511_v38 = vsel %vm529_vm0, 0.0, %v586_v7  ;;  %v3523_v45 = vsel %vm529_vm0, %v586_v7, %v587_v14 }
  0x85   : > { %v763_v60 = vrot.slane %v3511_v38, 1 }
  0x88   : > { %1054 = vrot.lane.b32.xlu0 %v973_v26, %s3041_s7  ;;  %803 = vrot.lane.b32.xlu1 %v717_v12, %s3042_s8  ;;  %v589_v26 = vrot.slane %v483_v3, 7  ;;  %v448_v12 = vld [vmem:[%s3128_s13 + $0xf8] sm:$0xff]  ;;  %s3516_s13 = scalar_lea.vmem %s4123_s2, %s2564_s11 }
  0x89   : > { %v484_v47 = vmax.f32 %v448_v12, 0.0  ;;  %v405_v53 = vld [vmem:[%s3516_s13] sm:$0xff]  ;;  %v407_v3 = vld [vmem:[%s3516_s13 + $0x10] sm:$0xff] }
  0x8a   : > { %v3526_v50 = vsel %vm529_vm0, %v587_v14, %v589_v26 }
  0x8c   : > { %1012 = vrot.lane.b32.xlu0 %v926_v34, %s3041_s7  ;;  %1014 = vrot.lane.b32.xlu1 %v928_v37, %s3041_s7  ;;  %v934_v34 = vrot.slane %v3487_v1, 2  ;;  %v936_v37 = vrot.slane %v663_v2, 2  ;;  %v764_v2 = vrot.slane %v3523_v45, 1 }
  0x8e   : > { %v937_v7 = vsel %vm901_vm1, %v934_v34, %v936_v37 }
  0x90   : > { %805 = vrot.lane.b32.xlu0 %v720_v54, %s3042_s8  ;;  %807 = vrot.lane.b32.xlu1 %v722_v0, %s3042_s8  ;;  %v406_v54 = vld [vmem:[%s3516_s13 + $0x8] sm:$0xff]  ;;  %v412_v0 = vstv %s411_s12 }
  0x91   : > { %v415_v12 = vmul.f32 %v412_v0, %v407_v3  ;;  %v408_v3 = vld [vmem:[%s3516_s13 + $0x18] sm:$0xff] }
  0x92   : > { %v1025_v18 = vpop.permute.xlu1 %1024  ;;  %v814_v19 = vpop.permute.xlu0 %813 }
  0x93   : > { %v1129_v16 = vsel %vm1112_vm3, %v3146_v22, %v814_v19  ;;  %v724_v22 = vsel %vm690_vm2, %v721_v41, %v723_v11  ;;  %v591_v11 = vrot.slane %v484_v47, 7  ;;  %v414_v19 = vmul.f32 %v412_v0, %v406_v54 }
  0x94   : > { %1016 = vrot.lane.b32.xlu0 %v931_v5, %s3041_s7  ;;  %1018 = vrot.lane.b32.xlu1 %v933_v9, %s3041_s7  ;;  %v3507_v33 = vsel %vm1153_vm4, %v1129_v16, %v1025_v18  ;;  %v2604_v5 = vld [vmem:[%s4124_s3 + $0x28] sm:$0xff]  ;;  %v766_v9 = vrot.slane %v3526_v50, 1  ;;  %v413_v18 = vmul.f32 %v412_v0, %v405_v53  ;;  %v765_v16 = vsel %vm690_vm2, %v763_v60, %v764_v2 }
  0x95   : > { %2811 = vmatprep.mubr.msk.f32.mxu1 %vm1268_vm5, %v3507_v33  ;;  %v486_v54 = vmax.f32 %v414_v19, 0.0 }
  0x96   : > { %v1027_v48 = vpop.permute.xlu1 %1026  ;;  %v816_v49 = vpop.permute.xlu0 %815  ;;  %v767_v37 = vsel %vm690_vm2, %v764_v2, %v766_v9  ;;  %v485_v53 = vmax.f32 %v413_v18, 0.0  ;;  %v416_v18 = vmul.f32 %v412_v0, %v408_v3 }
  0x97   : > { %v1130_v44 = vsel %vm1112_vm3, %v3143_v21, %v816_v49  ;;  %v935_v21 = vsel %vm901_vm1, %v932_v59, %v934_v34  ;;  %v974_v59 = vrot.slane %v3511_v38, 2  ;;  %v975_v34 = vrot.slane %v3523_v45, 2 }
  0x98   : > { %809 = vrot.lane.b32.xlu0 %v724_v22, %s3042_s8  ;;  %811 = vrot.lane.b32.xlu1 %v726_v39, %s3042_s8  ;;  %v3535_v41 = vsel %vm1153_vm4, %v1130_v44, %v1027_v48  ;;  %v977_v22 = vrot.slane %v3526_v50, 2  ;;  %v3557_v39 = vsel %vm529_vm0, %v589_v26, %v591_v11  ;;  %v487_v26 = vmax.f32 %v415_v12, 0.0 }
  0x99   : > { %2812 = vmatmul.mubr.msk.f32.vlgmr.msra.gmra.mrb[0].mxu1 %vm1268_vm5, %v3535_v41 }
  0x9a   : > { %v820_v13 = vpop.permute.xlu1 %819  ;;  %v818_v14 = vpop.permute.xlu0 %817  ;;  %2950 = vmatpush3.bf16.msra.mxu1 %v3384_v55  ;;  %v668_v55 = vsel %vm529_vm0, %v591_v11, 0.0  ;;  %v978_v11 = vsel %vm901_vm1, %v975_v34, %v977_v22  ;;  %v596_v19 = vrot.slane %v487_v26, 7 }
  0x9b   : > { %2839 = vmatprep.subr.mxu1 %v2604_v5  ;;  %v1132_v47 = vsel %vm1112_vm3, %v3159_v31, %v820_v13  ;;  %v1131_v48 = vsel %vm1112_vm3, %v3149_v23, %v818_v14  ;;  %v976_v23 = vsel %vm901_vm1, %v974_v59, %v975_v34  ;;  %v768_v31 = vrot.slane %v3557_v39, 1 }
  0x9c   : > { %1020 = vrot.lane.b32.xlu0 %v935_v21, %s3041_s7  ;;  %1022 = vrot.lane.b32.xlu1 %v937_v7, %s3041_s7  ;;  %v593_v13 = vrot.slane %v485_v53, 7  ;;  %v594_v14 = vrot.slane %v486_v54, 7  ;;  %v979_v59 = vrot.slane %v3557_v39, 2 }
  0x9d   : > { %v769_v12 = vsel %vm690_vm2, %v766_v9, %v768_v31 }
  0x9e   : > { %v1031_v49 = vpop.permute.xlu1 %1030  ;;  %v1029_v44 = vpop.permute.xlu0 %1028  ;;  %2840 = vmatpush3.msra.mxu1 %v2604_v5  ;;  %v770_v5 = vrot.slane %v668_v55, 1  ;;  %v3591_v0 = vsel %vm529_vm0, 0.0, %v593_v13  ;;  %v3597_v9 = vsel %vm529_vm0, %v594_v14, %v596_v19 }
  0x9f   : > { %v3565_v60 = vsel %vm1153_vm4, %v1132_v47, %v1031_v49  ;;  %v3568_v2 = vsel %vm1153_vm4, %v1131_v48, %v1029_v44  ;;  %v3588_v49 = vsel %vm529_vm0, %v593_v13, %v594_v14  ;;  %v488_v44 = vmax.f32 %v416_v18, 0.0 }
  0xa0   : > { %2814 = vmatprep.mubr.msk.f32.mxu1 %vm1268_vm5, %v3568_v2  ;;  %845 = vrot.lane.b32.xlu0 %v765_v16, %s3042_s8  ;;  %v771_v16 = vsel %vm690_vm2, %v768_v31, %v770_v5  ;;  %v773_v54 = vrot.slane %v3588_v49, 1  ;;  %v775_v5 = vrot.slane %v3597_v9, 1 }
  0xa1   : > { %2815 = vmatmul.mubr.msk.f32.gmra.mrb[2].mxu1 %vm1268_vm5, %v3565_v60  ;;  %847 = vrot.lane.b32.xlu1 %v767_v37, %s3042_s8  ;;  %v981_v37 = vrot.slane %v668_v55, 2  ;;  %v772_v55 = vrot.slane %v3591_v0, 1 }
  0xa2   : > { %v824_v21 = vpop.permute.xlu1 %823  ;;  %v822_v7 = vpop.permute.xlu0 %821 }
  0xa3   : > { %v1133_v47 = vsel %vm1112_vm3, %v3192_v56, %v822_v7  ;;  %v980_v56 = vsel %vm901_vm1, %v977_v22, %v979_v59  ;;  %v1134_v26 = vsel %vm1112_vm3, %v3185_v51, %v824_v21  ;;  %v982_v31 = vsel %vm901_vm1, %v979_v59, %v981_v37 }
  0xa4   : > { %1056 = vrot.lane.b32.xlu0 %v976_v23, %s3041_s7  ;;  %v598_v7 = vrot.slane %v488_v44, 7  ;;  %v774_v22 = vsel %vm690_vm2, %v772_v55, %v773_v54  ;;  %v983_v51 = vrot.slane %v3591_v0, 2  ;;  %v984_v21 = vrot.slane %v3588_v49, 2 }
  0xa5   : > { %1058 = vrot.lane.b32.xlu1 %v978_v11, %s3041_s7 }
  0xa6   : > { %v1033_v48 = vpop.permute.xlu0 %1032  ;;  %v782_v34 = vpop.permute.xlu1 %781  ;;  %v3625_v59 = vsel %vm529_vm0, %v596_v19, %v598_v7 }
  0xa7   : > { %v3594_v53 = vsel %vm1153_vm4, %v1133_v47, %v1033_v48  ;;  %v1113_v13 = vsel %vm1112_vm3, %v3202_v4, %v782_v34  ;;  %v669_v47 = vsel %vm529_vm0, %v598_v7, 0.0  ;;  %v985_v4 = vsel %vm901_vm1, %v983_v51, %v984_v21 }
  0xa8   : > { %2817 = vmatprep.mubr.msk.f32.mxu1 %vm1268_vm5, %v3594_v53  ;;  %849 = vrot.lane.b32.xlu0 %v769_v12, %s3042_s8  ;;  %v776_v12 = vsel %vm690_vm2, %v773_v54, %v775_v5  ;;  %v777_v48 = vrot.slane %v3625_v59, 1  ;;  %v779_v55 = vrot.slane %v669_v47, 1  ;;  %v990_v51 = vrot.slane %v669_v47, 2 }
  0xa9   : > { %851 = vrot.lane.b32.xlu1 %v771_v16, %s3042_s8  ;;  %v986_v16 = vrot.slane %v3597_v9, 2 }
  0xaa   : > { %v1035_v3 = vpop.permute.xlu0 %1034  ;;  %v784_v23 = vpop.permute.xlu1 %783 }
  0xab   : > { %v3611_v11 = vsel %vm1153_vm4, %v1134_v26, %v1035_v3  ;;  %v1114_v34 = vsel %vm1112_vm3, %v3205_v6, %v784_v23  ;;  %v2639_v26 = vld [vmem:[%s4124_s3 + $0x40] sm:$0xff]  ;;  %v778_v3 = vsel %vm690_vm2, %v775_v5, %v777_v48  ;;  %v988_v6 = vrot.slane %v3625_v59, 2 }
  0xac   : > { %2818 = vmatmul.mubr.msk.f32.gmra.mrb[4].mxu1 %vm1268_vm5, %v3611_v11  ;;  %1060 = vrot.lane.b32.xlu0 %v980_v56, %s3041_s7  ;;  %v987_v56 = vsel %vm901_vm1, %v984_v21, %v986_v16 }
  0xad   : > { %1062 = vrot.lane.b32.xlu1 %v982_v31, %s3041_s7 }
  0xae   : > { %v993_v14 = vpop.permute.xlu0 %992  ;;  %v826_v18 = vpop.permute.xlu1 %825 }
  0xaf   : > { %v1154_v37 = vsel %vm1153_vm4, %v1113_v13, %v993_v14  ;;  %v1135_v23 = vsel %vm1112_vm3, %v3188_v52, %v826_v18  ;;  %v991_v14 = vsel %vm901_vm1, %v988_v6, %v990_v51 }
  0xb0   : > { %2787 = vmatprep.mubr.msk.f32.mxu0 %vm1268_vm5, %v1154_v37  ;;  %853 = vrot.lane.b32.xlu0 %v774_v22, %s3042_s8  ;;  %v780_v22 = vsel %vm690_vm2, %v777_v48, %v779_v55 }
  0xb1   : > { %855 = vrot.lane.b32.xlu1 %v776_v12, %s3042_s8 }
  0xb2   : > { %v995_v44 = vpop.permute.xlu0 %994  ;;  %v828_v19 = vpop.permute.xlu1 %827 }
  0xb3   : > { %v1155_v54 = vsel %vm1153_vm4, %v1114_v34, %v995_v44  ;;  %v1136_v52 = vsel %vm1112_vm3, %v3226_v24, %v828_v19 }
  0xb4   : > { %2788 = vmatmul.mubr.msk.f32.vlgmr.msra.gmra.mrb[0].mxu0 %vm1268_vm5, %v1155_v54  ;;  %1064 = vrot.lane.b32.xlu0 %v985_v4, %s3041_s7 }
  0xb5   : > { %1066 = vrot.lane.b32.xlu1 %v987_v56, %s3041_s7  ;;  %2954 = vmatpush3.bf16.msra.mxu0 %v3427_v36  ;;  %v989_v36 = vsel %vm901_vm1, %v986_v16, %v988_v6 }
  0xb6   : > { %v1037_v31 = vpop.permute.xlu0 %1036  ;;  %v786_v7 = vpop.permute.xlu1 %785  ;;  %2893 = vmatprep.subr.mxu0 %v2639_v26 }
  0xb7   : > { %v3651_v21 = vsel %vm1153_vm4, %v1135_v23, %v1037_v31  ;;  %v1115_v12 = vsel %vm1112_vm3, %v3217_v15, %v786_v7 }
  0xb8   : > { %2820 = vmatprep.mubr.msk.f32.mxu1 %vm1268_vm5, %v3651_v21  ;;  %857 = vrot.lane.b32.xlu0 %v778_v3, %s3042_s8 }
  0xb9   : > { %859 = vrot.lane.b32.xlu1 %v780_v22, %s3042_s8  ;;  %2894 = vmatpush3.msra.mxu0 %v2639_v26 }
  0xba   : > { %v1039_v5 = vpop.permute.xlu0 %1038  ;;  %v788_v13 = vpop.permute.xlu1 %787 }
  0xbb   : > { %v3662_v18 = vsel %vm1153_vm4, %v1136_v52, %v1039_v5  ;;  %v1116_v47 = vsel %vm1112_vm3, %v3249_v42, %v788_v13 }
  0xbc   : > { %2821 = vmatmul.mubr.msk.f32.gmra.mrb[6].mxu1 %vm1268_vm5, %v3662_v18  ;;  %1068 = vrot.lane.b32.xlu0 %v989_v36, %s3041_s7 }
  0xbd   : > { %1070 = vrot.lane.b32.xlu1 %v991_v14, %s3041_s7 }
  0xbe   : > { %v997_v16 = vpop.permute.xlu0 %996  ;;  %v830_v37 = vpop.permute.xlu1 %829 }
  0xbf   : > { %v1156_v24 = vsel %vm1153_vm4, %v1115_v12, %v997_v16  ;;  %v1137_v44 = vsel %vm1112_vm3, %v3277_v62, %v830_v37 }
  0xc0   : > { %2790 = vmatprep.mubr.msk.f32.mxu0 %vm1268_vm5, %v1156_v24 }
  0xc2   : > { %v999_v4 = vpop.permute.xlu0 %998  ;;  %v832_v48 = vpop.permute.xlu1 %831 }
  0xc3   : > { %v1157_v34 = vsel %vm1153_vm4, %v1116_v47, %v999_v4  ;;  %v1138_v42 = vsel %vm1112_vm3, %v3274_v61, %v832_v48  ;;  %v2569_v61 = vld [vmem:[%s4125_s4] ss:$0 sm:$0xff] }
  0xc4   : > { %2791 = vmatmul.mubr.msk.f32.gmra.mrb[2].mxu0 %vm1268_vm5, %v1157_v34  ;;  %1218 = vst.msk [vmem:[#allocation2 + $0x88] sm:$0xff] %vm1112_vm3, %v2569_v61  ;;  %1201 = vst.msk [vmem:[#allocation2] sm:$0xff] %vm1112_vm3, %v2569_v61 }
  0xc5   : > { %1202 = vst.msk [vmem:[#allocation2 + $0x8] sm:$0xff] %vm1112_vm3, %v2569_v61  ;;  %1203 = vst.msk [vmem:[#allocation2 + $0x10] sm:$0xff] %vm1112_vm3, %v2569_v61 }
  0xc6   : > { %v1041_v19 = vpop.permute.xlu0 %1040  ;;  %v790_v15 = vpop.permute.xlu1 %789  ;;  %1204 = vst.msk [vmem:[#allocation2 + $0x18] sm:$0xff] %vm1112_vm3, %v2569_v61  ;;  %1205 = vst.msk [vmem:[#allocation2 + $0x20] sm:$0xff] %vm1112_vm3, %v2569_v61 }
  0xc7   : > { %v3679_v56 = vsel %vm1153_vm4, %v1137_v44, %v1041_v19  ;;  %v1117_v62 = vsel %vm1112_vm3, %v3300_v25, %v790_v15  ;;  %1206 = vst.msk [vmem:[#allocation2 + $0x28] sm:$0xff] %vm1112_vm3, %v2569_v61  ;;  %1207 = vst.msk [vmem:[#allocation2 + $0x30] sm:$0xff] %vm1112_vm3, %v2569_v61 }
  0xc8   : > { %2823 = vmatprep.mubr.msk.f32.mxu1 %vm1268_vm5, %v3679_v56  ;;  %1208 = vst.msk [vmem:[#allocation2 + $0x38] sm:$0xff] %vm1112_vm3, %v2569_v61  ;;  %1209 = vst.msk [vmem:[#allocation2 + $0x40] sm:$0xff] %vm1112_vm3, %v2569_v61 }
  0xc9   : > { %1210 = vst.msk [vmem:[#allocation2 + $0x48] sm:$0xff] %vm1112_vm3, %v2569_v61  ;;  %1211 = vst.msk [vmem:[#allocation2 + $0x50] sm:$0xff] %vm1112_vm3, %v2569_v61 }
  0xca   : > { %v1043_v55 = vpop.permute.xlu0 %1042  ;;  %v792_v54 = vpop.permute.xlu1 %791  ;;  %1212 = vst.msk [vmem:[#allocation2 + $0x58] sm:$0xff] %vm1112_vm3, %v2569_v61  ;;  %1213 = vst.msk [vmem:[#allocation2 + $0x60] sm:$0xff] %vm1112_vm3, %v2569_v61 }
  0xcb   : > { %v3686_v26 = vsel %vm1153_vm4, %v1138_v42, %v1043_v55  ;;  %v1118_v31 = vsel %vm1112_vm3, %v3297_v20, %v792_v54  ;;  %1214 = vst.msk [vmem:[#allocation2 + $0x68] sm:$0xff] %vm1112_vm3, %v2569_v61  ;;  %1215 = vst.msk [vmem:[#allocation2 + $0x70] sm:$0xff] %vm1112_vm3, %v2569_v61 }
  0xcc   : > { %2824 = vmatmul.mubr.msk.f32.gmra.mrb[8].mxu1 %vm1268_vm5, %v3686_v26  ;;  %1216 = vst.msk [vmem:[#allocation2 + $0x78] sm:$0xff] %vm1112_vm3, %v2569_v61  ;;  %1217 = vst.msk [vmem:[#allocation2 + $0x80] sm:$0xff] %vm1112_vm3, %v2569_v61 }
  0xcd   : > { %1219 = vst.msk [vmem:[#allocation2 + $0x90] sm:$0xff] %vm1112_vm3, %v2569_v61  ;;  %1220 = vst.msk [vmem:[#allocation2 + $0x98] sm:$0xff] %vm1112_vm3, %v2569_v61 }
  0xce   : > { %v1001_v3 = vpop.permute.xlu0 %1000  ;;  %v834_v6 = vpop.permute.xlu1 %833  ;;  %1221 = vst.msk [vmem:[#allocation2 + $0xa0] sm:$0xff] %vm1112_vm3, %v2569_v61  ;;  %1222 = vst.msk [vmem:[#allocation2 + $0xa8] sm:$0xff] %vm1112_vm3, %v2569_v61 }
  0xcf   : > { %v3693_v23 = vsel %vm1153_vm4, %v1117_v62, %v1001_v3  ;;  %1223 = vst.msk [vmem:[#allocation2 + $0xb0] sm:$0xff] %vm1112_vm3, %v2569_v61  ;;  %1224 = vst.msk [vmem:[#allocation2 + $0xb8] sm:$0xff] %vm1112_vm3, %v2569_v61  ;;  %v1139_v25 = vsel %vm1112_vm3, %v3288_v10, %v834_v6 }
  0xd0   : > { %2793 = vmatprep.mubr.msk.f32.mxu0 %vm1268_vm5, %v3693_v23  ;;  %1225 = vst.msk [vmem:[#allocation2 + $0xc0] sm:$0xff] %vm1112_vm3, %v2569_v61  ;;  %1226 = vst.msk [vmem:[#allocation2 + $0xc8] sm:$0xff] %vm1112_vm3, %v2569_v61 }
  0xd1   : > { %1227 = vst.msk [vmem:[#allocation2 + $0xd0] sm:$0xff] %vm1112_vm3, %v2569_v61  ;;  %1228 = vst.msk [vmem:[#allocation2 + $0xd8] sm:$0xff] %vm1112_vm3, %v2569_v61 }
  0xd2   : > { %v1003_v7 = vpop.permute.xlu0 %1002  ;;  %v836_v22 = vpop.permute.xlu1 %835  ;;  %1229 = vst.msk [vmem:[#allocation2 + $0xe0] sm:$0xff] %vm1112_vm3, %v2569_v61  ;;  %1230 = vst.msk [vmem:[#allocation2 + $0xe8] sm:$0xff] %vm1112_vm3, %v2569_v61 }
  0xd3   : > { %1231 = vst.msk [vmem:[#allocation2 + $0xf0] sm:$0xff] %vm1112_vm3, %v2569_v61  ;;  %1232 = vst.msk [vmem:[#allocation2 + $0xf8] sm:$0xff] %vm1112_vm3, %v2569_v61  ;;  %v1159_v20 = vsel %vm1153_vm4, %v1118_v31, %v1003_v7  ;;  %v1140_v5 = vsel %vm1112_vm3, %v3321_v43, %v836_v22 }
  0xd4   : > { %2794 = vmatmul.mubr.msk.f32.gmra.mrb[4].mxu0 %vm1268_vm5, %v1159_v20 }
  0xd6   : > { %v1045_v51 = vpop.permute.xlu0 %1044  ;;  %v794_v36 = vpop.permute.xlu1 %793 }
  0xd7   : > { %v3739_v52 = vsel %vm1153_vm4, %v1139_v25, %v1045_v51  ;;  %v1119_v10 = vsel %vm1112_vm3, %v3311_v35, %v794_v36 }
  0xd8   : > { %2826 = vmatprep.mubr.msk.f32.mxu1 %vm1268_vm5, %v3739_v52 }
  0xda   : > { %v1047_v13 = vpop.permute.xlu0 %1046  ;;  %v796_v14 = vpop.permute.xlu1 %795 }
  0xdb   : > { %v3746_v12 = vsel %vm1153_vm4, %v1140_v5, %v1047_v13  ;;  %v1120_v43 = vsel %vm1112_vm3, %v3339_v63, %v796_v14 }
  0xdc   : > { %2827 = vmatmul.mubr.msk.f32.gmra.mrb[10].mxu1 %vm1268_vm5, %v3746_v12 }
  0xde   : > { %v1005_v16 = vpop.permute.xlu0 %1004  ;;  %v838_v37 = vpop.permute.xlu1 %837 }
  0xdf   : > { %v1160_v24 = vsel %vm1153_vm4, %v1119_v10, %v1005_v16  ;;  %v1141_v34 = vsel %vm1112_vm3, %v3359_v29, %v838_v37 }
  0xe0   : > { %2796 = vmatprep.mubr.msk.f32.mxu0 %vm1268_vm5, %v1160_v24 }
  0xe2   : > { %v1007_v47 = vpop.permute.xlu0 %1006  ;;  %v840_v4 = vpop.permute.xlu1 %839 }
  0xe3   : > { %v1161_v48 = vsel %vm1153_vm4, %v1120_v43, %v1007_v47  ;;  %v1142_v63 = vsel %vm1112_vm3, %v3356_v28, %v840_v4 }
  0xe4   : > { %2797 = vmatmul.mubr.msk.f32.gmra.mrb[6].mxu0 %vm1268_vm5, %v1161_v48 }
  0xe6   : > { %v1049_v44 = vpop.permute.xlu0 %1048  ;;  %v798_v35 = vpop.permute.xlu1 %797 }
  0xe7   : > { %v3761_v19 = vsel %vm1153_vm4, %v1141_v34, %v1049_v44  ;;  %v1121_v29 = vsel %vm1112_vm3, %v3390_v58, %v798_v35 }
  0xe8   : > { %2829 = vmatprep.mubr.msk.f32.mxu1 %vm1268_vm5, %v3761_v19 }
  0xea   : > { %v1051_v15 = vpop.permute.xlu0 %1050  ;;  %v800_v42 = vpop.permute.xlu1 %799 }
  0xeb   : > { %v3768_v55 = vsel %vm1153_vm4, %v1142_v63, %v1051_v15  ;;  %v1122_v28 = vsel %vm1112_vm3, %v3387_v57, %v800_v42 }
  0xec   : > { %2830 = vmatmul.mubr.msk.f32.gmra.mrb[12].mxu1 %vm1268_vm5, %v3768_v55 }
  0xee   : > { %v1009_v54 = vpop.permute.xlu0 %1008  ;;  %v842_v62 = vpop.permute.xlu1 %841 }
  0xef   : > { %v1162_v3 = vsel %vm1153_vm4, %v1121_v29, %v1009_v54  ;;  %v1143_v7 = vsel %vm1112_vm3, %v3370_v40, %v842_v62 }
  0xf0   : > { %2799 = vmatprep.mubr.msk.f32.mxu0 %vm1268_vm5, %v1162_v3 }
  0xf2   : > { %v1011_v6 = vpop.permute.xlu0 %1010  ;;  %v844_v61 = vpop.permute.xlu1 %843 }
  0xf3   : > { %v1163_v31 = vsel %vm1153_vm4, %v1122_v28, %v1011_v6  ;;  %v1144_v57 = vsel %vm1112_vm3, %v3412_v17, %v844_v61 }
  0xf4   : > { %2800 = vmatmul.mubr.msk.f32.gmra.mrb[8].mxu0 %vm1268_vm5, %v1163_v31 }
  0xf6   : > { %v1053_v22 = vpop.permute.xlu0 %1052  ;;  %v802_v58 = vpop.permute.xlu1 %801 }
  0xf7   : > { %v3783_v25 = vsel %vm1153_vm4, %v1143_v7, %v1053_v22  ;;  %v1123_v40 = vsel %vm1112_vm3, %v3402_v8, %v802_v58  ;;  %v1249_v7 = vld [vmem:[#allocation2 + $0x80] sm:$0xff] }
  0xf8   : > { %2832 = vmatprep.mubr.msk.f32.mxu1 %vm1268_vm5, %v3783_v25 }
  0xfa   : > { %v1055_v51 = vpop.permute.xlu0 %1054  ;;  %v804_v36 = vpop.permute.xlu1 %803 }
  0xfb   : > { %v3790_v5 = vsel %vm1153_vm4, %v1144_v57, %v1055_v51  ;;  %v1124_v13 = vsel %vm1112_vm3, %v3437_v46, %v804_v36  ;;  %v1251_v51 = vld [vmem:[#allocation2 + $0x90] sm:$0xff] }
  0xfc   : > { %2833 = vmatmul.mubr.msk.f32.gmra.mrb[14].mxu1 %vm1268_vm5, %v3790_v5 }
  0xfd   : > { %2841 = vmatprep.mubr.msk.f32.mxu1 %vm1268_vm5, %v3693_v23 }
  0xfe   : > { %v1013_v14 = vpop.permute.xlu0 %1012  ;;  %v1015_v10 = vpop.permute.xlu1 %1014 }
  0xff   : > { %v1164_v17 = vsel %vm1153_vm4, %v1123_v40, %v1013_v14  ;;  %v1165_v16 = vsel %vm1153_vm4, %v1124_v13, %v1015_v10  ;;  %v1254_v14 = vld [vmem:[#allocation2 + $0xa8] sm:$0xff]  ;;  %v1253_v10 = vld [vmem:[#allocation2 + $0xa0] sm:$0xff] }
 0x100   : > { %2802 = vmatprep.mubr.msk.f32.mxu0 %vm1268_vm5, %v1164_v17  ;;  %2842 = vmatmul.mubr.msk.f32.vlgmr.msra.gmra.mrb[16].mxu1 %vm1268_vm5, %v1159_v20 }
 0x101   : > { %2803 = vmatmul.mubr.msk.f32.gmra.mrb[10].mxu0 %vm1268_vm5, %v1165_v16  ;;  %2844 = vmatprep.mubr.msk.f32.mxu1 %vm1268_vm5, %v1160_v24 }
 0x102   : > { %v806_v23 = vpop.permute.xlu0 %805  ;;  %v808_v37 = vpop.permute.xlu1 %807 }
 0x103   : > { %v1125_v8 = vsel %vm1112_vm3, %v3463_v32, %v806_v23  ;;  %v1126_v46 = vsel %vm1112_vm3, %v3460_v27, %v808_v37 }
 0x104   : > { %2845 = vmatmul.mubr.msk.f32.gmra.mrb[18].mxu1 %vm1268_vm5, %v1161_v48 }
 0x105   : > { %2847 = vmatprep.mubr.msk.f32.mxu1 %vm1268_vm5, %v1162_v3 }
 0x106   : > { %v1017_v43 = vpop.permute.xlu0 %1016  ;;  %v1019_v47 = vpop.permute.xlu1 %1018 }
 0x107   : > { %v1166_v20 = vsel %vm1153_vm4, %v1125_v8, %v1017_v43  ;;  %v1167_v4 = vsel %vm1153_vm4, %v1126_v46, %v1019_v47  ;;  %v1234_v8 = vld [vmem:[#allocation2 + $0x8] sm:$0xff]  ;;  %v1233_v46 = vld [vmem:[#allocation2] sm:$0xff] }
 0x108   : > { %2805 = vmatprep.mubr.msk.f32.mxu0 %vm1268_vm5, %v1166_v20  ;;  %2848 = vmatmul.mubr.msk.f32.gmra.mrb[20].mxu1 %vm1268_vm5, %v1163_v31 }
 0x109   : > { %2806 = vmatmul.mubr.msk.f32.gmra.mrb[12].mxu0 %vm1268_vm5, %v1167_v4  ;;  %2850 = vmatprep.mubr.msk.f32.mxu1 %vm1268_vm5, %v1164_v17 }
 0x10a   : > { %v810_v24 = vpop.permute.xlu0 %809  ;;  %v812_v48 = vpop.permute.xlu1 %811 }
 0x10b   : > { %v1127_v27 = vsel %vm1112_vm3, %v3466_v30, %v810_v24  ;;  %v1128_v32 = vsel %vm1112_vm3, %v3487_v1, %v812_v48  ;;  %v1256_v24 = vld [vmem:[#allocation2 + $0xb8] sm:$0xff]  ;;  %v1255_v48 = vld [vmem:[#allocation2 + $0xb0] sm:$0xff] }
 0x10c   : > { %2851 = vmatmul.mubr.msk.f32.gmra.mrb[22].mxu1 %vm1268_vm5, %v1165_v16 }
 0x10d   : > { %2853 = vmatprep.mubr.msk.f32.mxu1 %vm1268_vm5, %v1166_v20 }
 0x10e   : > { %v1021_v34 = vpop.permute.xlu0 %1020  ;;  %v1023_v44 = vpop.permute.xlu1 %1022 }
 0x10f   : > { %v1168_v35 = vsel %vm1153_vm4, %v1127_v27, %v1021_v34  ;;  %v1169_v63 = vsel %vm1153_vm4, %v1128_v32, %v1023_v44 }
 0x110   : > { %2808 = vmatprep.mubr.msk.f32.mxu0 %vm1268_vm5, %v1168_v35  ;;  %2854 = vmatmul.mubr.msk.f32.gmra.mrb[24].mxu1 %vm1268_vm5, %v1167_v4 }
 0x111   : > { %2809 = vmatmul.mubr.msk.f32.gmra.mrb[14].mxu0 %vm1268_vm5, %v1169_v63  ;;  %2856 = vmatprep.mubr.msk.f32.mxu1 %vm1268_vm5, %v1168_v35 }
 0x112   : > { %2895 = vmatprep.mubr.msk.f32.mxu0 %vm1268_vm5, %v1162_v3  ;;  %v846_v30 = vpop.permute.xlu0 %845 }
 0x113   : > { %v848_v1 = vpop.permute.xlu1 %847 }
 0x114   : > { %2857 = vmatmul.mubr.msk.f32.gmra.mrb[26].mxu1 %vm1268_vm5, %v1169_v63 }
 0x115   : > { %2859 = vmatprep.mubr.msk.f32.mxu1 %vm1268_vm5, %v3507_v33  ;;  %2896 = vmatmul.mubr.msk.f32.vlgmr.msra.gmra.mrb[16].mxu0 %vm1268_vm5, %v1163_v31 }
 0x116   : > { %2898 = vmatprep.mubr.msk.f32.mxu0 %vm1268_vm5, %v1164_v17  ;;  %v1057_v15 = vpop.permute.xlu0 %1056 }
 0x118   : > { %2860 = vmatmul.mubr.msk.f32.gmra.mrb[28].mxu1 %vm1268_vm5, %v3535_v41 }
 0x119   : > { %2862 = vmatprep.mubr.msk.f32.mxu1 %vm1268_vm5, %v3568_v2  ;;  %2899 = vmatmul.mubr.msk.f32.gmra.mrb[18].mxu0 %vm1268_vm5, %v1165_v16 }
 0x11a   : > { %2901 = vmatprep.mubr.msk.f32.mxu0 %vm1268_vm5, %v1166_v20 }
 0x11c   : > { %2863 = vmatmul.mubr.msk.f32.gmra.mrb[30].mxu1 %vm1268_vm5, %v3565_v60 }
 0x11d   : > { %2865 = vmatprep.mubr.msk.f32.mxu1 %vm1268_vm5, %v3594_v53  ;;  %2902 = vmatmul.mubr.msk.f32.gmra.mrb[20].mxu0 %vm1268_vm5, %v1167_v4 }
 0x11e   : > { %2904 = vmatprep.mubr.msk.f32.mxu0 %vm1268_vm5, %v1168_v35  ;;  %v1236_v35 = vld [vmem:[#allocation2 + $0x18] sm:$0xff] }
 0x120   : > { %2866 = vmatmul.mubr.msk.f32.gmra.mrb[32].mxu1 %vm1268_vm5, %v3611_v11 }
 0x121   : > { %2868 = vmatprep.mubr.msk.f32.mxu1 %vm1268_vm5, %v3651_v21  ;;  %2905 = vmatmul.mubr.msk.f32.gmra.mrb[22].mxu0 %vm1268_vm5, %v1169_v63  ;;  %v1235_v63 = vld [vmem:[#allocation2 + $0x10] sm:$0xff] }
 0x122   : > { %2907 = vmatprep.mubr.msk.f32.mxu0 %vm1268_vm5, %v3507_v33  ;;  %v1059_v33 = vpop.permute.xlu1 %1058 }
 0x124   : > { %2869 = vmatmul.mubr.msk.f32.gmra.mrb[34].mxu1 %vm1268_vm5, %v3662_v18 }
 0x125   : > { %2871 = vmatprep.mubr.msk.f32.mxu1 %vm1268_vm5, %v3679_v56  ;;  %2908 = vmatmul.mubr.msk.f32.gmra.mrb[24].mxu0 %vm1268_vm5, %v3535_v41  ;;  %v850_v41 = vpop.permute.xlu0 %849 }
 0x126   : > { %2910 = vmatprep.mubr.msk.f32.mxu0 %vm1268_vm5, %v3568_v2  ;;  %v852_v2 = vpop.permute.xlu1 %851 }
 0x128   : > { %2872 = vmatmul.mubr.msk.f32.gmra.mrb[36].mxu1 %vm1268_vm5, %v3686_v26 }
 0x129   : > { %2874 = vmatprep.mubr.msk.f32.mxu1 %vm1268_vm5, %v3739_v52  ;;  %2911 = vmatmul.mubr.msk.f32.gmra.mrb[26].mxu0 %vm1268_vm5, %v3565_v60  ;;  %v1145_v60 = vsel %vm1112_vm3, %v3511_v38, %v846_v30  ;;  %v1146_v38 = vsel %vm1112_vm3, %v3523_v45, %v848_v1 }
 0x12a   : > { %2913 = vmatprep.mubr.msk.f32.mxu0 %vm1268_vm5, %v3594_v53  ;;  %v1186_v53 = vsel %vm1153_vm4, %v1145_v60, %v1057_v15  ;;  %v1187_v45 = vsel %vm1153_vm4, %v1146_v38, %v1059_v33  ;;  %v1257_v60 = vld [vmem:[#allocation2 + $0xc0] sm:$0xff]  ;;  %v1238_v38 = vld [vmem:[#allocation2 + $0x28] sm:$0xff] }
 0x12c   : > { %2875 = vmatmul.mubr.msk.f32.gmra.mrb[38].mxu1 %vm1268_vm5, %v3746_v12 }
 0x12d   : > { %2877 = vmatprep.mubr.msk.f32.mxu1 %vm1268_vm5, %v3761_v19  ;;  %2914 = vmatmul.mubr.msk.f32.gmra.mrb[28].mxu0 %vm1268_vm5, %v3611_v11  ;;  %v1061_v11 = vpop.permute.xlu0 %1060 }
 0x12e   : > { %2916 = vmatprep.mubr.msk.f32.mxu0 %vm1268_vm5, %v3651_v21  ;;  %v1147_v21 = vsel %vm1112_vm3, %v3526_v50, %v850_v41  ;;  %v1063_v50 = vpop.permute.xlu1 %1062  ;;  %v1258_v41 = vld [vmem:[#allocation2 + $0xc8] sm:$0xff] }
 0x130   : > { %2878 = vmatmul.mubr.msk.f32.gmra.mrb[40].mxu1 %vm1268_vm5, %v3768_v55 }
 0x131   : > { %2880 = vmatprep.mubr.msk.f32.mxu1 %vm1268_vm5, %v3783_v25  ;;  %2917 = vmatmul.mubr.msk.f32.gmra.mrb[30].mxu0 %vm1268_vm5, %v3662_v18  ;;  %v1148_v18 = vsel %vm1112_vm3, %v3557_v39, %v852_v2  ;;  %v854_v42 = vpop.permute.xlu0 %853 }
 0x132   : > { %2919 = vmatprep.mubr.msk.f32.mxu0 %vm1268_vm5, %v3679_v56  ;;  %v1188_v56 = vsel %vm1153_vm4, %v1147_v21, %v1061_v11  ;;  %v1189_v29 = vsel %vm1153_vm4, %v1148_v18, %v1063_v50  ;;  %v1237_v18 = vld [vmem:[#allocation2 + $0x20] sm:$0xff] }
 0x134   : > { %2881 = vmatmul.mubr.msk.f32.gmra.mrb[42].mxu1 %vm1268_vm5, %v3790_v5 }
 0x135   : > { %2883 = vmatprep.mubr.msk.f32.mxu1 %vm1268_vm5, %v1186_v53  ;;  %2920 = vmatmul.mubr.msk.f32.gmra.mrb[32].mxu0 %vm1268_vm5, %v3686_v26  ;;  %v856_v26 = vpop.permute.xlu1 %855  ;;  %v1065_v39 = vpop.permute.xlu0 %1064 }
 0x136   : > { %2922 = vmatprep.mubr.msk.f32.mxu0 %vm1268_vm5, %v3739_v52  ;;  %v1150_v3 = vsel %vm1112_vm3, %v3588_v49, %v856_v26  ;;  %v1259_v26 = vld [vmem:[#allocation2 + $0xd0] sm:$0xff] }
 0x138   : > { %2884 = vmatmul.mubr.msk.f32.gmra.mrb[44].mxu1 %vm1268_vm5, %v1187_v45 }
 0x139   : > { %2923 = vmatmul.mubr.msk.f32.gmra.mrb[34].mxu0 %vm1268_vm5, %v3746_v12  ;;  %2886 = vmatprep.mubr.msk.f32.mxu1 %vm1268_vm5, %v1188_v56  ;;  %v1067_v52 = vpop.permute.xlu1 %1066  ;;  %v858_v12 = vpop.permute.xlu0 %857 }
 0x13a   : > { %2925 = vmatprep.mubr.msk.f32.mxu0 %vm1268_vm5, %v3761_v19  ;;  %v1149_v19 = vsel %vm1112_vm3, %v3591_v0, %v854_v42  ;;  %v1191_v0 = vsel %vm1153_vm4, %v1150_v3, %v1067_v52 }
 0x13b   : > { %v1190_v28 = vsel %vm1153_vm4, %v1149_v19, %v1065_v39 }
 0x13c   : > { %2887 = vmatmul.mubr.msk.f32.gmra.mrb[46].mxu1 %vm1268_vm5, %v1189_v29 }
 0x13d   : > { %2926 = vmatmul.mubr.msk.f32.gmra.mrb[36].mxu0 %vm1268_vm5, %v3768_v55  ;;  %v860_v54 = vpop.permute.xlu1 %859  ;;  %v1151_v55 = vsel %vm1112_vm3, %v3597_v9, %v858_v12  ;;  %v1069_v62 = vpop.permute.xlu0 %1068  ;;  %v1250_v9 = vld [vmem:[#allocation2 + $0x88] sm:$0xff] }
 0x13e   : > { %2928 = vmatprep.mubr.msk.f32.mxu0 %vm1268_vm5, %v3783_v25  ;;  %v1192_v6 = vsel %vm1153_vm4, %v1151_v55, %v1069_v62  ;;  %v1152_v61 = vsel %vm1112_vm3, %v3625_v59, %v860_v54  ;;  %v1252_v59 = vld [vmem:[#allocation2 + $0x98] sm:$0xff]  ;;  %v1239_v55 = vld [vmem:[#allocation2 + $0x30] sm:$0xff] }
 0x13f   : > { %v1240_v54 = vld [vmem:[#allocation2 + $0x38] sm:$0xff] }
 0x141   : > { %2929 = vmatmul.mubr.msk.f32.gmra.mrb[38].mxu0 %vm1268_vm5, %v3790_v5  ;;  %v1071_v31 = vpop.permute.xlu1 %1070 }
 0x142   : > { %2931 = vmatprep.mubr.msk.f32.mxu0 %vm1268_vm5, %v1186_v53  ;;  %v1193_v49 = vsel %vm1153_vm4, %v1152_v61, %v1071_v31  ;;  %v1261_v61 = vld [vmem:[#allocation2 + $0xe0] sm:$0xff] }
 0x145   : > { %2932 = vmatmul.mubr.msk.f32.gmra.mrb[40].mxu0 %vm1268_vm5, %v1187_v45 }
 0x146   : > { %2934 = vmatprep.mubr.msk.f32.mxu0 %vm1268_vm5, %v1188_v56 }
 0x149   : > { %2935 = vmatmul.mubr.msk.f32.gmra.mrb[42].mxu0 %vm1268_vm5, %v1189_v29  ;;  %v1260_v29 = vld [vmem:[#allocation2 + $0xd8] sm:$0xff] }
 0x14a   : > { %2937 = vmatprep.mubr.msk.f32.mxu0 %vm1268_vm5, %v1190_v28 }
 0x14d   : > { %2938 = vmatmul.mubr.msk.f32.gmra.mrb[44].mxu0 %vm1268_vm5, %v1191_v0  ;;  %v1262_v0 = vld [vmem:[#allocation2 + $0xe8] sm:$0xff] }
 0x14e   : > { %2940 = vmatprep.mubr.msk.f32.mxu0 %vm1268_vm5, %v1192_v6 }
 0x151   : > { %2941 = vmatmul.mubr.msk.f32.gmra.mrb[46].mxu0 %vm1268_vm5, %v1193_v49 }
 0x16c   : > { %v2813_v22 = vpop.f32.mrb[0].mxu1 }
 0x16d   : > { %v1607_v58 = vadd.f32 %v2813_v22, %v1250_v9  ;;  %v1511_v25 = vpop.f32.mrb[1].mxu1  ;;  %v1242_v22 = vld [vmem:[#allocation2 + $0x48] sm:$0xff] }
 0x16e   : > { %v1606_v57 = vadd.f32 %v1511_v25, %v1249_v7 }
 0x16f   : > { %1639 = vst.msk [vmem:[#allocation2 + $0x88] sm:$0xff] %vm1112_vm3, %v1607_v58  ;;  %v1241_v58 = vld [vmem:[#allocation2 + $0x40] sm:$0xff] }
 0x170   : > { %1638 = vst.msk [vmem:[#allocation2 + $0x80] sm:$0xff] %vm1112_vm3, %v1606_v57 }
 0x174   : > { %v2816_v36 = vpop.f32.mrb[2].mxu1 }
 0x175   : > { %v1609_v5 = vadd.f32 %v2816_v36, %v1252_v59  ;;  %v1521_v40 = vpop.f32.mrb[3].mxu1  ;;  %v1264_v36 = vld [vmem:[#allocation2 + $0xf8] sm:$0xff] }
 0x176   : > { %v1608_v13 = vadd.f32 %v1521_v40, %v1251_v51 }
 0x177   : > { %1641 = vst.msk [vmem:[#allocation2 + $0x98] sm:$0xff] %vm1112_vm3, %v1609_v5  ;;  %v1263_v5 = vld [vmem:[#allocation2 + $0xf0] sm:$0xff] }
 0x178   : > { %1640 = vst.msk [vmem:[#allocation2 + $0x90] sm:$0xff] %vm1112_vm3, %v1608_v13 }
 0x17f   : > { %v2819_v17 = vpop.f32.mrb[4].mxu1 }
 0x180   : > { %v1611_v16 = vadd.f32 %v2819_v17, %v1254_v14  ;;  %v1531_v23 = vpop.f32.mrb[5].mxu1  ;;  %v1244_v17 = vld [vmem:[#allocation2 + $0x58] sm:$0xff] }
 0x181   : > { %v1610_v37 = vadd.f32 %v1531_v23, %v1253_v10 }
 0x182   : > { %1643 = vst.msk [vmem:[#allocation2 + $0xa8] sm:$0xff] %vm1112_vm3, %v1611_v16 }
 0x183   : > { %1642 = vst.msk [vmem:[#allocation2 + $0xa0] sm:$0xff] %vm1112_vm3, %v1610_v37  ;;  %v1243_v37 = vld [vmem:[#allocation2 + $0x50] sm:$0xff] }
 0x187   : > { %v2789_v43 = vpop.f32.mrb[0].mxu0 }
 0x188   : > { %v1591_v47 = vadd.f32 %v2789_v43, %v1234_v8  ;;  %v1431_v20 = vpop.f32.mrb[1].mxu0 }
 0x189   : > { %v1590_v4 = vadd.f32 %v1431_v20, %v1233_v46 }
 0x18a   : > { %1623 = vst.msk [vmem:[#allocation2 + $0x8] sm:$0xff] %vm1112_vm3, %v1591_v47 }
 0x18b   : > { %1622 = vst.msk [vmem:[#allocation2] sm:$0xff] %vm1112_vm3, %v1590_v4 }
 0x18f   : > { %v2822_v27 = vpop.f32.mrb[6].mxu1 }
 0x190   : > { %v1613_v32 = vadd.f32 %v2822_v27, %v1256_v24  ;;  %v1541_v34 = vpop.f32.mrb[7].mxu1 }
 0x191   : > { %v1612_v44 = vadd.f32 %v1541_v34, %v1255_v48  ;;  %v1655_v16 = vld [vmem:[#allocation2 + $0x8] sm:$0xff] }
 0x192   : > { %1645 = vst.msk [vmem:[#allocation2 + $0xb8] sm:$0xff] %vm1112_vm3, %v1613_v32  ;;  %v1654_v43 = vld [vmem:[#allocation2] sm:$0xff] }
 0x193   : > { %1644 = vst.msk [vmem:[#allocation2 + $0xb0] sm:$0xff] %vm1112_vm3, %v1612_v44 }
 0x197   : > { %v2792_v30 = vpop.f32.mrb[2].mxu0 }
 0x198   : > { %v1593_v1 = vadd.f32 %v2792_v30, %v1236_v35  ;;  %v1441_v15 = vpop.f32.mrb[3].mxu0  ;;  %v1246_v30 = vld [vmem:[#allocation2 + $0x68] sm:$0xff] }
 0x199   : > { %v1592_v33 = vadd.f32 %v1441_v15, %v1235_v63 }
 0x19a   : > { %1625 = vst.msk [vmem:[#allocation2 + $0x18] sm:$0xff] %vm1112_vm3, %v1593_v1 }
 0x19b   : > { %1624 = vst.msk [vmem:[#allocation2 + $0x10] sm:$0xff] %vm1112_vm3, %v1592_v33  ;;  %v1245_v33 = vld [vmem:[#allocation2 + $0x60] sm:$0xff] }
 0x19f   : > { %v2825_v2 = vpop.f32.mrb[8].mxu1 }
 0x1a0   : > { %v1615_v53 = vadd.f32 %v2825_v2, %v1258_v41  ;;  %v1551_v11 = vpop.f32.mrb[9].mxu1 }
 0x1a1   : > { %v1614_v21 = vadd.f32 %v1551_v11, %v1257_v60  ;;  %v1657_v27 = vld [vmem:[#allocation2 + $0x18] sm:$0xff] }
 0x1a2   : > { %1647 = vst.msk [vmem:[#allocation2 + $0xc8] sm:$0xff] %vm1112_vm3, %v1615_v53  ;;  %v1656_v44 = vld [vmem:[#allocation2 + $0x10] sm:$0xff] }
 0x1a3   : > { %1646 = vst.msk [vmem:[#allocation2 + $0xc0] sm:$0xff] %vm1112_vm3, %v1614_v21 }
 0x1a7   : > { %v2795_v56 = vpop.f32.mrb[4].mxu0 }
 0x1a8   : > { %v1595_v50 = vadd.f32 %v2795_v56, %v1238_v38  ;;  %v1451_v42 = vpop.f32.mrb[5].mxu0 }
 0x1a9   : > { %v1594_v45 = vadd.f32 %v1451_v42, %v1237_v18 }
 0x1aa   : > { %1627 = vst.msk [vmem:[#allocation2 + $0x28] sm:$0xff] %vm1112_vm3, %v1595_v50 }
 0x1ab   : > { %1626 = vst.msk [vmem:[#allocation2 + $0x20] sm:$0xff] %vm1112_vm3, %v1594_v45 }
 0x1af   : > { %v2828_v39 = vpop.f32.mrb[10].mxu1 }
 0x1b0   : > { %v1617_v52 = vadd.f32 %v2828_v39, %v1260_v29  ;;  %v1561_v12 = vpop.f32.mrb[11].mxu1  ;;  %v1248_v39 = vld [vmem:[#allocation2 + $0x78] sm:$0xff] }
 0x1b1   : > { %v1616_v19 = vadd.f32 %v1561_v12, %v1259_v26  ;;  %v1659_v1 = vld [vmem:[#allocation2 + $0x28] sm:$0xff] }
 0x1b2   : > { %1649 = vst.msk [vmem:[#allocation2 + $0xd8] sm:$0xff] %vm1112_vm3, %v1617_v52  ;;  %v1658_v2 = vld [vmem:[#allocation2 + $0x20] sm:$0xff] }
 0x1b3   : > { %1648 = vst.msk [vmem:[#allocation2 + $0xd0] sm:$0xff] %vm1112_vm3, %v1616_v19  ;;  %v1247_v19 = vld [vmem:[#allocation2 + $0x70] sm:$0xff] }
 0x1b7   : > { %v2798_v62 = vpop.f32.mrb[6].mxu0 }
 0x1b8   : > { %v1597_v3 = vadd.f32 %v2798_v62, %v1240_v54  ;;  %v1461_v28 = vpop.f32.mrb[7].mxu0 }
 0x1b9   : > { %v1596_v6 = vadd.f32 %v1461_v28, %v1239_v55 }
 0x1ba   : > { %1629 = vst.msk [vmem:[#allocation2 + $0x38] sm:$0xff] %vm1112_vm3, %v1597_v3 }
 0x1bb   : > { %1628 = vst.msk [vmem:[#allocation2 + $0x30] sm:$0xff] %vm1112_vm3, %v1596_v6 }
 0x1bf   : > { %v2831_v31 = vpop.f32.mrb[12].mxu1 }
 0x1c0   : > { %v1619_v49 = vadd.f32 %v2831_v31, %v1262_v0  ;;  %v1571_v9 = vpop.f32.mrb[13].mxu1 }
 0x1c1   : > { %v1618_v7 = vadd.f32 %v1571_v9, %v1261_v61  ;;  %v1661_v56 = vld [vmem:[#allocation2 + $0x38] sm:$0xff] }
 0x1c2   : > { %1651 = vst.msk [vmem:[#allocation2 + $0xe8] sm:$0xff] %vm1112_vm3, %v1619_v49  ;;  %v1660_v45 = vld [vmem:[#allocation2 + $0x30] sm:$0xff] }
 0x1c3   : > { %1650 = vst.msk [vmem:[#allocation2 + $0xe0] sm:$0xff] %vm1112_vm3, %v1618_v7 }
 0x1c7   : > { %v2801_v25 = vpop.f32.mrb[8].mxu0 }
 0x1c8   : > { %v1599_v57 = vadd.f32 %v2801_v25, %v1242_v22  ;;  %v1471_v59 = vpop.f32.mrb[9].mxu0 }
 0x1c9   : > { %v1598_v51 = vadd.f32 %v1471_v59, %v1241_v58 }
 0x1ca   : > { %1631 = vst.msk [vmem:[#allocation2 + $0x48] sm:$0xff] %vm1112_vm3, %v1599_v57 }
 0x1cb   : > { %1630 = vst.msk [vmem:[#allocation2 + $0x40] sm:$0xff] %vm1112_vm3, %v1598_v51 }
 0x1cf   : > { %v2834_v40 = vpop.f32.mrb[14].mxu1 }
 0x1d0   : > { %v1621_v13 = vadd.f32 %v2834_v40, %v1264_v36  ;;  %v1581_v14 = vpop.f32.mrb[15].mxu1 }
 0x1d1   : > { %v1620_v10 = vadd.f32 %v1581_v14, %v1263_v5  ;;  %v1663_v52 = vld [vmem:[#allocation2 + $0x48] sm:$0xff] }
 0x1d2   : > { %1653 = vst.msk [vmem:[#allocation2 + $0xf8] sm:$0xff] %vm1112_vm3, %v1621_v13  ;;  %v1662_v62 = vld [vmem:[#allocation2 + $0x40] sm:$0xff] }
 0x1d3   : > { %1652 = vst.msk [vmem:[#allocation2 + $0xf0] sm:$0xff] %vm1112_vm3, %v1620_v10  ;;  %v2843_v23 = vpop.f32.mrb[16].mxu1 }
 0x1d4   : > { %v1928_v8 = vadd.f32 %v2843_v23, %v1655_v16  ;;  %v2804_v46 = vpop.f32.mrb[10].mxu0  ;;  %v1768_v47 = vpop.f32.mrb[17].mxu1 }
 0x1d5   : > { %v1601_v20 = vadd.f32 %v2804_v46, %v1244_v17  ;;  %v1927_v4 = vadd.f32 %v1768_v47, %v1654_v43  ;;  %v1481_v24 = vpop.f32.mrb[11].mxu0 }
 0x1d6   : > { %1960 = vst.msk [vmem:[#allocation2 + $0x8] sm:$0xff] %vm1112_vm3, %v1928_v8  ;;  %v1600_v48 = vadd.f32 %v1481_v24, %v1243_v37 }
 0x1d7   : > { %1633 = vst.msk [vmem:[#allocation2 + $0x58] sm:$0xff] %vm1112_vm3, %v1601_v20  ;;  %1959 = vst.msk [vmem:[#allocation2] sm:$0xff] %vm1112_vm3, %v1927_v4  ;;  %v2846_v32 = vpop.f32.mrb[18].mxu1 }
 0x1d8   : > { %1632 = vst.msk [vmem:[#allocation2 + $0x50] sm:$0xff] %vm1112_vm3, %v1600_v48  ;;  %v1930_v34 = vadd.f32 %v2846_v32, %v1657_v27  ;;  %v1778_v35 = vpop.f32.mrb[19].mxu1 }
 0x1d9   : > { %v1929_v63 = vadd.f32 %v1778_v35, %v1656_v44 }
 0x1da   : > { %1962 = vst.msk [vmem:[#allocation2 + $0x18] sm:$0xff] %vm1112_vm3, %v1930_v34 }
 0x1db   : > { %1961 = vst.msk [vmem:[#allocation2 + $0x10] sm:$0xff] %vm1112_vm3, %v1929_v63  ;;  %v2849_v15 = vpop.f32.mrb[20].mxu1 }
 0x1dc   : > { %v1932_v41 = vadd.f32 %v2849_v15, %v1659_v1  ;;  %v2807_v60 = vpop.f32.mrb[12].mxu0  ;;  %v1788_v53 = vpop.f32.mrb[21].mxu1 }
 0x1dd   : > { %v1603_v11 = vadd.f32 %v2807_v60, %v1246_v30  ;;  %v1931_v21 = vadd.f32 %v1788_v53, %v1658_v2  ;;  %v1491_v38 = vpop.f32.mrb[13].mxu0  ;;  %v1992_v58 = vld [vmem:[#allocation2 + $0x8] sm:$0xff]  ;;  %v1670_v53 = vld [vmem:[#allocation2 + $0x80] sm:$0xff] }
 0x1de   : > { %1964 = vst.msk [vmem:[#allocation2 + $0x28] sm:$0xff] %vm1112_vm3, %v1932_v41  ;;  %v1602_v18 = vadd.f32 %v1491_v38, %v1245_v33  ;;  %v1665_v31 = vld [vmem:[#allocation2 + $0x58] sm:$0xff]  ;;  %v1991_v51 = vld [vmem:[#allocation2] sm:$0xff]  ;;  %v1671_v41 = vld [vmem:[#allocation2 + $0x88] sm:$0xff] }
 0x1df   : > { %1635 = vst.msk [vmem:[#allocation2 + $0x68] sm:$0xff] %vm1112_vm3, %v1603_v11  ;;  %1963 = vst.msk [vmem:[#allocation2 + $0x20] sm:$0xff] %vm1112_vm3, %v1931_v21  ;;  %v2852_v50 = vpop.f32.mrb[22].mxu1  ;;  %v1664_v7 = vld [vmem:[#allocation2 + $0x50] sm:$0xff] }
 0x1e0   : > { %1634 = vst.msk [vmem:[#allocation2 + $0x60] sm:$0xff] %vm1112_vm3, %v1602_v18  ;;  %v1934_v42 = vadd.f32 %v2852_v50, %v1661_v56  ;;  %v1798_v29 = vpop.f32.mrb[23].mxu1 }
 0x1e1   : > { %v1933_v26 = vadd.f32 %v1798_v29, %v1660_v45  ;;  %v1994_v16 = vld [vmem:[#allocation2 + $0x18] sm:$0xff] }
 0x1e2   : > { %1966 = vst.msk [vmem:[#allocation2 + $0x38] sm:$0xff] %vm1112_vm3, %v1934_v42  ;;  %v1993_v46 = vld [vmem:[#allocation2 + $0x10] sm:$0xff] }
 0x1e3   : > { %1965 = vst.msk [vmem:[#allocation2 + $0x30] sm:$0xff] %vm1112_vm3, %v1933_v26  ;;  %v2855_v12 = vpop.f32.mrb[24].mxu1 }
 0x1e4   : > { %v1936_v54 = vadd.f32 %v2855_v12, %v1663_v52  ;;  %v2810_v55 = vpop.f32.mrb[14].mxu0  ;;  %v1808_v3 = vpop.f32.mrb[25].mxu1 }
 0x1e5   : > { %v1605_v28 = vadd.f32 %v2810_v55, %v1248_v39  ;;  %v1935_v6 = vadd.f32 %v1808_v3, %v1662_v62  ;;  %v1501_v0 = vpop.f32.mrb[15].mxu0  ;;  %v1996_v32 = vld [vmem:[#allocation2 + $0x28] sm:$0xff]  ;;  %v1673_v39 = vld [vmem:[#allocation2 + $0x98] sm:$0xff] }
 0x1e6   : > { %1968 = vst.msk [vmem:[#allocation2 + $0x48] sm:$0xff] %vm1112_vm3, %v1936_v54  ;;  %v1604_v61 = vadd.f32 %v1501_v0, %v1247_v19  ;;  %v1667_v40 = vld [vmem:[#allocation2 + $0x68] sm:$0xff]  ;;  %v1995_v63 = vld [vmem:[#allocation2 + $0x20] sm:$0xff]  ;;  %v1672_v19 = vld [vmem:[#allocation2 + $0x90] sm:$0xff] }
 0x1e7   : > { %1637 = vst.msk [vmem:[#allocation2 + $0x78] sm:$0xff] %vm1112_vm3, %v1605_v28  ;;  %1967 = vst.msk [vmem:[#allocation2 + $0x40] sm:$0xff] %vm1112_vm3, %v1935_v6  ;;  %v2858_v49 = vpop.f32.mrb[26].mxu1  ;;  %v1666_v10 = vld [vmem:[#allocation2 + $0x60] sm:$0xff] }
 0x1e8   : > { %1636 = vst.msk [vmem:[#allocation2 + $0x70] sm:$0xff] %vm1112_vm3, %v1604_v61  ;;  %v1938_v9 = vadd.f32 %v2858_v49, %v1665_v31  ;;  %v1818_v22 = vpop.f32.mrb[27].mxu1  ;;  %v2897_v25 = vpop.f32.mrb[16].mxu0 }
 0x1e9   : > { %v1937_v57 = vadd.f32 %v1818_v22, %v1664_v7  ;;  %v2265_v59 = vadd.f32 %v2897_v25, %v1992_v58  ;;  %v2105_v36 = vpop.f32.mrb[17].mxu0  ;;  %v1998_v21 = vld [vmem:[#allocation2 + $0x38] sm:$0xff]  ;;  %v1674_v58 = vld [vmem:[#allocation2 + $0xa0] sm:$0xff] }
 0x1ea   : > { %1970 = vst.msk [vmem:[#allocation2 + $0x58] sm:$0xff] %vm1112_vm3, %v1938_v9  ;;  %v2264_v5 = vadd.f32 %v2105_v36, %v1991_v51  ;;  %v1997_v50 = vld [vmem:[#allocation2 + $0x30] sm:$0xff]  ;;  %v1675_v9 = vld [vmem:[#allocation2 + $0xa8] sm:$0xff] }
 0x1eb   : > { %1969 = vst.msk [vmem:[#allocation2 + $0x50] sm:$0xff] %vm1112_vm3, %v1937_v57  ;;  %2297 = vst.msk [vmem:[#allocation2 + $0x8] sm:$0xff] %vm1112_vm3, %v2265_v59  ;;  %v2861_v13 = vpop.f32.mrb[28].mxu1 }
 0x1ec   : > { %2296 = vst.msk [vmem:[#allocation2] sm:$0xff] %vm1112_vm3, %v2264_v5  ;;  %v1940_v14 = vadd.f32 %v2861_v13, %v1667_v40  ;;  %v1828_v17 = vpop.f32.mrb[29].mxu1  ;;  %v2900_v23 = vpop.f32.mrb[18].mxu0 }
 0x1ed   : > { %v1939_v37 = vadd.f32 %v1828_v17, %v1666_v10  ;;  %v2267_v8 = vadd.f32 %v2900_v23, %v1994_v16  ;;  %v2115_v43 = vpop.f32.mrb[19].mxu0  ;;  %v2000_v55 = vld [vmem:[#allocation2 + $0x48] sm:$0xff]  ;;  %v1677_v17 = vld [vmem:[#allocation2 + $0xb8] sm:$0xff] }
 0x1ee   : > { %1972 = vst.msk [vmem:[#allocation2 + $0x68] sm:$0xff] %vm1112_vm3, %v1940_v14  ;;  %v2266_v47 = vadd.f32 %v2115_v43, %v1993_v46  ;;  %v1669_v20 = vld [vmem:[#allocation2 + $0x78] sm:$0xff]  ;;  %v1999_v6 = vld [vmem:[#allocation2 + $0x40] sm:$0xff] }
 0x1ef   : > { %1971 = vst.msk [vmem:[#allocation2 + $0x60] sm:$0xff] %vm1112_vm3, %v1939_v37  ;;  %2299 = vst.msk [vmem:[#allocation2 + $0x18] sm:$0xff] %vm1112_vm3, %v2267_v8  ;;  %v2864_v4 = vpop.f32.mrb[30].mxu1  ;;  %v1668_v24 = vld [vmem:[#allocation2 + $0x70] sm:$0xff] }
 0x1f0   : > { %2298 = vst.msk [vmem:[#allocation2 + $0x10] sm:$0xff] %vm1112_vm3, %v2266_v47  ;;  %v1942_v48 = vadd.f32 %v2864_v4, %v1669_v20  ;;  %v1838_v27 = vpop.f32.mrb[31].mxu1  ;;  %v2903_v34 = vpop.f32.mrb[20].mxu0  ;;  %v1676_v37 = vld [vmem:[#allocation2 + $0xb0] sm:$0xff] }
 0x1f1   : > { %v1941_v44 = vadd.f32 %v1838_v27, %v1668_v24  ;;  %v2269_v35 = vadd.f32 %v2903_v34, %v1996_v32  ;;  %v2125_v30 = vpop.f32.mrb[21].mxu0  ;;  %v2002_v57 = vld [vmem:[#allocation2 + $0x58] sm:$0xff]  ;;  %v1679_v34 = vld [vmem:[#allocation2 + $0xc8] sm:$0xff] }
 0x1f2   : > { %v2329_v1 = vld [vmem:[#allocation2 + $0x8] sm:$0xff]  ;;  %1974 = vst.msk [vmem:[#allocation2 + $0x78] sm:$0xff] %vm1112_vm3, %v1942_v48  ;;  %v2268_v15 = vadd.f32 %v2125_v30, %v1995_v63  ;;  %v2001_v5 = vld [vmem:[#allocation2 + $0x50] sm:$0xff]  ;;  %v1678_v63 = vld [vmem:[#allocation2 + $0xc0] sm:$0xff] }
 0x1f3   : > { %2361 = vst.msk [vmem:[%s3993_s27 + $0x8] sm:$0xff] %vm1112_vm3, %v2329_v1  ;;  %v2328_v33 = vld [vmem:[#allocation2] sm:$0xff]  ;;  %1973 = vst.msk [vmem:[#allocation2 + $0x70] sm:$0xff] %vm1112_vm3, %v1941_v44  ;;  %v2867_v60 = vpop.f32.mrb[32].mxu1 }
 0x1f4   : > { %2301 = vst.msk [vmem:[#allocation2 + $0x28] sm:$0xff] %vm1112_vm3, %v2269_v35  ;;  %2360 = vst.msk [vmem:[%s3993_s27] sm:$0xff] %vm1112_vm3, %v2328_v33  ;;  %v1944_v2 = vadd.f32 %v2867_v60, %v1671_v41  ;;  %v1848_v11 = vpop.f32.mrb[33].mxu1  ;;  %v2906_v38 = vpop.f32.mrb[22].mxu0 }
 0x1f5   : > { %2300 = vst.msk [vmem:[#allocation2 + $0x20] sm:$0xff] %vm1112_vm3, %v2268_v15  ;;  %v1943_v18 = vadd.f32 %v1848_v11, %v1670_v53  ;;  %v2271_v56 = vadd.f32 %v2906_v38, %v1998_v21  ;;  %v2135_v42 = vpop.f32.mrb[23].mxu0  ;;  %v2004_v46 = vld [vmem:[#allocation2 + $0x68] sm:$0xff]  ;;  %v1681_v38 = vld [vmem:[#allocation2 + $0xd8] sm:$0xff] }
 0x1f6   : > { %v2331_v45 = vld [vmem:[#allocation2 + $0x18] sm:$0xff]  ;;  %1976 = vst.msk [vmem:[#allocation2 + $0x88] sm:$0xff] %vm1112_vm3, %v1944_v2  ;;  %v2270_v29 = vadd.f32 %v2135_v42, %v1997_v50  ;;  %v2003_v4 = vld [vmem:[#allocation2 + $0x60] sm:$0xff]  ;;  %v1680_v50 = vld [vmem:[#allocation2 + $0xd0] sm:$0xff] }
 0x1f7   : > { %2363 = vst.msk [vmem:[%s3993_s27 + $0x18] sm:$0xff] %vm1112_vm3, %v2331_v45  ;;  %v2330_v26 = vld [vmem:[#allocation2 + $0x10] sm:$0xff]  ;;  %1975 = vst.msk [vmem:[#allocation2 + $0x80] sm:$0xff] %vm1112_vm3, %v1943_v18  ;;  %v2870_v52 = vpop.f32.mrb[34].mxu1 }
 0x1f8   : > { %2303 = vst.msk [vmem:[#allocation2 + $0x38] sm:$0xff] %vm1112_vm3, %v2271_v56  ;;  %2362 = vst.msk [vmem:[%s3993_s27 + $0x10] sm:$0xff] %vm1112_vm3, %v2330_v26  ;;  %v1946_v12 = vadd.f32 %v2870_v52, %v1673_v39  ;;  %v1858_v54 = vpop.f32.mrb[35].mxu1  ;;  %v2909_v62 = vpop.f32.mrb[24].mxu0 }
 0x1f9   : > { %2302 = vst.msk [vmem:[#allocation2 + $0x30] sm:$0xff] %vm1112_vm3, %v2270_v29  ;;  %v1945_v3 = vadd.f32 %v1858_v54, %v1672_v19  ;;  %v2273_v28 = vadd.f32 %v2909_v62, %v2000_v55  ;;  %v2145_v0 = vpop.f32.mrb[25].mxu0  ;;  %v2006_v1 = vld [vmem:[#allocation2 + $0x78] sm:$0xff]  ;;  %v1683_v62 = vld [vmem:[#allocation2 + $0xe8] sm:$0xff] }
 0x1fa   : > { %1978 = vst.msk [vmem:[#allocation2 + $0x98] sm:$0xff] %vm1112_vm3, %v1946_v12  ;;  %v2272_v31 = vadd.f32 %v2145_v0, %v1999_v6  ;;  %v2005_v60 = vld [vmem:[#allocation2 + $0x70] sm:$0xff]  ;;  %v1682_v6 = vld [vmem:[#allocation2 + $0xe0] sm:$0xff] }
 0x1fb   : > { %v2333_v61 = vld [vmem:[#allocation2 + $0x28] sm:$0xff]  ;;  %1977 = vst.msk [vmem:[#allocation2 + $0x90] sm:$0xff] %vm1112_vm3, %v1945_v3  ;;  %2305 = vst.msk [vmem:[#allocation2 + $0x48] sm:$0xff] %vm1112_vm3, %v2273_v28  ;;  %v2873_v7 = vpop.f32.mrb[36].mxu1 }
 0x1fc   : > { %2365 = vst.msk [vmem:[%s3993_s27 + $0x28] sm:$0xff] %vm1112_vm3, %v2333_v61  ;;  %v2332_v49 = vld [vmem:[#allocation2 + $0x20] sm:$0xff]  ;;  %2304 = vst.msk [vmem:[#allocation2 + $0x40] sm:$0xff] %vm1112_vm3, %v2272_v31  ;;  %v1948_v22 = vadd.f32 %v2873_v7, %v1675_v9  ;;  %v1868_v25 = vpop.f32.mrb[37].mxu1  ;;  %v2912_v59 = vpop.f32.mrb[26].mxu0 }
 0x1fd   : > { %2364 = vst.msk [vmem:[%s3993_s27 + $0x20] sm:$0xff] %vm1112_vm3, %v2332_v49  ;;  %v1947_v51 = vadd.f32 %v1868_v25, %v1674_v58  ;;  %v2275_v36 = vadd.f32 %v2912_v59, %v2002_v57  ;;  %v2155_v40 = vpop.f32.mrb[27].mxu0  ;;  %v2008_v45 = vld [vmem:[#allocation2 + $0x88] sm:$0xff]  ;;  %v1685_v59 = vld [vmem:[#allocation2 + $0xf8] sm:$0xff] }
 0x1fe   : > { %1980 = vst.msk [vmem:[#allocation2 + $0xa8] sm:$0xff] %vm1112_vm3, %v1948_v22  ;;  %v2274_v14 = vadd.f32 %v2155_v40, %v2001_v5  ;;  %v2007_v52 = vld [vmem:[#allocation2 + $0x80] sm:$0xff]  ;;  %v1684_v5 = vld [vmem:[#allocation2 + $0xf0] sm:$0xff] }
 0x1ff   : > { %v2335_v13 = vld [vmem:[#allocation2 + $0x38] sm:$0xff]  ;;  %1979 = vst.msk [vmem:[#allocation2 + $0xa0] sm:$0xff] %vm1112_vm3, %v1947_v51  ;;  %2307 = vst.msk [vmem:[#allocation2 + $0x58] sm:$0xff] %vm1112_vm3, %v2275_v36  ;;  %v2876_v16 = vpop.f32.mrb[38].mxu1 }
 0x200   : > { %2367 = vst.msk [vmem:[%s3993_s27 + $0x38] sm:$0xff] %vm1112_vm3, %v2335_v13  ;;  %v2334_v10 = vld [vmem:[#allocation2 + $0x30] sm:$0xff]  ;;  %2306 = vst.msk [vmem:[#allocation2 + $0x50] sm:$0xff] %vm1112_vm3, %v2274_v14  ;;  %v1950_v23 = vadd.f32 %v2876_v16, %v1677_v17  ;;  %v1878_v8 = vpop.f32.mrb[39].mxu1  ;;  %v2915_v43 = vpop.f32.mrb[28].mxu0 }
 0x201   : > { %2366 = vst.msk [vmem:[%s3993_s27 + $0x30] sm:$0xff] %vm1112_vm3, %v2334_v10  ;;  %v1949_v47 = vadd.f32 %v1878_v8, %v1676_v37  ;;  %v2277_v20 = vadd.f32 %v2915_v43, %v2004_v46  ;;  %v2165_v24 = vpop.f32.mrb[29].mxu0  ;;  %v2010_v61 = vld [vmem:[#allocation2 + $0x98] sm:$0xff] }
 0x202   : > { %v2337_v48 = vld [vmem:[#allocation2 + $0x48] sm:$0xff]  ;;  %1982 = vst.msk [vmem:[#allocation2 + $0xb8] sm:$0xff] %vm1112_vm3, %v1950_v23  ;;  %v2276_v27 = vadd.f32 %v2165_v24, %v2003_v4  ;;  %v2009_v7 = vld [vmem:[#allocation2 + $0x90] sm:$0xff] }
 0x203   : > { %2369 = vst.msk [vmem:[%s3993_s27 + $0x48] sm:$0xff] %vm1112_vm3, %v2337_v48  ;;  %v2336_v32 = vld [vmem:[#allocation2 + $0x40] sm:$0xff]  ;;  %1981 = vst.msk [vmem:[#allocation2 + $0xb0] sm:$0xff] %vm1112_vm3, %v1949_v47  ;;  %v2879_v44 = vpop.f32.mrb[40].mxu1 }
 0x204   : > { %2309 = vst.msk [vmem:[#allocation2 + $0x68] sm:$0xff] %vm1112_vm3, %v2277_v20  ;;  %2368 = vst.msk [vmem:[%s3993_s27 + $0x40] sm:$0xff] %vm1112_vm3, %v2336_v32  ;;  %v1952_v35 = vadd.f32 %v2879_v44, %v1679_v34  ;;  %v1888_v30 = vpop.f32.mrb[41].mxu1  ;;  %v2918_v15 = vpop.f32.mrb[30].mxu0 }
 0x205   : > { %2308 = vst.msk [vmem:[#allocation2 + $0x60] sm:$0xff] %vm1112_vm3, %v2276_v27  ;;  %v1951_v33 = vadd.f32 %v1888_v30, %v1678_v63  ;;  %v2279_v41 = vadd.f32 %v2918_v15, %v2006_v1  ;;  %v2175_v2 = vpop.f32.mrb[31].mxu0  ;;  %v2012_v13 = vld [vmem:[#allocation2 + $0xa8] sm:$0xff] }
 0x206   : > { %v2339_v53 = vld [vmem:[#allocation2 + $0x58] sm:$0xff]  ;;  %1984 = vst.msk [vmem:[#allocation2 + $0xc8] sm:$0xff] %vm1112_vm3, %v1952_v35  ;;  %v2278_v11 = vadd.f32 %v2175_v2, %v2005_v60  ;;  %v2011_v16 = vld [vmem:[#allocation2 + $0xa0] sm:$0xff] }
 0x207   : > { %2371 = vst.msk [vmem:[%s3993_s27 + $0x58] sm:$0xff] %vm1112_vm3, %v2339_v53  ;;  %v2338_v21 = vld [vmem:[#allocation2 + $0x50] sm:$0xff]  ;;  %1983 = vst.msk [vmem:[#allocation2 + $0xc0] sm:$0xff] %vm1112_vm3, %v1951_v33  ;;  %v2882_v18 = vpop.f32.mrb[42].mxu1 }
 0x208   : > { %2311 = vst.msk [vmem:[#allocation2 + $0x78] sm:$0xff] %vm1112_vm3, %v2279_v41  ;;  %2370 = vst.msk [vmem:[%s3993_s27 + $0x50] sm:$0xff] %vm1112_vm3, %v2338_v21  ;;  %v1954_v56 = vadd.f32 %v2882_v18, %v1681_v38  ;;  %v1898_v42 = vpop.f32.mrb[43].mxu1  ;;  %v2921_v29 = vpop.f32.mrb[32].mxu0 }
 0x209   : > { %2310 = vst.msk [vmem:[#allocation2 + $0x70] sm:$0xff] %vm1112_vm3, %v2278_v11  ;;  %v1953_v26 = vadd.f32 %v1898_v42, %v1680_v50  ;;  %v2281_v39 = vadd.f32 %v2921_v29, %v2008_v45  ;;  %v2185_v12 = vpop.f32.mrb[33].mxu0  ;;  %v2014_v43 = vld [vmem:[#allocation2 + $0xb8] sm:$0xff] }
 0x20a   : > { %1986 = vst.msk [vmem:[#allocation2 + $0xd8] sm:$0xff] %vm1112_vm3, %v1954_v56  ;;  %v2280_v54 = vadd.f32 %v2185_v12, %v2007_v52  ;;  %v2013_v4 = vld [vmem:[#allocation2 + $0xb0] sm:$0xff] }
 0x20b   : > { %v2341_v19 = vld [vmem:[#allocation2 + $0x68] sm:$0xff]  ;;  %1985 = vst.msk [vmem:[#allocation2 + $0xd0] sm:$0xff] %vm1112_vm3, %v1953_v26  ;;  %2313 = vst.msk [vmem:[#allocation2 + $0x88] sm:$0xff] %vm1112_vm3, %v2281_v39  ;;  %v2885_v3 = vpop.f32.mrb[44].mxu1 }
 0x20c   : > { %2373 = vst.msk [vmem:[%s3993_s27 + $0x68] sm:$0xff] %vm1112_vm3, %v2341_v19  ;;  %v2340_v55 = vld [vmem:[#allocation2 + $0x60] sm:$0xff]  ;;  %2312 = vst.msk [vmem:[#allocation2 + $0x80] sm:$0xff] %vm1112_vm3, %v2280_v54  ;;  %v1956_v28 = vadd.f32 %v2885_v3, %v1683_v62  ;;  %v1908_v0 = vpop.f32.mrb[45].mxu1  ;;  %v2924_v31 = vpop.f32.mrb[34].mxu0 }
 0x20d   : > { %2372 = vst.msk [vmem:[%s3993_s27 + $0x60] sm:$0xff] %vm1112_vm3, %v2340_v55  ;;  %v1955_v49 = vadd.f32 %v1908_v0, %v1682_v6  ;;  %v2283_v9 = vadd.f32 %v2924_v31, %v2010_v61  ;;  %v2195_v22 = vpop.f32.mrb[35].mxu0  ;;  %v2016_v34 = vld [vmem:[#allocation2 + $0xc8] sm:$0xff] }
 0x20e   : > { %1988 = vst.msk [vmem:[#allocation2 + $0xe8] sm:$0xff] %vm1112_vm3, %v1956_v28  ;;  %v2282_v25 = vadd.f32 %v2195_v22, %v2009_v7  ;;  %v2015_v63 = vld [vmem:[#allocation2 + $0xc0] sm:$0xff] }
 0x20f   : > { %v2343_v58 = vld [vmem:[#allocation2 + $0x78] sm:$0xff]  ;;  %1987 = vst.msk [vmem:[#allocation2 + $0xe0] sm:$0xff] %vm1112_vm3, %v1955_v49  ;;  %2315 = vst.msk [vmem:[#allocation2 + $0x98] sm:$0xff] %vm1112_vm3, %v2283_v9  ;;  %v2888_v51 = vpop.f32.mrb[46].mxu1 }
 0x210   : > { %2375 = vst.msk [vmem:[%s3993_s27 + $0x78] sm:$0xff] %vm1112_vm3, %v2343_v58  ;;  %v2342_v57 = vld [vmem:[#allocation2 + $0x70] sm:$0xff]  ;;  %2314 = vst.msk [vmem:[#allocation2 + $0x90] sm:$0xff] %vm1112_vm3, %v2282_v25  ;;  %v1958_v36 = vadd.f32 %v2888_v51, %v1685_v59  ;;  %v1918_v40 = vpop.f32.mrb[47].mxu1  ;;  %v2927_v14 = vpop.f32.mrb[36].mxu0 }
 0x211   : > { %2374 = vst.msk [vmem:[%s3993_s27 + $0x70] sm:$0xff] %vm1112_vm3, %v2342_v57  ;;  %v1957_v10 = vadd.f32 %v1918_v40, %v1684_v5  ;;  %v2285_v17 = vadd.f32 %v2927_v14, %v2012_v13  ;;  %v2205_v23 = vpop.f32.mrb[37].mxu0  ;;  %v2018_v41 = vld [vmem:[#allocation2 + $0xd8] sm:$0xff] }
 0x212   : > { %v2345_v37 = vld [vmem:[#allocation2 + $0x88] sm:$0xff]  ;;  %1990 = vst.msk [vmem:[#allocation2 + $0xf8] sm:$0xff] %vm1112_vm3, %v1958_v36  ;;  %v2284_v8 = vadd.f32 %v2205_v23, %v2011_v16  ;;  %v2017_v53 = vld [vmem:[#allocation2 + $0xd0] sm:$0xff] }
 0x213   : > { %2377 = vst.msk [vmem:[%s3993_s27 + $0x88] sm:$0xff] %vm1112_vm3, %v2345_v37  ;;  %v2344_v46 = vld [vmem:[#allocation2 + $0x80] sm:$0xff]  ;;  %1989 = vst.msk [vmem:[#allocation2 + $0xf0] sm:$0xff] %vm1112_vm3, %v1957_v10 }
 0x214   : > { %2317 = vst.msk [vmem:[#allocation2 + $0xa8] sm:$0xff] %vm1112_vm3, %v2285_v17  ;;  %2376 = vst.msk [vmem:[%s3993_s27 + $0x80] sm:$0xff] %vm1112_vm3, %v2344_v46  ;;  %v2930_v47 = vpop.f32.mrb[38].mxu0 }
 0x215   : > { %2316 = vst.msk [vmem:[#allocation2 + $0xa0] sm:$0xff] %vm1112_vm3, %v2284_v8  ;;  %v2287_v20 = vadd.f32 %v2930_v47, %v2014_v43  ;;  %v2215_v24 = vpop.f32.mrb[39].mxu0  ;;  %v2020_v56 = vld [vmem:[#allocation2 + $0xe8] sm:$0xff] }
 0x216   : > { %v2347_v48 = vld [vmem:[#allocation2 + $0x98] sm:$0xff]  ;;  %v2286_v27 = vadd.f32 %v2215_v24, %v2013_v4  ;;  %v2019_v45 = vld [vmem:[#allocation2 + $0xe0] sm:$0xff] }
 0x217   : > { %2379 = vst.msk [vmem:[%s3993_s27 + $0x98] sm:$0xff] %vm1112_vm3, %v2347_v48  ;;  %v2346_v32 = vld [vmem:[#allocation2 + $0x90] sm:$0xff]  ;;  %2319 = vst.msk [vmem:[#allocation2 + $0xb8] sm:$0xff] %vm1112_vm3, %v2287_v20 }
 0x218   : > { %2378 = vst.msk [vmem:[%s3993_s27 + $0x90] sm:$0xff] %vm1112_vm3, %v2346_v32  ;;  %2318 = vst.msk [vmem:[#allocation2 + $0xb0] sm:$0xff] %vm1112_vm3, %v2286_v27  ;;  %v2933_v44 = vpop.f32.mrb[40].mxu0 }
 0x219   : > { %v2289_v35 = vadd.f32 %v2933_v44, %v2016_v34  ;;  %v2225_v30 = vpop.f32.mrb[41].mxu0  ;;  %v2022_v12 = vld [vmem:[#allocation2 + $0xf8] sm:$0xff] }
 0x21a   : > { %v2288_v15 = vadd.f32 %v2225_v30, %v2015_v63  ;;  %v2021_v55 = vld [vmem:[#allocation2 + $0xf0] sm:$0xff] }
 0x21b   : > { %v2349_v1 = vld [vmem:[#allocation2 + $0xa8] sm:$0xff]  ;;  %2321 = vst.msk [vmem:[#allocation2 + $0xc8] sm:$0xff] %vm1112_vm3, %v2289_v35 }
 0x21c   : > { %2381 = vst.msk [vmem:[%s3993_s27 + $0xa8] sm:$0xff] %vm1112_vm3, %v2349_v1  ;;  %v2348_v33 = vld [vmem:[#allocation2 + $0xa0] sm:$0xff]  ;;  %2320 = vst.msk [vmem:[#allocation2 + $0xc0] sm:$0xff] %vm1112_vm3, %v2288_v15  ;;  %v2936_v60 = vpop.f32.mrb[42].mxu0 }
 0x21d   : > { %2380 = vst.msk [vmem:[%s3993_s27 + $0xa0] sm:$0xff] %vm1112_vm3, %v2348_v33  ;;  %v2291_v2 = vadd.f32 %v2936_v60, %v2018_v41  ;;  %v2235_v11 = vpop.f32.mrb[43].mxu0 }
 0x21e   : > { %v2351_v21 = vld [vmem:[#allocation2 + $0xb8] sm:$0xff]  ;;  %v2290_v38 = vadd.f32 %v2235_v11, %v2017_v53 }
 0x21f   : > { %2383 = vst.msk [vmem:[%s3993_s27 + $0xb8] sm:$0xff] %vm1112_vm3, %v2351_v21  ;;  %v2350_v18 = vld [vmem:[#allocation2 + $0xb0] sm:$0xff]  ;;  %2323 = vst.msk [vmem:[#allocation2 + $0xd8] sm:$0xff] %vm1112_vm3, %v2291_v2 }
 0x220   : > { %2382 = vst.msk [vmem:[%s3993_s27 + $0xb0] sm:$0xff] %vm1112_vm3, %v2350_v18  ;;  %2322 = vst.msk [vmem:[#allocation2 + $0xd0] sm:$0xff] %vm1112_vm3, %v2290_v38  ;;  %v2939_v50 = vpop.f32.mrb[44].mxu0 }
 0x221   : > { %v2293_v42 = vadd.f32 %v2939_v50, %v2020_v56  ;;  %v2245_v29 = vpop.f32.mrb[45].mxu0 }
 0x222   : > { %v2353_v26 = vld [vmem:[#allocation2 + $0xc8] sm:$0xff]  ;;  %v2292_v39 = vadd.f32 %v2245_v29, %v2019_v45 }
 0x223   : > { %2385 = vst.msk [vmem:[%s3993_s27 + $0xc8] sm:$0xff] %vm1112_vm3, %v2353_v26  ;;  %v2352_v52 = vld [vmem:[#allocation2 + $0xc0] sm:$0xff]  ;;  %2325 = vst.msk [vmem:[#allocation2 + $0xe8] sm:$0xff] %vm1112_vm3, %v2293_v42 }
 0x224   : > { %2384 = vst.msk [vmem:[%s3993_s27 + $0xc0] sm:$0xff] %vm1112_vm3, %v2352_v52  ;;  %2324 = vst.msk [vmem:[#allocation2 + $0xe0] sm:$0xff] %vm1112_vm3, %v2292_v39  ;;  %v2942_v19 = vpop.f32.mrb[46].mxu0 }
 0x225   : > { %v2295_v54 = vadd.f32 %v2942_v19, %v2022_v12  ;;  %v2255_v62 = vpop.f32.mrb[47].mxu0 }
 0x226   : > { %v2355_v3 = vld [vmem:[#allocation2 + $0xd8] sm:$0xff]  ;;  %v2294_v28 = vadd.f32 %v2255_v62, %v2021_v55 }
 0x227   : > { %2387 = vst.msk [vmem:[%s3993_s27 + $0xd8] sm:$0xff] %vm1112_vm3, %v2355_v3  ;;  %v2354_v6 = vld [vmem:[#allocation2 + $0xd0] sm:$0xff]  ;;  %2327 = vst.msk [vmem:[#allocation2 + $0xf8] sm:$0xff] %vm1112_vm3, %v2295_v54 }
 0x228   : > { %2386 = vst.msk [vmem:[%s3993_s27 + $0xd0] sm:$0xff] %vm1112_vm3, %v2354_v6  ;;  %2326 = vst.msk [vmem:[#allocation2 + $0xf0] sm:$0xff] %vm1112_vm3, %v2294_v28 }
 0x22a   : > { %v2357_v0 = vld [vmem:[#allocation2 + $0xe8] sm:$0xff] }
 0x22b   : > { %2389 = vst.msk [vmem:[%s3993_s27 + $0xe8] sm:$0xff] %vm1112_vm3, %v2357_v0  ;;  %v2356_v61 = vld [vmem:[#allocation2 + $0xe0] sm:$0xff] }
 0x22c   : > { %2388 = vst.msk [vmem:[%s3993_s27 + $0xe0] sm:$0xff] %vm1112_vm3, %v2356_v61 }
 0x22e   : > { %v2359_v31 = vld [vmem:[#allocation2 + $0xf8] sm:$0xff] }
 0x22f   : > { %2391 = vst.msk [vmem:[%s3993_s27 + $0xf8] sm:$0xff] %vm1112_vm3, %v2359_v31  ;;  %v2358_v49 = vld [vmem:[#allocation2 + $0xf0] sm:$0xff] }
 0x230   : > { %2390 = vst.msk [vmem:[%s3993_s27 + $0xf0] sm:$0xff] %vm1112_vm3, %v2358_v49 }
 0x231 PF: > { %s15_s22 = sadd.s32 1, %s3039_s22   ;;  %s4128_s18 = smov %s3031_s20 }
 0x232   : > { %p12_p12 = scmp.ge.s32.totalorder %s15_s22, 10   ;;  %s4129_s19 = smov %s3035_s21 }
 0x233   : > { %s4130_s20 = smov %s4133_s23  ;;  %s4131_s21 = smov %s4137_s24 }
 0x234   :  { %14 = sbr.rel (!%p12_p12) target bundleno = 3 (0x3), region = 78 }

// kernel: upblock_forward.2
= control target key start
LH: loop header
LB: loop body
LE: loop exit
PB: predicated region body
PF: predicated region fallthrough
CT: control target
= control target key end

     0   :  { %s3078_s18 = smov 0   ;;  %s3080_s19 = smov 0   ;;  %s4137_s0 = inlined_call_operand.vmem [shape: f32[2,32,32,4], index: 0, kind: input, shape index: {}, may-alias: {0,1,2}]   ;;  %s4138_s1 = inlined_call_operand.vmem [shape: f32[2,32,32,4], index: 1, kind: input, shape index: {}, may-alias: {0,1,2}]   ;;  %s4139_s2 = inlined_call_operand.vmem [shape: f32[2,32,32,4], index: 2, kind: input, shape index: {}, may-alias: {0,1,2}]   ;;  %s4140_s3 = inlined_call_operand.vmem [shape: f32[3,12,8], index: 3, kind: input, shape index: {}]   ;;  %s4141_s4 = inlined_call_operand.vmem [shape: f32[1,8], index: 4, kind: input, shape index: {}]   ;;  %s4142_s5 = inlined_call_operand.vmem [shape: f32[2,32,32,8], index: 5, kind: output, shape index: {}]  }
   0x1   :  { %s3082_s20 = smov 0   ;;  %s3084_s21 = smov 0  }
   0x2   :  { %s3086_s22 = smov 0  }
   0x3 LB: > { %s24_s23 = sadd.s32 1, %s3035_s20  ;;  %s27_s24 = sadd.s32 1, %s3039_s21  ;;  %s3043_s22 = sphi %s3086_s22, %s15_s22   ;;  %s3039_s21 = sphi %s3084_s21, %s4149_s21   ;;  %s3035_s20 = sphi %s3082_s20, %s4148_s20   ;;  %s3031_s19 = sphi %s3080_s19, %s4147_s19   ;;  %s3027_s18 = sphi %s3078_s18, %s4146_s18  }
   0x4   : > { %p25_p0 = scmp.ge.s32.totalorder %s24_s23, 4  ;;  %p2550_p1 = scmp.ge.s32.totalorder %s3043_s22, 1 }
   0x5   : > { %p273_p2 = scmp.lt.s32.totalorder %s3043_s22, 9 }
   0x6   : > { %s4151_s23 = smov (%p25_p0, %s24_s23), 0  ;;  %s4153_s24 = smov (!%p25_p0, %s27_s24), %s3039_s21 }
   0x7   : > { %p274_p3 = pnand %p2550_p1, %p273_p2  ;;  %p29_p4 = scmp.ge.s32.totalorder %s4153_s24, 2 }
   0x8   : > { %s3111_s25 = sshll.u32 (!%p274_p3), %s3027_s18, 3  ;;  %p341_p5 = scmp.lt.s32.totalorder (!%p274_p3), %s3031_s19, 1  ;;  %v1265_v0 = vld [vmem:[%s4140_s3] sm:$0xff] (!%p274_p3)  ;;  %v1266_v1 = vld [vmem:[%s4140_s3 + $0x8] sm:$0xf] (!%p274_p3)  ;;  %vm1364_vm0 = vcmask (!%p274_p3), 1043456  }
   0x9   : > { %s4155_s24 = smov (%p29_p4, %s4153_s24), 0  ;;  %277 = sbr.rel (%p274_p3) target bundleno = 561 (0x231), region = 40 }
   0xa   : > { %p357_p6 = scmp.lt.s32.totalorder (!%p274_p3), %s3111_s25, 31  ;;  %s2552_s8 = sadd.s32 (!%p274_p3), 4294967295, %s3111_s25  ;;  %v2942_v2 = vpack.c.bf16 (!%p274_p3), %v1266_v1, %v1265_v0  ;;  %vm3045_vm1 = vmmov (!%p274_p3), 1   ;;  %vm529_vm3 = vcmask (!%p274_p3), 1040384   ;;  %vm901_vm4 = vcmask (!%p274_p3), 1045504  }
   0xb   : > { %p339_p7 = scmp.gt.s32.totalorder (!%p274_p3), %s2552_s8, 0  ;;  %vm3127_vm2 = vmpackc.low (!%p274_p3), %vm1364_vm0, %vm3045_vm1  ;;  %p2553_p8 = scmp.lt.s32.totalorder (!%p274_p3), %s2552_s8, 31  ;;  %vm690_vm5 = vcmask (!%p274_p3), 1046528   ;;  %vm1112_vm6 = vcmask (!%p274_p3), 31744   ;;  %vm1153_vm7 = vcmask (!%p274_p3), 64512   ;;  %vm1267_vm8 = vcmask (!%p274_p3), 97280  }
   0xc   : > { %2960 = vmatprep.subr.msk.bf16.mxu1 (!%p274_p3), %vm3127_vm2, %v2942_v2  ;;  %2944 = vmatprep.subr.msk.bf16.mxu0 (!%p274_p3), %vm3127_vm2, %v2942_v2  ;;  %p397_p9 = scmp.gt.s32.totalorder (!%p274_p3), %s3027_s18, 0  ;;  %s3046_s30 = smov (!%p274_p3), 8  }
   0xd   : > { %2961 = vmatpush3.bf16.msk.msra.mxu1 (!%p274_p3), %vm3127_vm2, %v2942_v2  ;;  %2947 = vmatpush3.bf16.msk.msra.mxu0 (!%p274_p3), %vm3127_vm2, %v2942_v2  ;;  %s3047_s6 = smov (!%p274_p3), 4   ;;  %p409_p11 = scmp.lt.s32.totalorder (!%p274_p3), %s3027_s18, 3 }
  0x10   : > { %s4157_s19 = smov (!%p341_p5, %s3031_s19), 1 }
  0x11   : > { %s358_s26 = scalar_select %p357_p6, %s3111_s25, 31 }
  0x12   : > { %s3115_s27 = sshll.u32 %s4157_s19, 7 }
  0x13   : > { %s2562_s7 = sshll.u32 %s358_s26, 2 }
  0x14   : > { %s3125_s9 = sadd.s32 %s2562_s7, %s3115_s27 }
  0x15   : > { %s2564_s10 = sshll.u32 %s3125_s9, 3 }
  0x16   : > { %s3141_s13 = scalar_lea.vmem %s4138_s1, %s2564_s10 }
  0x17   : > { %v429_v4 = vld [vmem:[%s3141_s13 + $0x60] sm:$0xff]  ;;  %v430_v5 = vld [vmem:[%s3141_s13 + $0x68] sm:$0xff]  ;;  %v431_v6 = vld [vmem:[%s3141_s13 + $0x70] sm:$0xff]  ;;  %s340_s14 = scalar_select %p339_p7, %s2552_s8, 0 }
  0x18   : > { %v465_v7 = vmax.f32 %v429_v4, 0.0  ;;  %v466_v8 = vmax.f32 %v430_v5, 0.0  ;;  %v467_v9 = vmax.f32 %v431_v6, 0.0  ;;  %v432_v10 = vld [vmem:[%s3141_s13 + $0x78] sm:$0xff]  ;;  %v433_v11 = vld [vmem:[%s3141_s13 + $0x80] sm:$0xff]  ;;  %v434_v12 = vld [vmem:[%s3141_s13 + $0x88] sm:$0xff] }
  0x19   : > { %v468_v13 = vmax.f32 %v432_v10, 0.0  ;;  %v435_v14 = vld [vmem:[%s3141_s13 + $0x90] sm:$0xff]  ;;  %s4159_s14 = smov (!%p2553_p8, %s340_s14), 31  ;;  %v469_v19 = vmax.f32 %v433_v11, 0.0  ;;  %v470_v20 = vmax.f32 %v434_v12, 0.0  ;;  %v436_v55 = vld [vmem:[%s3141_s13 + $0x98] sm:$0xff] }
  0x1a   : > { %v558_v15 = vrot.slane %v465_v7, 7  ;;  %v559_v16 = vrot.slane %v466_v8, 7  ;;  %v561_v17 = vrot.slane %v467_v9, 7  ;;  %s2558_s15 = sshll.u32 %s4159_s14, 2  ;;  %v471_v24 = vmax.f32 %v435_v14, 0.0  ;;  %s366_s8 = sadd.s32 8, %s3111_s25 }
  0x1b   : > { %v563_v18 = vrot.slane %v468_v13, 7  ;;  %s347_s16 = sadd.s32 %s3115_s27, %s2558_s15  ;;  %v565_v37 = vrot.slane %v469_v19, 7  ;;  %v566_v40 = vrot.slane %v470_v20, 7  ;;  %v472_v63 = vmax.f32 %v436_v55, 0.0  ;;  %p3256_p10 = scmp.lt.s32.totalorder %s366_s8, 31  ;;  %v417_v55 = vld [vmem:[%s3141_s13] sm:$0xff] }
  0x1c   : > { %v3157_v21 = vsel %vm529_vm3, %v558_v15, %v559_v16  ;;  %v3160_v22 = vsel %vm529_vm3, 0.0, %v558_v15  ;;  %v3163_v23 = vsel %vm529_vm3, %v559_v16, %v561_v17  ;;  %s2560_s17 = sshll.u32 %s347_s16, 3  ;;  %v568_v41 = vrot.slane %v471_v24, 7  ;;  %s4009_s14 = scalar_lea.vmem %s4142_s5, %s2564_s10 }
  0x1d   : > { %v938_v25 = vrot.slane %v3160_v22, 2  ;;  %v939_v26 = vrot.slane %v3157_v21, 2  ;;  %v727_v27 = vrot.slane %v3160_v22, 1  ;;  %v728_v28 = vrot.slane %v3157_v21, 1  ;;  %s3179_s28 = scalar_lea.vmem %s4137_s0, %s2560_s17  ;;  %s4161_s8 = smov (!%p3256_p10, %s366_s8), 31 }
  0x1e   : > { %v941_v29 = vrot.slane %v3163_v23, 2  ;;  %v730_v30 = vrot.slane %v3163_v23, 1  ;;  %v3173_v31 = vsel %vm529_vm3, %v561_v17, %v563_v18  ;;  %v664_v32 = vsel %vm529_vm3, %v563_v18, 0.0  ;;  %s398_s29 = scalar_select %p397_p9, 1, 0  ;;  %v393_v42 = vld [vmem:[%s3179_s28] sm:$0xff] }
  0x1f   : > { %v940_v33 = vsel %vm901_vm4, %v938_v25, %v939_v26  ;;  %v729_v34 = vsel %vm690_vm5, %v727_v27, %v728_v28  ;;  %v732_v35 = vrot.slane %v3173_v31, 1  ;;  %v734_v36 = vrot.slane %v664_v32, 1  ;;  %v394_v43 = vld [vmem:[%s3179_s28 + $0x8] sm:$0xff]  ;;  %v395_v44 = vld [vmem:[%s3179_s28 + $0x10] sm:$0xff]  ;;  %v396_v8 = vld [vmem:[%s3179_s28 + $0x18] sm:$0xff]  ;;  %s4163_s8 = smov (!%p3256_p10, %s4161_s8), 31 }
  0x20   : > { %1024 = vrot.lane.b32.xlu1 %v940_v33, %s3046_s30  ;;  %813 = vrot.lane.b32.xlu0 %v729_v34, %s3047_s6  ;;  %v942_v38 = vsel %vm901_vm4, %v939_v26, %v941_v29  ;;  %v731_v39 = vsel %vm690_vm5, %v728_v28, %v730_v30  ;;  %s399_s7 = scvt.s32.f32 %s398_s29  ;;  %v943_v45 = vrot.slane %v3173_v31, 2  ;;  %v945_v49 = vrot.slane %v664_v32, 2  ;;  %s3277_s25 = sshll.u32 %s4163_s8, 2 }
  0x21   : > { %v735_v47 = vsel %vm690_vm5, %v732_v35, %v734_v36  ;;  %v733_v48 = vsel %vm690_vm5, %v730_v30, %v732_v35  ;;  %v3199_v51 = vsel %vm529_vm3, %v565_v37, %v566_v40  ;;  %v3202_v52 = vsel %vm529_vm3, %v566_v40, %v568_v41  ;;  %v437_v35 = vld [vmem:[%s3141_s13 + $0xa0] sm:$0xff]  ;;  %v438_v36 = vld [vmem:[%s3141_s13 + $0xa8] sm:$0xff]  ;;  %s375_s12 = sadd.s32 %s3277_s25, %s3115_s27 }
  0x22   : > { %v400_v46 = vstv %s399_s7  ;;  %v3206_v56 = vsel %vm529_vm3, 0.0, %v565_v37  ;;  %v737_v60 = vrot.slane %v3199_v51, 1  ;;  %v739_v61 = vrot.slane %v3202_v52, 1  ;;  %s3508_s18 = scalar_select %p409_p11, 1, 0 }
  0x23   : > { %v401_v50 = vmul.f32 %v400_v46, %v393_v42  ;;  %v402_v53 = vmul.f32 %v400_v46, %v394_v43  ;;  %v403_v54 = vmul.f32 %v400_v46, %v395_v44  ;;  %v946_v0 = vsel %vm901_vm4, %v943_v45, %v945_v49  ;;  %v439_v44 = vld [vmem:[%s3141_s13 + $0xb0] sm:$0xff]  ;;  %s2571_s7 = sshll.u32 %s375_s12, 3 }
  0x24   : > { %1026 = vrot.lane.b32.xlu1 %v942_v38, %s3046_s30  ;;  %815 = vrot.lane.b32.xlu0 %v731_v39, %s3047_s6  ;;  %v944_v1 = vsel %vm901_vm4, %v941_v29, %v943_v45  ;;  %v736_v2 = vrot.slane %v3206_v56, 1  ;;  %v740_v9 = vsel %vm690_vm5, %v737_v60, %v739_v61  ;;  %v947_v10 = vrot.slane %v3206_v56, 2  ;;  %s411_s8 = scvt.s32.f32 %s3508_s18 }
  0x25   : > { %v449_v57 = vmax.f32 %v401_v50, 0.0  ;;  %v450_v58 = vmax.f32 %v402_v53, 0.0  ;;  %v451_v59 = vmax.f32 %v403_v54, 0.0  ;;  %v948_v11 = vrot.slane %v3199_v51, 2 }
  0x26   : > { %v738_v12 = vsel %vm690_vm5, %v736_v2, %v737_v60  ;;  %v570_v15 = vrot.slane %v472_v63, 7  ;;  %v404_v17 = vmul.f32 %v400_v46, %v396_v8  ;;  %v950_v18 = vrot.slane %v3202_v52, 2 }
  0x27   : > { %v530_v62 = vrot.slane %v449_v57, 7  ;;  %v531_v4 = vrot.slane %v450_v58, 7  ;;  %v533_v6 = vrot.slane %v451_v59, 7  ;;  %v949_v19 = vsel %vm901_vm4, %v947_v10, %v948_v11  ;;  %v418_v57 = vld [vmem:[%s3141_s13 + $0x8] sm:$0xff] }
  0x28   : > { %819 = vrot.lane.b32.xlu1 %v735_v47, %s3047_s6  ;;  %817 = vrot.lane.b32.xlu0 %v733_v48, %s3047_s6  ;;  %v3240_v25 = vsel %vm529_vm3, %v568_v41, %v570_v15  ;;  %v452_v26 = vmax.f32 %v404_v17, 0.0  ;;  %v951_v27 = vsel %vm901_vm4, %v948_v11, %v950_v18  ;;  %v665_v33 = vsel %vm529_vm3, %v570_v15, 0.0  ;;  %v440_v17 = vld [vmem:[%s3141_s13 + $0xb8] sm:$0xff] }
  0x29   : > { %v3216_v5 = vsel %vm529_vm3, 0.0, %v530_v62  ;;  %v3219_v7 = vsel %vm529_vm3, %v530_v62, %v531_v4  ;;  %v3231_v16 = vsel %vm529_vm3, %v531_v4, %v533_v6  ;;  %v741_v28 = vrot.slane %v3240_v25, 1  ;;  %v419_v4 = vld [vmem:[%s3141_s13 + $0x10] sm:$0xff] }
  0x2a   : > { %v691_v13 = vrot.slane %v3216_v5, 1  ;;  %v692_v14 = vrot.slane %v3219_v7, 1  ;;  %v694_v24 = vrot.slane %v3231_v16, 1  ;;  %v902_v30 = vrot.slane %v3216_v5, 2 }
  0x2b   : > { %v903_v32 = vrot.slane %v3219_v7, 2  ;;  %v535_v34 = vrot.slane %v452_v26, 7  ;;  %v742_v37 = vsel %vm690_vm5, %v739_v61, %v741_v28  ;;  %v743_v38 = vrot.slane %v665_v33, 1 }
  0x2c   : > { %1030 = vrot.lane.b32.xlu1 %v946_v0, %s3046_s30  ;;  %1028 = vrot.lane.b32.xlu0 %v944_v1, %s3046_s30  ;;  %v693_v20 = vsel %vm690_vm5, %v691_v13, %v692_v14  ;;  %v695_v29 = vsel %vm690_vm5, %v692_v14, %v694_v24  ;;  %v905_v40 = vrot.slane %v3231_v16, 2  ;;  %v473_v41 = vmax.f32 %v437_v35, 0.0 }
  0x2d   : > { %v904_v39 = vsel %vm901_vm4, %v902_v30, %v903_v32  ;;  %v474_v42 = vmax.f32 %v438_v36, 0.0  ;;  %v3263_v43 = vsel %vm529_vm3, %v533_v6, %v535_v34  ;;  %v744_v45 = vsel %vm690_vm5, %v741_v28, %v743_v38 }
  0x2e   : > { %v952_v46 = vrot.slane %v3240_v25, 2  ;;  %v906_v47 = vsel %vm901_vm4, %v903_v32, %v905_v40  ;;  %v696_v48 = vrot.slane %v3263_v43, 1  ;;  %v572_v49 = vrot.slane %v473_v41, 7 }
  0x2f   : > { %v573_v50 = vrot.slane %v474_v42, 7  ;;  %v660_v53 = vsel %vm529_vm3, %v535_v34, 0.0  ;;  %v475_v54 = vmax.f32 %v439_v44, 0.0  ;;  %v954_v58 = vrot.slane %v665_v33, 2 }
  0x30   : > { %823 = vrot.lane.b32.xlu1 %v740_v9, %s3047_s6  ;;  %821 = vrot.lane.b32.xlu0 %v738_v12, %s3047_s6  ;;  %v953_v59 = vsel %vm901_vm4, %v950_v18, %v952_v46  ;;  %v697_v60 = vsel %vm690_vm5, %v694_v24, %v696_v48  ;;  %v698_v61 = vrot.slane %v660_v53, 1  ;;  %v3291_v63 = vsel %vm529_vm3, 0.0, %v572_v49 }
  0x31   : > { %v3288_v62 = vsel %vm529_vm3, %v572_v49, %v573_v50  ;;  %v575_v0 = vrot.slane %v475_v54, 7  ;;  %v453_v1 = vmax.f32 %v417_v55, 0.0  ;;  %v454_v2 = vmax.f32 %v418_v57, 0.0  ;;  %v441_v57 = vld [vmem:[%s3141_s13 + $0xc0] sm:$0xff] }
  0x32   : > { %v955_v6 = vsel %vm901_vm4, %v952_v46, %v954_v58  ;;  %v699_v8 = vsel %vm690_vm5, %v696_v48, %v698_v61  ;;  %v907_v9 = vrot.slane %v3263_v43, 2  ;;  %v745_v10 = vrot.slane %v3291_v63, 1  ;;  %v442_v58 = vld [vmem:[%s3141_s13 + $0xc8] sm:$0xff] }
  0x33   : > { %v746_v11 = vrot.slane %v3288_v62, 1  ;;  %v3302_v12 = vsel %vm529_vm3, %v573_v50, %v575_v0  ;;  %v537_v13 = vrot.slane %v453_v1, 7  ;;  %v538_v14 = vrot.slane %v454_v2, 7 }
  0x34   : > { %1032 = vrot.lane.b32.xlu0 %v949_v19, %s3046_s30  ;;  %781 = vrot.lane.b32.xlu1 %v693_v20, %s3047_s6  ;;  %v455_v15 = vmax.f32 %v419_v4, 0.0  ;;  %v909_v18 = vrot.slane %v660_v53, 2  ;;  %v908_v19 = vsel %vm901_vm4, %v905_v40, %v907_v9  ;;  %v748_v24 = vrot.slane %v3302_v12, 1 }
  0x35   : > { %v747_v20 = vsel %vm690_vm5, %v745_v10, %v746_v11  ;;  %v3311_v26 = vsel %vm529_vm3, %v537_v13, %v538_v14  ;;  %v956_v32 = vrot.slane %v3291_v63, 2  ;;  %v957_v34 = vrot.slane %v3288_v62, 2 }
  0x36   : > { %v540_v28 = vrot.slane %v455_v15, 7  ;;  %v910_v30 = vsel %vm901_vm4, %v907_v9, %v909_v18  ;;  %v749_v33 = vsel %vm690_vm5, %v746_v11, %v748_v24  ;;  %v701_v36 = vrot.slane %v3311_v26, 1  ;;  %v421_v18 = vld [vmem:[%s3141_s13 + $0x20] sm:$0xff] }
  0x37   : > { %v958_v40 = vsel %vm901_vm4, %v956_v32, %v957_v34  ;;  %v959_v42 = vrot.slane %v3302_v12, 2  ;;  %v912_v50 = vrot.slane %v3311_v26, 2  ;;  %v477_v2 = vmax.f32 %v441_v57, 0.0 }
  0x38   : > { %1034 = vrot.lane.b32.xlu0 %v951_v27, %s3046_s30  ;;  %783 = vrot.lane.b32.xlu1 %v695_v29, %s3047_s6  ;;  %v3314_v27 = vsel %vm529_vm3, 0.0, %v537_v13  ;;  %v476_v29 = vmax.f32 %v440_v17, 0.0  ;;  %v478_v4 = vmax.f32 %v442_v58, 0.0 }
  0x39   : > { %v700_v35 = vrot.slane %v3314_v27, 1  ;;  %v960_v48 = vsel %vm901_vm4, %v957_v34, %v959_v42 }
  0x3a   : > { %v577_v38 = vrot.slane %v476_v29, 7  ;;  %v580_v15 = vrot.slane %v478_v4, 7 }
  0x3b   : > { %v702_v41 = vsel %vm690_vm5, %v700_v35, %v701_v36 }
  0x3c   : > { %992 = vrot.lane.b32.xlu0 %v904_v39, %s3046_s30  ;;  %825 = vrot.lane.b32.xlu1 %v742_v37, %s3047_s6  ;;  %v3325_v37 = vsel %vm529_vm3, %v538_v14, %v540_v28  ;;  %v420_v39 = vld [vmem:[%s3141_s13 + $0x18] sm:$0xff]  ;;  %v666_v54 = vsel %vm529_vm3, %v577_v38, 0.0  ;;  %v579_v14 = vrot.slane %v477_v2, 7 }
  0x3d   : > { %v703_v44 = vrot.slane %v3325_v37, 1  ;;  %v456_v46 = vmax.f32 %v420_v39, 0.0  ;;  %v914_v61 = vrot.slane %v3325_v37, 2 }
  0x3e   : > { %v3370_v32 = vsel %vm529_vm3, %v579_v14, %v580_v15 }
  0x3f   : > { %v704_v49 = vsel %vm690_vm5, %v701_v36, %v703_v44  ;;  %v542_v55 = vrot.slane %v456_v46, 7  ;;  %v423_v36 = vld [vmem:[%s3141_s13 + $0x30] sm:$0xff] }
  0x40   : > { %994 = vrot.lane.b32.xlu0 %v906_v47, %s3046_s30  ;;  %827 = vrot.lane.b32.xlu1 %v744_v45, %s3047_s6  ;;  %v3335_v45 = vsel %vm529_vm3, %v575_v0, %v577_v38  ;;  %v911_v47 = vrot.slane %v3314_v27, 2  ;;  %v752_v0 = vrot.slane %v666_v54, 1 }
  0x41   : > { %v750_v53 = vrot.slane %v3335_v45, 1  ;;  %v3353_v1 = vsel %vm529_vm3, %v540_v28, %v542_v55  ;;  %v961_v10 = vrot.slane %v3335_v45, 2  ;;  %v661_v13 = vsel %vm529_vm3, %v542_v55, 0.0 }
  0x42   : > { %v705_v11 = vrot.slane %v3353_v1, 1  ;;  %v707_v29 = vrot.slane %v661_v13, 1  ;;  %v916_v38 = vrot.slane %v3353_v1, 2 }
  0x43   : > { %v753_v9 = vsel %vm690_vm5, %v750_v53, %v752_v0 }
  0x44   : > { %1036 = vrot.lane.b32.xlu0 %v953_v59, %s3046_s30  ;;  %785 = vrot.lane.b32.xlu1 %v697_v60, %s3047_s6  ;;  %v913_v59 = vsel %vm901_vm4, %v911_v47, %v912_v50  ;;  %v751_v60 = vsel %vm690_vm5, %v748_v24, %v750_v53  ;;  %v962_v24 = vsel %vm901_vm4, %v959_v42, %v961_v10  ;;  %v755_v42 = vrot.slane %v3370_v32, 1  ;;  %v2610_v53 = vld [vmem:[%s4140_s3 + $0x10] sm:$0xff] }
  0x45   : > { %v706_v28 = vsel %vm690_vm5, %v703_v44, %v705_v11  ;;  %v917_v55 = vsel %vm901_vm4, %v914_v61, %v916_v38 }
  0x48   : > { %1038 = vrot.lane.b32.xlu0 %v955_v6, %s3046_s30  ;;  %787 = vrot.lane.b32.xlu1 %v699_v8, %s3047_s6  ;;  %v443_v6 = vld [vmem:[%s3141_s13 + $0xd0] sm:$0xff]  ;;  %v915_v8 = vsel %vm901_vm4, %v912_v50, %v914_v61  ;;  %v918_v50 = vrot.slane %v661_v13, 2 }
  0x49   : > { %v479_v17 = vmax.f32 %v443_v6, 0.0 }
  0x4a   : > { %v919_v61 = vsel %vm901_vm4, %v916_v38, %v918_v50 }
  0x4b   : > { %v582_v34 = vrot.slane %v479_v17, 7 }
  0x4c   : > { %996 = vrot.lane.b32.xlu0 %v908_v19, %s3046_s30  ;;  %829 = vrot.lane.b32.xlu1 %v747_v20, %s3047_s6  ;;  %v422_v19 = vld [vmem:[%s3141_s13 + $0x28] sm:$0xff]  ;;  %v963_v20 = vrot.slane %v666_v54, 2  ;;  %v2611_v54 = vld [vmem:[%s4140_s3 + $0x18] sm:$0xf] }
  0x4d   : > { %v458_v35 = vmax.f32 %v422_v19, 0.0  ;;  %v3384_v44 = vsel %vm529_vm3, %v580_v15, %v582_v34  ;;  %v424_v15 = vld [vmem:[%s3141_s13 + $0x38] sm:$0xff] }
  0x4e   : > { %v964_v39 = vsel %vm901_vm4, %v961_v10, %v963_v20  ;;  %v757_v58 = vrot.slane %v3384_v44, 1  ;;  %v968_v17 = vrot.slane %v3384_v44, 2 }
  0x4f   : > { %v545_v47 = vrot.slane %v458_v35, 7  ;;  %v2645_v35 = vld [vmem:[%s4140_s3 + $0x20] sm:$0xff] }
  0x50   : > { %998 = vrot.lane.b32.xlu0 %v910_v30, %s3046_s30  ;;  %831 = vrot.lane.b32.xlu1 %v749_v33, %s3047_s6  ;;  %v457_v30 = vmax.f32 %v421_v18, 0.0  ;;  %v3373_v33 = vsel %vm529_vm3, 0.0, %v579_v14 }
  0x51   : > { %v965_v6 = vrot.slane %v3373_v33, 2 }
  0x52   : > { %v544_v46 = vrot.slane %v457_v30, 7 }
  0x54   : > { %1040 = vrot.lane.b32.xlu0 %v958_v40, %s3046_s30  ;;  %789 = vrot.lane.b32.xlu1 %v702_v41, %s3047_s6  ;;  %v708_v40 = vsel %vm690_vm5, %v705_v11, %v707_v29  ;;  %v754_v41 = vrot.slane %v3373_v33, 1  ;;  %v3404_v0 = vsel %vm529_vm3, 0.0, %v544_v46 }
  0x55   : > { %v709_v10 = vrot.slane %v3404_v0, 1  ;;  %v920_v30 = vrot.slane %v3404_v0, 2 }
  0x56   : > { %v756_v57 = vsel %vm690_vm5, %v754_v41, %v755_v42 }
  0x58   : > { %1042 = vrot.lane.b32.xlu0 %v960_v48, %s3046_s30  ;;  %791 = vrot.lane.b32.xlu1 %v704_v49, %s3047_s6  ;;  %v459_v48 = vmax.f32 %v423_v36, 0.0  ;;  %v444_v49 = vld [vmem:[%s3141_s13 + $0xd8] sm:$0xff]  ;;  %v2646_v36 = vld [vmem:[%s4140_s3 + $0x28] sm:$0xf] }
  0x59   : > { %v480_v4 = vmax.f32 %v444_v49, 0.0 }
  0x5a   : > { %v547_v2 = vrot.slane %v459_v48, 7 }
  0x5b   : > { %v584_v14 = vrot.slane %v480_v4, 7 }
  0x5c   : > { %1000 = vrot.lane.b32.xlu0 %v913_v59, %s3046_s30  ;;  %833 = vrot.lane.b32.xlu1 %v751_v60, %s3047_s6  ;;  %v3398_v59 = vpack.c.bf16 %v2611_v54, %v2610_v53  ;;  %v3401_v60 = vsel %vm529_vm3, %v544_v46, %v545_v47  ;;  %v3418_v13 = vsel %vm529_vm3, %v545_v47, %v547_v2  ;;  %v425_v53 = vld [vmem:[%s3141_s13 + $0x40] sm:$0xff]  ;;  %v426_v54 = vld [vmem:[%s3141_s13 + $0x48] sm:$0xff] }
  0x5d   : > { %v710_v11 = vrot.slane %v3401_v60, 1  ;;  %v712_v20 = vrot.slane %v3418_v13, 1  ;;  %v921_v38 = vrot.slane %v3401_v60, 2  ;;  %v667_v41 = vsel %vm529_vm3, %v584_v14, 0.0 }
  0x5e   : > { %2950 = vmatprep.subr.msk.bf16.mxu1 %vm3127_vm2, %v3398_v59  ;;  %v923_v48 = vrot.slane %v3418_v13, 2  ;;  %v761_v49 = vrot.slane %v667_v41, 1 }
  0x5f   : > { %v711_v19 = vsel %vm690_vm5, %v709_v10, %v710_v11  ;;  %v922_v46 = vsel %vm901_vm4, %v920_v30, %v921_v38 }
  0x60   : > { %1002 = vrot.lane.b32.xlu0 %v915_v8, %s3046_s30  ;;  %835 = vrot.lane.b32.xlu1 %v753_v9, %s3047_s6  ;;  %v758_v8 = vsel %vm690_vm5, %v755_v42, %v757_v58  ;;  %v966_v9 = vrot.slane %v3370_v32, 2 }
  0x62   : > { %v967_v18 = vsel %vm901_vm4, %v965_v6, %v966_v9  ;;  %v969_v29 = vsel %vm901_vm4, %v966_v9, %v968_v17 }
  0x64   : > { %1044 = vrot.lane.b32.xlu0 %v962_v24, %s3046_s30  ;;  %793 = vrot.lane.b32.xlu1 %v706_v28, %s3047_s6  ;;  %v3428_v24 = vsel %vm529_vm3, %v582_v34, %v584_v14  ;;  %v460_v28 = vmax.f32 %v424_v15, 0.0  ;;  %v713_v34 = vsel %vm690_vm5, %v710_v11, %v712_v20  ;;  %v972_v14 = vrot.slane %v667_v41, 2 }
  0x66   : > { %v549_v42 = vrot.slane %v460_v28, 7 }
  0x68   : > { %1046 = vrot.lane.b32.xlu0 %v964_v39, %s3046_s30  ;;  %795 = vrot.lane.b32.xlu1 %v708_v40, %s3047_s6  ;;  %v759_v39 = vrot.slane %v3428_v24, 1  ;;  %v3443_v40 = vpack.c.bf16 %v2646_v36, %v2645_v35  ;;  %v3455_v50 = vsel %vm529_vm3, %v547_v2, %v549_v42  ;;  %v662_v6 = vsel %vm529_vm3, %v549_v42, 0.0 }
  0x69   : > { %v461_v2 = vmax.f32 %v425_v53, 0.0  ;;  %v716_v15 = vrot.slane %v662_v6, 1  ;;  %v925_v30 = vrot.slane %v3455_v50, 2  ;;  %v445_v53 = vld [vmem:[%s3141_s13 + $0xe0] sm:$0xff] }
  0x6a   : > { %2956 = vmatprep.subr.msk.bf16.mxu0 %vm3127_vm2, %v3443_v40  ;;  %v760_v47 = vsel %vm690_vm5, %v757_v58, %v759_v39  ;;  %v762_v4 = vsel %vm690_vm5, %v759_v39, %v761_v49  ;;  %v970_v58 = vrot.slane %v3428_v24, 2 }
  0x6b   : > { %v926_v41 = vsel %vm901_vm4, %v923_v48, %v925_v30 }
  0x6c   : > { %1004 = vrot.lane.b32.xlu0 %v917_v55, %s3046_s30  ;;  %837 = vrot.lane.b32.xlu1 %v756_v57, %s3047_s6  ;;  %v427_v55 = vld [vmem:[%s3141_s13 + $0x50] sm:$0xff]  ;;  %v924_v57 = vsel %vm901_vm4, %v921_v38, %v923_v48  ;;  %v971_v10 = vsel %vm901_vm4, %v968_v17, %v970_v58  ;;  %v973_v35 = vsel %vm901_vm4, %v970_v58, %v972_v14  ;;  %v481_v58 = vmax.f32 %v445_v53, 0.0 }
  0x6d   : > { %v463_v9 = vmax.f32 %v427_v55, 0.0  ;;  %v446_v55 = vld [vmem:[%s3141_s13 + $0xe8] sm:$0xff] }
  0x6f   : > { %v554_v28 = vrot.slane %v463_v9, 7 }
  0x70   : > { %1006 = vrot.lane.b32.xlu0 %v919_v61, %s3046_s30  ;;  %839 = vrot.lane.b32.xlu1 %v758_v8, %s3047_s6  ;;  %v714_v61 = vrot.slane %v3455_v50, 1  ;;  %v462_v8 = vmax.f32 %v426_v54, 0.0 }
  0x72   : > { %v715_v11 = vsel %vm690_vm5, %v712_v20, %v714_v61  ;;  %v717_v17 = vsel %vm690_vm5, %v714_v61, %v716_v15  ;;  %v927_v20 = vrot.slane %v662_v6, 2  ;;  %v586_v15 = vrot.slane %v481_v58, 7 }
  0x74   : > { %1048 = vrot.lane.b32.xlu0 %v967_v18, %s3046_s30  ;;  %797 = vrot.lane.b32.xlu1 %v711_v19, %s3047_s6  ;;  %v551_v18 = vrot.slane %v461_v2, 7  ;;  %v552_v19 = vrot.slane %v462_v8, 7  ;;  %v928_v42 = vsel %vm901_vm4, %v925_v30, %v927_v20  ;;  %v482_v8 = vmax.f32 %v446_v55, 0.0  ;;  %v448_v20 = vld [vmem:[%s3141_s13 + $0xf8] sm:$0xff] }
  0x75   : > { %v484_v55 = vmax.f32 %v448_v20, 0.0 }
  0x76   : > { %v3478_v36 = vsel %vm529_vm3, %v551_v18, %v552_v19  ;;  %v3484_v38 = vsel %vm529_vm3, %v552_v19, %v554_v28 }
  0x77   : > { %v721_v49 = vrot.slane %v3484_v38, 1  ;;  %v930_v48 = vrot.slane %v3478_v36, 2  ;;  %v932_v2 = vrot.slane %v3484_v38, 2 }
  0x78   : > { %1050 = vrot.lane.b32.xlu0 %v969_v29, %s3046_s30  ;;  %799 = vrot.lane.b32.xlu1 %v713_v34, %s3047_s6  ;;  %v428_v29 = vld [vmem:[%s3141_s13 + $0x58] sm:$0xff]  ;;  %v3481_v34 = vsel %vm529_vm3, 0.0, %v551_v18 }
  0x79   : > { %v464_v39 = vmax.f32 %v428_v29, 0.0  ;;  %v933_v18 = vsel %vm901_vm4, %v930_v48, %v932_v2  ;;  %v587_v29 = vrot.slane %v482_v8, 7  ;;  %v412_v8 = vstv %s411_s8 }
  0x7b   : > { %v556_v54 = vrot.slane %v464_v39, 7 }
  0x7c   : > { %1008 = vrot.lane.b32.xlu0 %v922_v46, %s3046_s30  ;;  %841 = vrot.lane.b32.xlu1 %v760_v47, %s3047_s6  ;;  %v718_v46 = vrot.slane %v3481_v34, 1  ;;  %v719_v47 = vrot.slane %v3478_v36, 1 }
  0x7d   : > { %v3505_v9 = vsel %vm529_vm3, %v554_v28, %v556_v54 }
  0x7e   : > { %v720_v61 = vsel %vm690_vm5, %v718_v46, %v719_v47  ;;  %v722_v6 = vsel %vm690_vm5, %v719_v47, %v721_v49  ;;  %v723_v19 = vrot.slane %v3505_v9, 1  ;;  %v3529_v47 = vsel %vm529_vm3, 0.0, %v586_v15 }
  0x80   : > { %1010 = vrot.lane.b32.xlu0 %v924_v57, %s3046_s30  ;;  %843 = vrot.lane.b32.xlu1 %v762_v4, %s3047_s6  ;;  %v447_v57 = vld [vmem:[%s3141_s13 + $0xf0] sm:$0xff]  ;;  %v929_v4 = vrot.slane %v3481_v34, 2  ;;  %s3534_s13 = scalar_lea.vmem %s4139_s2, %s2571_s7 }
  0x82   : > { %v931_v14 = vsel %vm901_vm4, %v929_v4, %v930_v48 }
  0x84   : > { %1052 = vrot.lane.b32.xlu0 %v971_v10, %s3046_s30  ;;  %801 = vrot.lane.b32.xlu1 %v715_v11, %s3047_s6  ;;  %v663_v10 = vsel %vm529_vm3, %v556_v54, 0.0  ;;  %v483_v11 = vmax.f32 %v447_v57, 0.0  ;;  %v3541_v54 = vsel %vm529_vm3, %v586_v15, %v587_v29 }
  0x85   : > { %v725_v28 = vrot.slane %v663_v10, 1  ;;  %v936_v46 = vrot.slane %v663_v10, 2  ;;  %v763_v10 = vrot.slane %v3529_v47, 1 }
  0x87   : > { %v726_v53 = vsel %vm690_vm5, %v723_v19, %v725_v28 }
  0x88   : > { %1054 = vrot.lane.b32.xlu0 %v973_v35, %s3046_s30  ;;  %803 = vrot.lane.b32.xlu1 %v717_v17, %s3047_s6  ;;  %v589_v17 = vrot.slane %v483_v11, 7  ;;  %v764_v11 = vrot.slane %v3541_v54, 1 }
  0x8a   : > { %v3544_v48 = vsel %vm529_vm3, %v587_v29, %v589_v17 }
  0x8c   : > { %1012 = vrot.lane.b32.xlu0 %v926_v41, %s3046_s30  ;;  %1014 = vrot.lane.b32.xlu1 %v928_v42, %s3046_s30  ;;  %v934_v42 = vrot.slane %v3505_v9, 2 }
  0x8e   : > { %v937_v15 = vsel %vm901_vm4, %v934_v42, %v936_v46 }
  0x90   : > { %805 = vrot.lane.b32.xlu0 %v720_v61, %s3047_s6  ;;  %807 = vrot.lane.b32.xlu1 %v722_v6, %s3047_s6  ;;  %v405_v61 = vld [vmem:[%s3534_s13] sm:$0xff]  ;;  %v406_v6 = vld [vmem:[%s3534_s13 + $0x8] sm:$0xff] }
  0x92   : > { %v1025_v30 = vpop.permute.xlu1 %1024  ;;  %v814_v35 = vpop.permute.xlu0 %813 }
  0x93   : > { %v1129_v39 = vsel %vm1112_vm6, %v3160_v22, %v814_v35  ;;  %v724_v22 = vsel %vm690_vm5, %v721_v49, %v723_v19  ;;  %v591_v19 = vrot.slane %v484_v55, 7  ;;  %v414_v35 = vmul.f32 %v412_v8, %v406_v6 }
  0x94   : > { %1016 = vrot.lane.b32.xlu0 %v931_v14, %s3046_s30  ;;  %1018 = vrot.lane.b32.xlu1 %v933_v18, %s3046_s30  ;;  %v3525_v41 = vsel %vm1153_vm7, %v1129_v39, %v1025_v30  ;;  %v407_v14 = vld [vmem:[%s3534_s13 + $0x10] sm:$0xff]  ;;  %v766_v18 = vrot.slane %v3544_v48, 1  ;;  %v413_v30 = vmul.f32 %v412_v8, %v405_v61  ;;  %v974_v39 = vrot.slane %v3529_v47, 2 }
  0x95   : > { %2814 = vmatprep.mubr.msk.f32.mxu1 %vm1267_vm8, %v3525_v41  ;;  %v415_v20 = vmul.f32 %v412_v8, %v407_v14  ;;  %v486_v6 = vmax.f32 %v414_v35, 0.0  ;;  %v408_v14 = vld [vmem:[%s3534_s13 + $0x18] sm:$0xff] }
  0x96   : > { %v1027_v57 = vpop.permute.xlu1 %1026  ;;  %v816_v4 = vpop.permute.xlu0 %815  ;;  %v767_v46 = vsel %vm690_vm5, %v764_v11, %v766_v18  ;;  %v485_v61 = vmax.f32 %v413_v30, 0.0  ;;  %v416_v35 = vmul.f32 %v412_v8, %v408_v14 }
  0x97   : > { %v1130_v58 = vsel %vm1112_vm6, %v3157_v21, %v816_v4  ;;  %v935_v21 = vsel %vm901_vm4, %v932_v2, %v934_v42  ;;  %v765_v2 = vsel %vm690_vm5, %v763_v10, %v764_v11  ;;  %v975_v42 = vrot.slane %v3541_v54, 2 }
  0x98   : > { %809 = vrot.lane.b32.xlu0 %v724_v22, %s3047_s6  ;;  %811 = vrot.lane.b32.xlu1 %v726_v53, %s3047_s6  ;;  %v3553_v49 = vsel %vm1153_vm7, %v1130_v58, %v1027_v57  ;;  %v977_v22 = vrot.slane %v3544_v48, 2  ;;  %v3574_v53 = vsel %vm529_vm3, %v589_v17, %v591_v19  ;;  %v487_v17 = vmax.f32 %v415_v20, 0.0 }
  0x99   : > { %2815 = vmatmul.mubr.msk.f32.vlgmr.msra.gmra.mrb[0].mxu1 %vm1267_vm8, %v3553_v49  ;;  %v594_v30 = vrot.slane %v486_v6, 7 }
  0x9a   : > { %v820_v28 = vpop.permute.xlu1 %819  ;;  %v818_v29 = vpop.permute.xlu0 %817  ;;  %2953 = vmatpush3.bf16.msk.msra.mxu1 %vm3127_vm2, %v3398_v59  ;;  %v668_v59 = vsel %vm529_vm3, %v591_v19, 0.0  ;;  %v596_v20 = vrot.slane %v487_v17, 7 }
  0x9b   : > { %v1132_v55 = vsel %vm1112_vm6, %v3173_v31, %v820_v28  ;;  %v1131_v57 = vsel %vm1112_vm6, %v3163_v23, %v818_v29  ;;  %v976_v23 = vsel %vm901_vm4, %v974_v39, %v975_v42  ;;  %v768_v31 = vrot.slane %v3574_v53, 1 }
  0x9c   : > { %1020 = vrot.lane.b32.xlu0 %v935_v21, %s3046_s30  ;;  %1022 = vrot.lane.b32.xlu1 %v937_v15, %s3046_s30  ;;  %v770_v21 = vrot.slane %v668_v59, 1  ;;  %v978_v28 = vsel %vm901_vm4, %v975_v42, %v977_v22  ;;  %v593_v29 = vrot.slane %v485_v61, 7  ;;  %v979_v39 = vrot.slane %v3574_v53, 2 }
  0x9d   : > { %v488_v61 = vmax.f32 %v416_v35, 0.0 }
  0x9e   : > { %v1031_v4 = vpop.permute.xlu1 %1030  ;;  %v1029_v58 = vpop.permute.xlu0 %1028  ;;  %v3608_v8 = vsel %vm529_vm3, 0.0, %v593_v29 }
  0x9f   : > { %v3582_v10 = vsel %vm1153_vm7, %v1132_v55, %v1031_v4  ;;  %v3585_v11 = vsel %vm1153_vm7, %v1131_v57, %v1029_v58  ;;  %v981_v55 = vrot.slane %v668_v59, 2  ;;  %v3605_v58 = vsel %vm529_vm3, %v593_v29, %v594_v30 }
  0xa0   : > { %2817 = vmatprep.mubr.msk.f32.mxu1 %vm1267_vm8, %v3585_v11  ;;  %845 = vrot.lane.b32.xlu0 %v765_v2, %s3047_s6  ;;  %v769_v2 = vsel %vm690_vm5, %v766_v18, %v768_v31  ;;  %v3614_v18 = vsel %vm529_vm3, %v594_v30, %v596_v20  ;;  %v772_v59 = vrot.slane %v3608_v8, 1  ;;  %v773_v17 = vrot.slane %v3605_v58, 1 }
  0xa1   : > { %2818 = vmatmul.mubr.msk.f32.gmra.mrb[2].mxu1 %vm1267_vm8, %v3582_v10  ;;  %847 = vrot.lane.b32.xlu1 %v767_v46, %s3047_s6  ;;  %v771_v46 = vsel %vm690_vm5, %v768_v31, %v770_v21  ;;  %v982_v21 = vsel %vm901_vm4, %v979_v39, %v981_v55 }
  0xa2   : > { %v824_v15 = vpop.permute.xlu1 %823  ;;  %v822_v19 = vpop.permute.xlu0 %821 }
  0xa3   : > { %v1133_v57 = vsel %vm1112_vm6, %v3206_v56, %v822_v19  ;;  %v980_v56 = vsel %vm901_vm4, %v977_v22, %v979_v39  ;;  %v1134_v14 = vsel %vm1112_vm6, %v3199_v51, %v824_v15  ;;  %v775_v19 = vrot.slane %v3614_v18, 1 }
  0xa4   : > { %1056 = vrot.lane.b32.xlu0 %v976_v23, %s3046_s30  ;;  %v774_v22 = vsel %vm690_vm5, %v772_v59, %v773_v17  ;;  %v983_v51 = vrot.slane %v3608_v8, 2  ;;  %v984_v15 = vrot.slane %v3605_v58, 2  ;;  %v986_v39 = vrot.slane %v3614_v18, 2 }
  0xa5   : > { %1058 = vrot.lane.b32.xlu1 %v978_v28, %s3046_s30  ;;  %v598_v28 = vrot.slane %v488_v61, 7 }
  0xa6   : > { %v1033_v4 = vpop.permute.xlu0 %1032  ;;  %v782_v42 = vpop.permute.xlu1 %781  ;;  %v987_v59 = vsel %vm901_vm4, %v984_v15, %v986_v39 }
  0xa7   : > { %v3611_v6 = vsel %vm1153_vm7, %v1133_v57, %v1033_v4  ;;  %v1113_v30 = vsel %vm1112_vm6, %v3216_v5, %v782_v42  ;;  %v3642_v55 = vsel %vm529_vm3, %v596_v20, %v598_v28  ;;  %v669_v4 = vsel %vm529_vm3, %v598_v28, 0.0 }
  0xa8   : > { %2820 = vmatprep.mubr.msk.f32.mxu1 %vm1267_vm8, %v3611_v6  ;;  %849 = vrot.lane.b32.xlu0 %v769_v2, %s3047_s6  ;;  %v985_v5 = vsel %vm901_vm4, %v983_v51, %v984_v15  ;;  %v777_v42 = vrot.slane %v3642_v55, 1  ;;  %v990_v51 = vrot.slane %v669_v4, 2 }
  0xa9   : > { %851 = vrot.lane.b32.xlu1 %v771_v46, %s3047_s6  ;;  %v776_v46 = vsel %vm690_vm5, %v773_v17, %v775_v19  ;;  %v779_v17 = vrot.slane %v669_v4, 1 }
  0xaa   : > { %v1035_v23 = vpop.permute.xlu0 %1034  ;;  %v784_v31 = vpop.permute.xlu1 %783 }
  0xab   : > { %v3628_v29 = vsel %vm1153_vm7, %v1134_v14, %v1035_v23  ;;  %v1114_v61 = vsel %vm1112_vm6, %v3219_v7, %v784_v31  ;;  %v778_v23 = vsel %vm690_vm5, %v775_v19, %v777_v42 }
  0xac   : > { %2821 = vmatmul.mubr.msk.f32.gmra.mrb[4].mxu1 %vm1267_vm8, %v3628_v29  ;;  %1060 = vrot.lane.b32.xlu0 %v980_v56, %s3046_s30 }
  0xad   : > { %1062 = vrot.lane.b32.xlu1 %v982_v21, %s3046_s30  ;;  %v988_v21 = vrot.slane %v3642_v55, 2 }
  0xae   : > { %v993_v35 = vpop.permute.xlu0 %992  ;;  %v826_v2 = vpop.permute.xlu1 %825 }
  0xaf   : > { %v1154_v57 = vsel %vm1153_vm7, %v1113_v30, %v993_v35  ;;  %v1135_v7 = vsel %vm1112_vm6, %v3202_v52, %v826_v2  ;;  %v989_v3 = vsel %vm901_vm4, %v986_v39, %v988_v21  ;;  %v991_v30 = vsel %vm901_vm4, %v988_v21, %v990_v51 }
  0xb0   : > { %2790 = vmatprep.mubr.msk.f32.mxu0 %vm1267_vm8, %v1154_v57  ;;  %853 = vrot.lane.b32.xlu0 %v774_v22, %s3047_s6  ;;  %v780_v22 = vsel %vm690_vm5, %v777_v42, %v779_v17 }
  0xb1   : > { %855 = vrot.lane.b32.xlu1 %v776_v46, %s3047_s6 }
  0xb2   : > { %v995_v56 = vpop.permute.xlu0 %994  ;;  %v828_v20 = vpop.permute.xlu1 %827 }
  0xb3   : > { %v1155_v14 = vsel %vm1153_vm7, %v1114_v61, %v995_v56  ;;  %v1136_v52 = vsel %vm1112_vm6, %v3240_v25, %v828_v20 }
  0xb4   : > { %2791 = vmatmul.mubr.msk.f32.vlgmr.msra.gmra.mrb[0].mxu0 %vm1267_vm8, %v1155_v14  ;;  %1064 = vrot.lane.b32.xlu0 %v985_v5, %s3046_s30 }
  0xb5   : > { %1066 = vrot.lane.b32.xlu1 %v987_v59, %s3046_s30  ;;  %2959 = vmatpush3.bf16.msk.msra.mxu0 %vm3127_vm2, %v3443_v40 }
  0xb6   : > { %v1037_v31 = vpop.permute.xlu0 %1036  ;;  %v786_v28 = vpop.permute.xlu1 %785 }
  0xb7   : > { %v3667_v15 = vsel %vm1153_vm7, %v1135_v7, %v1037_v31  ;;  %v1115_v2 = vsel %vm1112_vm6, %v3231_v16, %v786_v28 }
  0xb8   : > { %2823 = vmatprep.mubr.msk.f32.mxu1 %vm1267_vm8, %v3667_v15  ;;  %857 = vrot.lane.b32.xlu0 %v778_v23, %s3047_s6 }
  0xb9   : > { %859 = vrot.lane.b32.xlu1 %v780_v22, %s3047_s6 }
  0xba   : > { %v1039_v40 = vpop.permute.xlu0 %1038  ;;  %v788_v19 = vpop.permute.xlu1 %787 }
  0xbb   : > { %v3678_v35 = vsel %vm1153_vm7, %v1136_v52, %v1039_v40  ;;  %v1116_v57 = vsel %vm1112_vm6, %v3263_v43, %v788_v19 }
  0xbc   : > { %2824 = vmatmul.mubr.msk.f32.gmra.mrb[6].mxu1 %vm1267_vm8, %v3678_v35  ;;  %1068 = vrot.lane.b32.xlu0 %v989_v3, %s3046_s30 }
  0xbd   : > { %1070 = vrot.lane.b32.xlu1 %v991_v30, %s3046_s30 }
  0xbe   : > { %v997_v46 = vpop.permute.xlu0 %996  ;;  %v830_v39 = vpop.permute.xlu1 %829 }
  0xbf   : > { %v1156_v25 = vsel %vm1153_vm7, %v1115_v2, %v997_v46  ;;  %v1137_v61 = vsel %vm1112_vm6, %v3291_v63, %v830_v39 }
  0xc0   : > { %2793 = vmatprep.mubr.msk.f32.mxu0 %vm1267_vm8, %v1156_v25 }
  0xc2   : > { %v999_v4 = vpop.permute.xlu0 %998  ;;  %v832_v5 = vpop.permute.xlu1 %831 }
  0xc3   : > { %v1157_v42 = vsel %vm1153_vm7, %v1116_v57, %v999_v4  ;;  %v1138_v43 = vsel %vm1112_vm6, %v3288_v62, %v832_v5  ;;  %v2576_v62 = vld [vmem:[%s4141_s4] ss:$0 sm:$0xff] }
  0xc4   : > { %2794 = vmatmul.mubr.msk.f32.gmra.mrb[2].mxu0 %vm1267_vm8, %v1157_v42  ;;  %1218 = vst.msk [vmem:[#allocation2 + $0x88] sm:$0xff] %vm1153_vm7, %v2576_v62  ;;  %1201 = vst.msk [vmem:[#allocation2] sm:$0xff] %vm1153_vm7, %v2576_v62 }
  0xc5   : > { %1202 = vst.msk [vmem:[#allocation2 + $0x8] sm:$0xff] %vm1153_vm7, %v2576_v62  ;;  %1203 = vst.msk [vmem:[#allocation2 + $0x10] sm:$0xff] %vm1153_vm7, %v2576_v62 }
  0xc6   : > { %v1041_v56 = vpop.permute.xlu0 %1040  ;;  %v790_v16 = vpop.permute.xlu1 %789  ;;  %1204 = vst.msk [vmem:[#allocation2 + $0x18] sm:$0xff] %vm1153_vm7, %v2576_v62  ;;  %1205 = vst.msk [vmem:[#allocation2 + $0x20] sm:$0xff] %vm1153_vm7, %v2576_v62 }
  0xc7   : > { %v3695_v20 = vsel %vm1153_vm7, %v1137_v61, %v1041_v56  ;;  %v1117_v63 = vsel %vm1112_vm6, %v3314_v27, %v790_v16  ;;  %1206 = vst.msk [vmem:[#allocation2 + $0x28] sm:$0xff] %vm1153_vm7, %v2576_v62  ;;  %1207 = vst.msk [vmem:[#allocation2 + $0x30] sm:$0xff] %vm1153_vm7, %v2576_v62 }
  0xc8   : > { %2826 = vmatprep.mubr.msk.f32.mxu1 %vm1267_vm8, %v3695_v20  ;;  %1208 = vst.msk [vmem:[#allocation2 + $0x38] sm:$0xff] %vm1153_vm7, %v2576_v62  ;;  %1209 = vst.msk [vmem:[#allocation2 + $0x40] sm:$0xff] %vm1153_vm7, %v2576_v62 }
  0xc9   : > { %1210 = vst.msk [vmem:[#allocation2 + $0x48] sm:$0xff] %vm1153_vm7, %v2576_v62  ;;  %1211 = vst.msk [vmem:[#allocation2 + $0x50] sm:$0xff] %vm1153_vm7, %v2576_v62 }
  0xca   : > { %v1043_v59 = vpop.permute.xlu0 %1042  ;;  %v792_v17 = vpop.permute.xlu1 %791  ;;  %1212 = vst.msk [vmem:[#allocation2 + $0x58] sm:$0xff] %vm1153_vm7, %v2576_v62  ;;  %1213 = vst.msk [vmem:[#allocation2 + $0x60] sm:$0xff] %vm1153_vm7, %v2576_v62 }
  0xcb   : > { %v3702_v14 = vsel %vm1153_vm7, %v1138_v43, %v1043_v59  ;;  %v1118_v31 = vsel %vm1112_vm6, %v3311_v26, %v792_v17  ;;  %1214 = vst.msk [vmem:[#allocation2 + $0x68] sm:$0xff] %vm1153_vm7, %v2576_v62  ;;  %1215 = vst.msk [vmem:[#allocation2 + $0x70] sm:$0xff] %vm1153_vm7, %v2576_v62 }
  0xcc   : > { %2827 = vmatmul.mubr.msk.f32.gmra.mrb[8].mxu1 %vm1267_vm8, %v3702_v14  ;;  %1216 = vst.msk [vmem:[#allocation2 + $0x78] sm:$0xff] %vm1153_vm7, %v2576_v62  ;;  %1217 = vst.msk [vmem:[#allocation2 + $0x80] sm:$0xff] %vm1153_vm7, %v2576_v62 }
  0xcd   : > { %1219 = vst.msk [vmem:[#allocation2 + $0x90] sm:$0xff] %vm1153_vm7, %v2576_v62  ;;  %1220 = vst.msk [vmem:[#allocation2 + $0x98] sm:$0xff] %vm1153_vm7, %v2576_v62 }
  0xce   : > { %v1001_v23 = vpop.permute.xlu0 %1000  ;;  %v834_v21 = vpop.permute.xlu1 %833  ;;  %1221 = vst.msk [vmem:[#allocation2 + $0xa0] sm:$0xff] %vm1153_vm7, %v2576_v62  ;;  %1222 = vst.msk [vmem:[#allocation2 + $0xa8] sm:$0xff] %vm1153_vm7, %v2576_v62 }
  0xcf   : > { %v3709_v7 = vsel %vm1153_vm7, %v1117_v63, %v1001_v23  ;;  %1223 = vst.msk [vmem:[#allocation2 + $0xb0] sm:$0xff] %vm1153_vm7, %v2576_v62  ;;  %1224 = vst.msk [vmem:[#allocation2 + $0xb8] sm:$0xff] %vm1153_vm7, %v2576_v62  ;;  %v1139_v27 = vsel %vm1112_vm6, %v3302_v12, %v834_v21 }
  0xd0   : > { %2796 = vmatprep.mubr.msk.f32.mxu0 %vm1267_vm8, %v3709_v7  ;;  %1225 = vst.msk [vmem:[#allocation2 + $0xc0] sm:$0xff] %vm1153_vm7, %v2576_v62  ;;  %1226 = vst.msk [vmem:[#allocation2 + $0xc8] sm:$0xff] %vm1153_vm7, %v2576_v62 }
  0xd1   : > { %1227 = vst.msk [vmem:[#allocation2 + $0xd0] sm:$0xff] %vm1153_vm7, %v2576_v62  ;;  %1228 = vst.msk [vmem:[#allocation2 + $0xd8] sm:$0xff] %vm1153_vm7, %v2576_v62 }
  0xd2   : > { %v1003_v28 = vpop.permute.xlu0 %1002  ;;  %v836_v22 = vpop.permute.xlu1 %835  ;;  %1229 = vst.msk [vmem:[#allocation2 + $0xe0] sm:$0xff] %vm1153_vm7, %v2576_v62  ;;  %1230 = vst.msk [vmem:[#allocation2 + $0xe8] sm:$0xff] %vm1153_vm7, %v2576_v62 }
  0xd3   : > { %1231 = vst.msk [vmem:[#allocation2 + $0xf0] sm:$0xff] %vm1153_vm7, %v2576_v62  ;;  %1232 = vst.msk [vmem:[#allocation2 + $0xf8] sm:$0xff] %vm1153_vm7, %v2576_v62  ;;  %v1159_v26 = vsel %vm1153_vm7, %v1118_v31, %v1003_v28  ;;  %v1140_v40 = vsel %vm1112_vm6, %v3335_v45, %v836_v22 }
  0xd4   : > { %2797 = vmatmul.mubr.msk.f32.gmra.mrb[4].mxu0 %vm1267_vm8, %v1159_v26 }
  0xd6   : > { %v1045_v51 = vpop.permute.xlu0 %1044  ;;  %v794_v3 = vpop.permute.xlu1 %793 }
  0xd7   : > { %v3755_v52 = vsel %vm1153_vm7, %v1139_v27, %v1045_v51  ;;  %v1119_v12 = vsel %vm1112_vm6, %v3325_v37, %v794_v3 }
  0xd8   : > { %2829 = vmatprep.mubr.msk.f32.mxu1 %vm1267_vm8, %v3755_v52 }
  0xda   : > { %v1047_v19 = vpop.permute.xlu0 %1046  ;;  %v796_v30 = vpop.permute.xlu1 %795 }
  0xdb   : > { %v3762_v2 = vsel %vm1153_vm7, %v1140_v40, %v1047_v19  ;;  %v1120_v45 = vsel %vm1112_vm6, %v3353_v1, %v796_v30 }
  0xdc   : > { %2830 = vmatmul.mubr.msk.f32.gmra.mrb[10].mxu1 %vm1267_vm8, %v3762_v2 }
  0xde   : > { %v1005_v46 = vpop.permute.xlu0 %1004  ;;  %v838_v39 = vpop.permute.xlu1 %837 }
  0xdf   : > { %v1160_v25 = vsel %vm1153_vm7, %v1119_v12, %v1005_v46  ;;  %v1141_v42 = vsel %vm1112_vm6, %v3373_v33, %v838_v39 }
  0xe0   : > { %2799 = vmatprep.mubr.msk.f32.mxu0 %vm1267_vm8, %v1160_v25 }
  0xe2   : > { %v1007_v57 = vpop.permute.xlu0 %1006  ;;  %v840_v4 = vpop.permute.xlu1 %839 }
  0xe3   : > { %v1161_v5 = vsel %vm1153_vm7, %v1120_v45, %v1007_v57  ;;  %v1142_v1 = vsel %vm1112_vm6, %v3370_v32, %v840_v4 }
  0xe4   : > { %2800 = vmatmul.mubr.msk.f32.gmra.mrb[6].mxu0 %vm1267_vm8, %v1161_v5 }
  0xe6   : > { %v1049_v61 = vpop.permute.xlu0 %1048  ;;  %v798_v37 = vpop.permute.xlu1 %797 }
  0xe7   : > { %v3777_v56 = vsel %vm1153_vm7, %v1141_v42, %v1049_v61  ;;  %v1121_v33 = vsel %vm1112_vm6, %v3404_v0, %v798_v37 }
  0xe8   : > { %2832 = vmatprep.mubr.msk.f32.mxu1 %vm1267_vm8, %v3777_v56 }
  0xea   : > { %v1051_v16 = vpop.permute.xlu0 %1050  ;;  %v800_v43 = vpop.permute.xlu1 %799 }
  0xeb   : > { %v3784_v59 = vsel %vm1153_vm7, %v1142_v1, %v1051_v16  ;;  %v1122_v32 = vsel %vm1112_vm6, %v3401_v60, %v800_v43 }
  0xec   : > { %2833 = vmatmul.mubr.msk.f32.gmra.mrb[12].mxu1 %vm1267_vm8, %v3784_v59 }
  0xee   : > { %v1009_v17 = vpop.permute.xlu0 %1008  ;;  %v842_v63 = vpop.permute.xlu1 %841 }
  0xef   : > { %v1162_v23 = vsel %vm1153_vm7, %v1121_v33, %v1009_v17  ;;  %v1143_v28 = vsel %vm1112_vm6, %v3384_v44, %v842_v63 }
  0xf0   : > { %2802 = vmatprep.mubr.msk.f32.mxu0 %vm1267_vm8, %v1162_v23 }
  0xf2   : > { %v1011_v21 = vpop.permute.xlu0 %1010  ;;  %v844_v62 = vpop.permute.xlu1 %843 }
  0xf3   : > { %v1163_v31 = vsel %vm1153_vm7, %v1122_v32, %v1011_v21  ;;  %v1144_v60 = vsel %vm1112_vm6, %v3428_v24, %v844_v62 }
  0xf4   : > { %2803 = vmatmul.mubr.msk.f32.gmra.mrb[8].mxu0 %vm1267_vm8, %v1163_v31 }
  0xf6   : > { %v1053_v22 = vpop.permute.xlu0 %1052  ;;  %v802_v0 = vpop.permute.xlu1 %801 }
  0xf7   : > { %v3799_v27 = vsel %vm1153_vm7, %v1143_v28, %v1053_v22  ;;  %v1123_v44 = vsel %vm1112_vm6, %v3418_v13, %v802_v0  ;;  %v1249_v28 = vld [vmem:[#allocation2 + $0x80] sm:$0xff] }
  0xf8   : > { %2835 = vmatprep.mubr.msk.f32.mxu1 %vm1267_vm8, %v3799_v27 }
  0xfa   : > { %v1055_v51 = vpop.permute.xlu0 %1054  ;;  %v804_v3 = vpop.permute.xlu1 %803 }
  0xfb   : > { %v3806_v40 = vsel %vm1153_vm7, %v1144_v60, %v1055_v51  ;;  %v1124_v19 = vsel %vm1112_vm6, %v3455_v50, %v804_v3  ;;  %v1251_v51 = vld [vmem:[#allocation2 + $0x90] sm:$0xff] }
  0xfc   : > { %2836 = vmatmul.mubr.msk.f32.gmra.mrb[14].mxu1 %vm1267_vm8, %v3806_v40 }
  0xfd   : > { %2842 = vmatprep.mubr.msk.f32.mxu1 %vm1267_vm8, %v3709_v7 }
  0xfe   : > { %v1013_v30 = vpop.permute.xlu0 %1012  ;;  %v1015_v12 = vpop.permute.xlu1 %1014 }
  0xff   : > { %v1164_v24 = vsel %vm1153_vm7, %v1123_v44, %v1013_v30  ;;  %v1165_v46 = vsel %vm1153_vm7, %v1124_v19, %v1015_v12  ;;  %v1254_v30 = vld [vmem:[#allocation2 + $0xa8] sm:$0xff]  ;;  %v1253_v12 = vld [vmem:[#allocation2 + $0xa0] sm:$0xff] }
 0x100   : > { %2805 = vmatprep.mubr.msk.f32.mxu0 %vm1267_vm8, %v1164_v24  ;;  %2843 = vmatmul.mubr.msk.f32.vlgmr.msra.gmra.mrb[16].mxu1 %vm1267_vm8, %v1159_v26 }
 0x101   : > { %2806 = vmatmul.mubr.msk.f32.gmra.mrb[10].mxu0 %vm1267_vm8, %v1165_v46  ;;  %2845 = vmatprep.mubr.msk.f32.mxu1 %vm1267_vm8, %v1160_v25 }
 0x102   : > { %v806_v7 = vpop.permute.xlu0 %805  ;;  %v808_v39 = vpop.permute.xlu1 %807 }
 0x103   : > { %v1125_v13 = vsel %vm1112_vm6, %v3481_v34, %v806_v7  ;;  %v1126_v50 = vsel %vm1112_vm6, %v3478_v36, %v808_v39 }
 0x104   : > { %2846 = vmatmul.mubr.msk.f32.gmra.mrb[18].mxu1 %vm1267_vm8, %v1161_v5 }
 0x105   : > { %2848 = vmatprep.mubr.msk.f32.mxu1 %vm1267_vm8, %v1162_v23 }
 0x106   : > { %v1017_v45 = vpop.permute.xlu0 %1016  ;;  %v1019_v57 = vpop.permute.xlu1 %1018 }
 0x107   : > { %v1166_v26 = vsel %vm1153_vm7, %v1125_v13, %v1017_v45  ;;  %v1167_v4 = vsel %vm1153_vm7, %v1126_v50, %v1019_v57  ;;  %v1234_v13 = vld [vmem:[#allocation2 + $0x8] sm:$0xff]  ;;  %v1233_v50 = vld [vmem:[#allocation2] sm:$0xff] }
 0x108   : > { %2808 = vmatprep.mubr.msk.f32.mxu0 %vm1267_vm8, %v1166_v26  ;;  %2849 = vmatmul.mubr.msk.f32.gmra.mrb[20].mxu1 %vm1267_vm8, %v1163_v31 }
 0x109   : > { %2809 = vmatmul.mubr.msk.f32.gmra.mrb[12].mxu0 %vm1267_vm8, %v1167_v4  ;;  %2851 = vmatprep.mubr.msk.f32.mxu1 %vm1267_vm8, %v1164_v24 }
 0x10a   : > { %v810_v25 = vpop.permute.xlu0 %809  ;;  %v812_v5 = vpop.permute.xlu1 %811 }
 0x10b   : > { %v1127_v36 = vsel %vm1112_vm6, %v3484_v38, %v810_v25  ;;  %v1128_v34 = vsel %vm1112_vm6, %v3505_v9, %v812_v5  ;;  %v1256_v25 = vld [vmem:[#allocation2 + $0xb8] sm:$0xff]  ;;  %v1255_v5 = vld [vmem:[#allocation2 + $0xb0] sm:$0xff] }
 0x10c   : > { %2852 = vmatmul.mubr.msk.f32.gmra.mrb[22].mxu1 %vm1267_vm8, %v1165_v46 }
 0x10d   : > { %2854 = vmatprep.mubr.msk.f32.mxu1 %vm1267_vm8, %v1166_v26 }
 0x10e   : > { %v1021_v42 = vpop.permute.xlu0 %1020  ;;  %v1023_v61 = vpop.permute.xlu1 %1022 }
 0x10f   : > { %v1168_v37 = vsel %vm1153_vm7, %v1127_v36, %v1021_v42  ;;  %v1169_v1 = vsel %vm1153_vm7, %v1128_v34, %v1023_v61 }
 0x110   : > { %2811 = vmatprep.mubr.msk.f32.mxu0 %vm1267_vm8, %v1168_v37  ;;  %2855 = vmatmul.mubr.msk.f32.gmra.mrb[24].mxu1 %vm1267_vm8, %v1167_v4 }
 0x111   : > { %2812 = vmatmul.mubr.msk.f32.gmra.mrb[14].mxu0 %vm1267_vm8, %v1169_v1  ;;  %2857 = vmatprep.mubr.msk.f32.mxu1 %vm1267_vm8, %v1168_v37 }
 0x112   : > { %2894 = vmatprep.mubr.msk.f32.mxu0 %vm1267_vm8, %v1162_v23  ;;  %v846_v38 = vpop.permute.xlu0 %845 }
 0x113   : > { %v848_v9 = vpop.permute.xlu1 %847 }
 0x114   : > { %2858 = vmatmul.mubr.msk.f32.gmra.mrb[26].mxu1 %vm1267_vm8, %v1169_v1 }
 0x115   : > { %2860 = vmatprep.mubr.msk.f32.mxu1 %vm1267_vm8, %v3525_v41  ;;  %2895 = vmatmul.mubr.msk.f32.vlgmr.msra.gmra.mrb[16].mxu0 %vm1267_vm8, %v1163_v31 }
 0x116   : > { %2897 = vmatprep.mubr.msk.f32.mxu0 %vm1267_vm8, %v1164_v24  ;;  %v1057_v16 = vpop.permute.xlu0 %1056 }
 0x118   : > { %2861 = vmatmul.mubr.msk.f32.gmra.mrb[28].mxu1 %vm1267_vm8, %v3553_v49 }
 0x119   : > { %2863 = vmatprep.mubr.msk.f32.mxu1 %vm1267_vm8, %v3585_v11  ;;  %2898 = vmatmul.mubr.msk.f32.gmra.mrb[18].mxu0 %vm1267_vm8, %v1165_v46 }
 0x11a   : > { %2900 = vmatprep.mubr.msk.f32.mxu0 %vm1267_vm8, %v1166_v26 }
 0x11c   : > { %2864 = vmatmul.mubr.msk.f32.gmra.mrb[30].mxu1 %vm1267_vm8, %v3582_v10 }
 0x11d   : > { %2866 = vmatprep.mubr.msk.f32.mxu1 %vm1267_vm8, %v3611_v6  ;;  %2901 = vmatmul.mubr.msk.f32.gmra.mrb[20].mxu0 %vm1267_vm8, %v1167_v4 }
 0x11e   : > { %2903 = vmatprep.mubr.msk.f32.mxu0 %vm1267_vm8, %v1168_v37  ;;  %v1236_v37 = vld [vmem:[#allocation2 + $0x18] sm:$0xff] }
 0x120   : > { %2867 = vmatmul.mubr.msk.f32.gmra.mrb[32].mxu1 %vm1267_vm8, %v3628_v29 }
 0x121   : > { %2869 = vmatprep.mubr.msk.f32.mxu1 %vm1267_vm8, %v3667_v15  ;;  %2904 = vmatmul.mubr.msk.f32.gmra.mrb[22].mxu0 %vm1267_vm8, %v1169_v1  ;;  %v1235_v1 = vld [vmem:[#allocation2 + $0x10] sm:$0xff] }
 0x122   : > { %2906 = vmatprep.mubr.msk.f32.mxu0 %vm1267_vm8, %v3525_v41  ;;  %v1059_v41 = vpop.permute.xlu1 %1058 }
 0x124   : > { %2870 = vmatmul.mubr.msk.f32.gmra.mrb[34].mxu1 %vm1267_vm8, %v3678_v35 }
 0x125   : > { %2872 = vmatprep.mubr.msk.f32.mxu1 %vm1267_vm8, %v3695_v20  ;;  %2907 = vmatmul.mubr.msk.f32.gmra.mrb[24].mxu0 %vm1267_vm8, %v3553_v49  ;;  %v850_v49 = vpop.permute.xlu0 %849 }
 0x126   : > { %2909 = vmatprep.mubr.msk.f32.mxu0 %vm1267_vm8, %v3585_v11  ;;  %v852_v11 = vpop.permute.xlu1 %851 }
 0x128   : > { %2873 = vmatmul.mubr.msk.f32.gmra.mrb[36].mxu1 %vm1267_vm8, %v3702_v14 }
 0x129   : > { %2875 = vmatprep.mubr.msk.f32.mxu1 %vm1267_vm8, %v3755_v52  ;;  %2910 = vmatmul.mubr.msk.f32.gmra.mrb[26].mxu0 %vm1267_vm8, %v3582_v10  ;;  %v1145_v10 = vsel %vm1112_vm6, %v3529_v47, %v846_v38  ;;  %v1146_v47 = vsel %vm1112_vm6, %v3541_v54, %v848_v9 }
 0x12a   : > { %2912 = vmatprep.mubr.msk.f32.mxu0 %vm1267_vm8, %v3611_v6  ;;  %v1186_v6 = vsel %vm1153_vm7, %v1145_v10, %v1057_v16  ;;  %v1187_v54 = vsel %vm1153_vm7, %v1146_v47, %v1059_v41  ;;  %v1257_v10 = vld [vmem:[#allocation2 + $0xc0] sm:$0xff]  ;;  %v1238_v47 = vld [vmem:[#allocation2 + $0x28] sm:$0xff] }
 0x12c   : > { %2876 = vmatmul.mubr.msk.f32.gmra.mrb[38].mxu1 %vm1267_vm8, %v3762_v2 }
 0x12d   : > { %2878 = vmatprep.mubr.msk.f32.mxu1 %vm1267_vm8, %v3777_v56  ;;  %2913 = vmatmul.mubr.msk.f32.gmra.mrb[28].mxu0 %vm1267_vm8, %v3628_v29  ;;  %v1061_v29 = vpop.permute.xlu0 %1060 }
 0x12e   : > { %2915 = vmatprep.mubr.msk.f32.mxu0 %vm1267_vm8, %v3667_v15  ;;  %v1147_v15 = vsel %vm1112_vm6, %v3544_v48, %v850_v49  ;;  %v1063_v48 = vpop.permute.xlu1 %1062  ;;  %v1258_v49 = vld [vmem:[#allocation2 + $0xc8] sm:$0xff] }
 0x130   : > { %2879 = vmatmul.mubr.msk.f32.gmra.mrb[40].mxu1 %vm1267_vm8, %v3784_v59 }
 0x131   : > { %2881 = vmatprep.mubr.msk.f32.mxu1 %vm1267_vm8, %v3799_v27  ;;  %2916 = vmatmul.mubr.msk.f32.gmra.mrb[30].mxu0 %vm1267_vm8, %v3678_v35  ;;  %v1148_v35 = vsel %vm1112_vm6, %v3574_v53, %v852_v11  ;;  %v854_v43 = vpop.permute.xlu0 %853 }
 0x132   : > { %2918 = vmatprep.mubr.msk.f32.mxu0 %vm1267_vm8, %v3695_v20  ;;  %v1188_v20 = vsel %vm1153_vm7, %v1147_v15, %v1061_v29  ;;  %v1189_v33 = vsel %vm1153_vm7, %v1148_v35, %v1063_v48  ;;  %v1237_v35 = vld [vmem:[#allocation2 + $0x20] sm:$0xff] }
 0x134   : > { %2882 = vmatmul.mubr.msk.f32.gmra.mrb[42].mxu1 %vm1267_vm8, %v3806_v40 }
 0x135   : > { %2884 = vmatprep.mubr.msk.f32.mxu1 %vm1267_vm8, %v1186_v6  ;;  %2919 = vmatmul.mubr.msk.f32.gmra.mrb[32].mxu0 %vm1267_vm8, %v3702_v14  ;;  %v856_v14 = vpop.permute.xlu1 %855  ;;  %v1065_v53 = vpop.permute.xlu0 %1064 }
 0x136   : > { %2921 = vmatprep.mubr.msk.f32.mxu0 %vm1267_vm8, %v3755_v52  ;;  %v1150_v23 = vsel %vm1112_vm6, %v3605_v58, %v856_v14  ;;  %v1259_v14 = vld [vmem:[#allocation2 + $0xd0] sm:$0xff] }
 0x138   : > { %2885 = vmatmul.mubr.msk.f32.gmra.mrb[44].mxu1 %vm1267_vm8, %v1187_v54 }
 0x139   : > { %2922 = vmatmul.mubr.msk.f32.gmra.mrb[34].mxu0 %vm1267_vm8, %v3762_v2  ;;  %2887 = vmatprep.mubr.msk.f32.mxu1 %vm1267_vm8, %v1188_v20  ;;  %v1067_v52 = vpop.permute.xlu1 %1066  ;;  %v858_v2 = vpop.permute.xlu0 %857 }
 0x13a   : > { %2924 = vmatprep.mubr.msk.f32.mxu0 %vm1267_vm8, %v3777_v56  ;;  %v1149_v56 = vsel %vm1112_vm6, %v3608_v8, %v854_v43  ;;  %v1191_v8 = vsel %vm1153_vm7, %v1150_v23, %v1067_v52 }
 0x13b   : > { %v1190_v32 = vsel %vm1153_vm7, %v1149_v56, %v1065_v53 }
 0x13c   : > { %2888 = vmatmul.mubr.msk.f32.gmra.mrb[46].mxu1 %vm1267_vm8, %v1189_v33 }
 0x13d   : > { %2925 = vmatmul.mubr.msk.f32.gmra.mrb[36].mxu0 %vm1267_vm8, %v3784_v59  ;;  %v860_v17 = vpop.permute.xlu1 %859  ;;  %v1151_v59 = vsel %vm1112_vm6, %v3614_v18, %v858_v2  ;;  %v1069_v63 = vpop.permute.xlu0 %1068  ;;  %v1250_v18 = vld [vmem:[#allocation2 + $0x88] sm:$0xff] }
 0x13e   : > { %2927 = vmatprep.mubr.msk.f32.mxu0 %vm1267_vm8, %v3799_v27  ;;  %v1192_v21 = vsel %vm1153_vm7, %v1151_v59, %v1069_v63  ;;  %v1152_v62 = vsel %vm1112_vm6, %v3642_v55, %v860_v17  ;;  %v1252_v55 = vld [vmem:[#allocation2 + $0x98] sm:$0xff]  ;;  %v1239_v59 = vld [vmem:[#allocation2 + $0x30] sm:$0xff] }
 0x13f   : > { %v1240_v17 = vld [vmem:[#allocation2 + $0x38] sm:$0xff] }
 0x141   : > { %2928 = vmatmul.mubr.msk.f32.gmra.mrb[38].mxu0 %vm1267_vm8, %v3806_v40  ;;  %v1071_v31 = vpop.permute.xlu1 %1070 }
 0x142   : > { %2930 = vmatprep.mubr.msk.f32.mxu0 %vm1267_vm8, %v1186_v6  ;;  %v1193_v58 = vsel %vm1153_vm7, %v1152_v62, %v1071_v31  ;;  %v1261_v62 = vld [vmem:[#allocation2 + $0xe0] sm:$0xff] }
 0x145   : > { %2931 = vmatmul.mubr.msk.f32.gmra.mrb[40].mxu0 %vm1267_vm8, %v1187_v54 }
 0x146   : > { %2933 = vmatprep.mubr.msk.f32.mxu0 %vm1267_vm8, %v1188_v20 }
 0x149   : > { %2934 = vmatmul.mubr.msk.f32.gmra.mrb[42].mxu0 %vm1267_vm8, %v1189_v33  ;;  %v1260_v33 = vld [vmem:[#allocation2 + $0xd8] sm:$0xff] }
 0x14a   : > { %2936 = vmatprep.mubr.msk.f32.mxu0 %vm1267_vm8, %v1190_v32 }
 0x14d   : > { %2937 = vmatmul.mubr.msk.f32.gmra.mrb[44].mxu0 %vm1267_vm8, %v1191_v8  ;;  %v1262_v8 = vld [vmem:[#allocation2 + $0xe8] sm:$0xff] }
 0x14e   : > { %2939 = vmatprep.mubr.msk.f32.mxu0 %vm1267_vm8, %v1192_v21 }
 0x151   : > { %2940 = vmatmul.mubr.msk.f32.gmra.mrb[46].mxu0 %vm1267_vm8, %v1193_v58 }
 0x16c   : > { %v2816_v22 = vpop.f32.mrb[0].mxu1 }
 0x16d   : > { %v1610_v0 = vadd.f32 %v2816_v22, %v1250_v18  ;;  %v1514_v27 = vpop.f32.mrb[1].mxu1  ;;  %v1242_v22 = vld [vmem:[#allocation2 + $0x48] sm:$0xff] }
 0x16e   : > { %v1609_v60 = vadd.f32 %v1514_v27, %v1249_v28 }
 0x16f   : > { %1642 = vst.msk [vmem:[#allocation2 + $0x88] sm:$0xff] %vm1153_vm7, %v1610_v0  ;;  %v1241_v0 = vld [vmem:[#allocation2 + $0x40] sm:$0xff] }
 0x170   : > { %1641 = vst.msk [vmem:[#allocation2 + $0x80] sm:$0xff] %vm1153_vm7, %v1609_v60 }
 0x174   : > { %v2819_v3 = vpop.f32.mrb[2].mxu1 }
 0x175   : > { %v1612_v40 = vadd.f32 %v2819_v3, %v1252_v55  ;;  %v1524_v44 = vpop.f32.mrb[3].mxu1  ;;  %v1264_v3 = vld [vmem:[#allocation2 + $0xf8] sm:$0xff] }
 0x176   : > { %v1611_v19 = vadd.f32 %v1524_v44, %v1251_v51 }
 0x177   : > { %1644 = vst.msk [vmem:[#allocation2 + $0x98] sm:$0xff] %vm1153_vm7, %v1612_v40  ;;  %v1263_v40 = vld [vmem:[#allocation2 + $0xf0] sm:$0xff] }
 0x178   : > { %1643 = vst.msk [vmem:[#allocation2 + $0x90] sm:$0xff] %vm1153_vm7, %v1611_v19 }
 0x17f   : > { %v2822_v24 = vpop.f32.mrb[4].mxu1 }
 0x180   : > { %v1614_v46 = vadd.f32 %v2822_v24, %v1254_v30  ;;  %v1534_v7 = vpop.f32.mrb[5].mxu1  ;;  %v1244_v24 = vld [vmem:[#allocation2 + $0x58] sm:$0xff] }
 0x181   : > { %v1613_v39 = vadd.f32 %v1534_v7, %v1253_v12 }
 0x182   : > { %1646 = vst.msk [vmem:[#allocation2 + $0xa8] sm:$0xff] %vm1153_vm7, %v1614_v46 }
 0x183   : > { %1645 = vst.msk [vmem:[#allocation2 + $0xa0] sm:$0xff] %vm1153_vm7, %v1613_v39  ;;  %v1243_v39 = vld [vmem:[#allocation2 + $0x50] sm:$0xff] }
 0x187   : > { %v2792_v45 = vpop.f32.mrb[0].mxu0 }
 0x188   : > { %v1594_v57 = vadd.f32 %v2792_v45, %v1234_v13  ;;  %v1434_v26 = vpop.f32.mrb[1].mxu0 }
 0x189   : > { %v1593_v4 = vadd.f32 %v1434_v26, %v1233_v50 }
 0x18a   : > { %1626 = vst.msk [vmem:[#allocation2 + $0x8] sm:$0xff] %vm1153_vm7, %v1594_v57 }
 0x18b   : > { %1625 = vst.msk [vmem:[#allocation2] sm:$0xff] %vm1153_vm7, %v1593_v4 }
 0x18f   : > { %v2825_v36 = vpop.f32.mrb[6].mxu1 }
 0x190   : > { %v1616_v34 = vadd.f32 %v2825_v36, %v1256_v25  ;;  %v1544_v42 = vpop.f32.mrb[7].mxu1 }
 0x191   : > { %v1615_v61 = vadd.f32 %v1544_v42, %v1255_v5  ;;  %v1658_v46 = vld [vmem:[#allocation2 + $0x8] sm:$0xff] }
 0x192   : > { %1648 = vst.msk [vmem:[#allocation2 + $0xb8] sm:$0xff] %vm1153_vm7, %v1616_v34  ;;  %v1657_v45 = vld [vmem:[#allocation2] sm:$0xff] }
 0x193   : > { %1647 = vst.msk [vmem:[#allocation2 + $0xb0] sm:$0xff] %vm1153_vm7, %v1615_v61 }
 0x197   : > { %v2795_v38 = vpop.f32.mrb[2].mxu0 }
 0x198   : > { %v1596_v9 = vadd.f32 %v2795_v38, %v1236_v37  ;;  %v1444_v16 = vpop.f32.mrb[3].mxu0  ;;  %v1246_v38 = vld [vmem:[#allocation2 + $0x68] sm:$0xff] }
 0x199   : > { %v1595_v41 = vadd.f32 %v1444_v16, %v1235_v1 }
 0x19a   : > { %1628 = vst.msk [vmem:[#allocation2 + $0x18] sm:$0xff] %vm1153_vm7, %v1596_v9 }
 0x19b   : > { %1627 = vst.msk [vmem:[#allocation2 + $0x10] sm:$0xff] %vm1153_vm7, %v1595_v41  ;;  %v1245_v41 = vld [vmem:[#allocation2 + $0x60] sm:$0xff] }
 0x19f   : > { %v2828_v11 = vpop.f32.mrb[8].mxu1 }
 0x1a0   : > { %v1618_v6 = vadd.f32 %v2828_v11, %v1258_v49  ;;  %v1554_v29 = vpop.f32.mrb[9].mxu1 }
 0x1a1   : > { %v1617_v15 = vadd.f32 %v1554_v29, %v1257_v10  ;;  %v1660_v36 = vld [vmem:[#allocation2 + $0x18] sm:$0xff] }
 0x1a2   : > { %1650 = vst.msk [vmem:[#allocation2 + $0xc8] sm:$0xff] %vm1153_vm7, %v1618_v6  ;;  %v1659_v61 = vld [vmem:[#allocation2 + $0x10] sm:$0xff] }
 0x1a3   : > { %1649 = vst.msk [vmem:[#allocation2 + $0xc0] sm:$0xff] %vm1153_vm7, %v1617_v15 }
 0x1a7   : > { %v2798_v20 = vpop.f32.mrb[4].mxu0 }
 0x1a8   : > { %v1598_v48 = vadd.f32 %v2798_v20, %v1238_v47  ;;  %v1454_v43 = vpop.f32.mrb[5].mxu0 }
 0x1a9   : > { %v1597_v54 = vadd.f32 %v1454_v43, %v1237_v35 }
 0x1aa   : > { %1630 = vst.msk [vmem:[#allocation2 + $0x28] sm:$0xff] %vm1153_vm7, %v1598_v48 }
 0x1ab   : > { %1629 = vst.msk [vmem:[#allocation2 + $0x20] sm:$0xff] %vm1153_vm7, %v1597_v54 }
 0x1af   : > { %v2831_v53 = vpop.f32.mrb[10].mxu1 }
 0x1b0   : > { %v1620_v52 = vadd.f32 %v2831_v53, %v1260_v33  ;;  %v1564_v2 = vpop.f32.mrb[11].mxu1  ;;  %v1248_v53 = vld [vmem:[#allocation2 + $0x78] sm:$0xff] }
 0x1b1   : > { %v1619_v56 = vadd.f32 %v1564_v2, %v1259_v14  ;;  %v1662_v9 = vld [vmem:[#allocation2 + $0x28] sm:$0xff] }
 0x1b2   : > { %1652 = vst.msk [vmem:[#allocation2 + $0xd8] sm:$0xff] %vm1153_vm7, %v1620_v52  ;;  %v1661_v11 = vld [vmem:[#allocation2 + $0x20] sm:$0xff] }
 0x1b3   : > { %1651 = vst.msk [vmem:[#allocation2 + $0xd0] sm:$0xff] %vm1153_vm7, %v1619_v56  ;;  %v1247_v56 = vld [vmem:[#allocation2 + $0x70] sm:$0xff] }
 0x1b7   : > { %v2801_v63 = vpop.f32.mrb[6].mxu0 }
 0x1b8   : > { %v1600_v23 = vadd.f32 %v2801_v63, %v1240_v17  ;;  %v1464_v32 = vpop.f32.mrb[7].mxu0 }
 0x1b9   : > { %v1599_v21 = vadd.f32 %v1464_v32, %v1239_v59 }
 0x1ba   : > { %1632 = vst.msk [vmem:[#allocation2 + $0x38] sm:$0xff] %vm1153_vm7, %v1600_v23 }
 0x1bb   : > { %1631 = vst.msk [vmem:[#allocation2 + $0x30] sm:$0xff] %vm1153_vm7, %v1599_v21 }
 0x1bf   : > { %v2834_v31 = vpop.f32.mrb[12].mxu1 }
 0x1c0   : > { %v1622_v58 = vadd.f32 %v2834_v31, %v1262_v8  ;;  %v1574_v18 = vpop.f32.mrb[13].mxu1 }
 0x1c1   : > { %v1621_v28 = vadd.f32 %v1574_v18, %v1261_v62  ;;  %v1664_v20 = vld [vmem:[#allocation2 + $0x38] sm:$0xff] }
 0x1c2   : > { %1654 = vst.msk [vmem:[#allocation2 + $0xe8] sm:$0xff] %vm1153_vm7, %v1622_v58  ;;  %v1663_v54 = vld [vmem:[#allocation2 + $0x30] sm:$0xff] }
 0x1c3   : > { %1653 = vst.msk [vmem:[#allocation2 + $0xe0] sm:$0xff] %vm1153_vm7, %v1621_v28 }
 0x1c7   : > { %v2804_v27 = vpop.f32.mrb[8].mxu0 }
 0x1c8   : > { %v1602_v60 = vadd.f32 %v2804_v27, %v1242_v22  ;;  %v1474_v55 = vpop.f32.mrb[9].mxu0 }
 0x1c9   : > { %v1601_v51 = vadd.f32 %v1474_v55, %v1241_v0 }
 0x1ca   : > { %1634 = vst.msk [vmem:[#allocation2 + $0x48] sm:$0xff] %vm1153_vm7, %v1602_v60 }
 0x1cb   : > { %1633 = vst.msk [vmem:[#allocation2 + $0x40] sm:$0xff] %vm1153_vm7, %v1601_v51 }
 0x1cf   : > { %v2837_v44 = vpop.f32.mrb[14].mxu1 }
 0x1d0   : > { %v1624_v19 = vadd.f32 %v2837_v44, %v1264_v3  ;;  %v1584_v30 = vpop.f32.mrb[15].mxu1 }
 0x1d1   : > { %v1623_v12 = vadd.f32 %v1584_v30, %v1263_v40  ;;  %v1666_v52 = vld [vmem:[#allocation2 + $0x48] sm:$0xff] }
 0x1d2   : > { %1656 = vst.msk [vmem:[#allocation2 + $0xf8] sm:$0xff] %vm1153_vm7, %v1624_v19  ;;  %v1665_v63 = vld [vmem:[#allocation2 + $0x40] sm:$0xff] }
 0x1d3   : > { %1655 = vst.msk [vmem:[#allocation2 + $0xf0] sm:$0xff] %vm1153_vm7, %v1623_v12  ;;  %v2844_v7 = vpop.f32.mrb[16].mxu1 }
 0x1d4   : > { %v1933_v13 = vadd.f32 %v2844_v7, %v1658_v46  ;;  %v2807_v50 = vpop.f32.mrb[10].mxu0  ;;  %v1773_v57 = vpop.f32.mrb[17].mxu1 }
 0x1d5   : > { %v1604_v26 = vadd.f32 %v2807_v50, %v1244_v24  ;;  %v1932_v4 = vadd.f32 %v1773_v57, %v1657_v45  ;;  %v1484_v25 = vpop.f32.mrb[11].mxu0 }
 0x1d6   : > { %1965 = vst.msk [vmem:[#allocation2 + $0x8] sm:$0xff] %vm1153_vm7, %v1933_v13  ;;  %v1603_v5 = vadd.f32 %v1484_v25, %v1243_v39 }
 0x1d7   : > { %1636 = vst.msk [vmem:[#allocation2 + $0x58] sm:$0xff] %vm1153_vm7, %v1604_v26  ;;  %1964 = vst.msk [vmem:[#allocation2] sm:$0xff] %vm1153_vm7, %v1932_v4  ;;  %v2847_v34 = vpop.f32.mrb[18].mxu1 }
 0x1d8   : > { %1635 = vst.msk [vmem:[#allocation2 + $0x50] sm:$0xff] %vm1153_vm7, %v1603_v5  ;;  %v1935_v42 = vadd.f32 %v2847_v34, %v1660_v36  ;;  %v1783_v37 = vpop.f32.mrb[19].mxu1 }
 0x1d9   : > { %v1934_v1 = vadd.f32 %v1783_v37, %v1659_v61 }
 0x1da   : > { %1967 = vst.msk [vmem:[#allocation2 + $0x18] sm:$0xff] %vm1153_vm7, %v1935_v42 }
 0x1db   : > { %1966 = vst.msk [vmem:[#allocation2 + $0x10] sm:$0xff] %vm1153_vm7, %v1934_v1  ;;  %v2850_v16 = vpop.f32.mrb[20].mxu1 }
 0x1dc   : > { %v1937_v49 = vadd.f32 %v2850_v16, %v1662_v9  ;;  %v2810_v10 = vpop.f32.mrb[12].mxu0  ;;  %v1793_v6 = vpop.f32.mrb[21].mxu1 }
 0x1dd   : > { %v1606_v29 = vadd.f32 %v2810_v10, %v1246_v38  ;;  %v1936_v15 = vadd.f32 %v1793_v6, %v1661_v11  ;;  %v1494_v47 = vpop.f32.mrb[13].mxu0  ;;  %v1997_v0 = vld [vmem:[#allocation2 + $0x8] sm:$0xff]  ;;  %v1673_v6 = vld [vmem:[#allocation2 + $0x80] sm:$0xff] }
 0x1de   : > { %1969 = vst.msk [vmem:[#allocation2 + $0x28] sm:$0xff] %vm1153_vm7, %v1937_v49  ;;  %v1605_v35 = vadd.f32 %v1494_v47, %v1245_v41  ;;  %v1668_v31 = vld [vmem:[#allocation2 + $0x58] sm:$0xff]  ;;  %v1996_v51 = vld [vmem:[#allocation2] sm:$0xff]  ;;  %v1674_v49 = vld [vmem:[#allocation2 + $0x88] sm:$0xff] }
 0x1df   : > { %1638 = vst.msk [vmem:[#allocation2 + $0x68] sm:$0xff] %vm1153_vm7, %v1606_v29  ;;  %1968 = vst.msk [vmem:[#allocation2 + $0x20] sm:$0xff] %vm1153_vm7, %v1936_v15  ;;  %v2853_v48 = vpop.f32.mrb[22].mxu1  ;;  %v1667_v28 = vld [vmem:[#allocation2 + $0x50] sm:$0xff] }
 0x1e0   : > { %1637 = vst.msk [vmem:[#allocation2 + $0x60] sm:$0xff] %vm1153_vm7, %v1605_v35  ;;  %v1939_v43 = vadd.f32 %v2853_v48, %v1664_v20  ;;  %v1803_v33 = vpop.f32.mrb[23].mxu1 }
 0x1e1   : > { %v1938_v14 = vadd.f32 %v1803_v33, %v1663_v54  ;;  %v1999_v46 = vld [vmem:[#allocation2 + $0x18] sm:$0xff] }
 0x1e2   : > { %1971 = vst.msk [vmem:[#allocation2 + $0x38] sm:$0xff] %vm1153_vm7, %v1939_v43  ;;  %v1998_v50 = vld [vmem:[#allocation2 + $0x10] sm:$0xff] }
 0x1e3   : > { %1970 = vst.msk [vmem:[#allocation2 + $0x30] sm:$0xff] %vm1153_vm7, %v1938_v14  ;;  %v2856_v2 = vpop.f32.mrb[24].mxu1 }
 0x1e4   : > { %v1941_v17 = vadd.f32 %v2856_v2, %v1666_v52  ;;  %v2813_v59 = vpop.f32.mrb[14].mxu0  ;;  %v1813_v23 = vpop.f32.mrb[25].mxu1 }
 0x1e5   : > { %v1608_v32 = vadd.f32 %v2813_v59, %v1248_v53  ;;  %v1940_v21 = vadd.f32 %v1813_v23, %v1665_v63  ;;  %v1504_v8 = vpop.f32.mrb[15].mxu0  ;;  %v2001_v34 = vld [vmem:[#allocation2 + $0x28] sm:$0xff]  ;;  %v1676_v53 = vld [vmem:[#allocation2 + $0x98] sm:$0xff] }
 0x1e6   : > { %1973 = vst.msk [vmem:[#allocation2 + $0x48] sm:$0xff] %vm1153_vm7, %v1941_v17  ;;  %v1607_v62 = vadd.f32 %v1504_v8, %v1247_v56  ;;  %v1670_v44 = vld [vmem:[#allocation2 + $0x68] sm:$0xff]  ;;  %v2000_v1 = vld [vmem:[#allocation2 + $0x20] sm:$0xff]  ;;  %v1675_v56 = vld [vmem:[#allocation2 + $0x90] sm:$0xff] }
 0x1e7   : > { %1640 = vst.msk [vmem:[#allocation2 + $0x78] sm:$0xff] %vm1153_vm7, %v1608_v32  ;;  %1972 = vst.msk [vmem:[#allocation2 + $0x40] sm:$0xff] %vm1153_vm7, %v1940_v21  ;;  %v2859_v58 = vpop.f32.mrb[26].mxu1  ;;  %v1669_v12 = vld [vmem:[#allocation2 + $0x60] sm:$0xff] }
 0x1e8   : > { %1639 = vst.msk [vmem:[#allocation2 + $0x70] sm:$0xff] %vm1153_vm7, %v1607_v62  ;;  %v1943_v18 = vadd.f32 %v2859_v58, %v1668_v31  ;;  %v1823_v22 = vpop.f32.mrb[27].mxu1  ;;  %v2896_v27 = vpop.f32.mrb[16].mxu0 }
 0x1e9   : > { %v1942_v60 = vadd.f32 %v1823_v22, %v1667_v28  ;;  %v2272_v55 = vadd.f32 %v2896_v27, %v1997_v0  ;;  %v2112_v3 = vpop.f32.mrb[17].mxu0  ;;  %v2003_v15 = vld [vmem:[#allocation2 + $0x38] sm:$0xff]  ;;  %v1677_v0 = vld [vmem:[#allocation2 + $0xa0] sm:$0xff] }
 0x1ea   : > { %1975 = vst.msk [vmem:[#allocation2 + $0x58] sm:$0xff] %vm1153_vm7, %v1943_v18  ;;  %v2271_v40 = vadd.f32 %v2112_v3, %v1996_v51  ;;  %v2002_v48 = vld [vmem:[#allocation2 + $0x30] sm:$0xff]  ;;  %v1678_v18 = vld [vmem:[#allocation2 + $0xa8] sm:$0xff] }
 0x1eb   : > { %1974 = vst.msk [vmem:[#allocation2 + $0x50] sm:$0xff] %vm1153_vm7, %v1942_v60  ;;  %2304 = vst.msk [vmem:[#allocation2 + $0x8] sm:$0xff] %vm1153_vm7, %v2272_v55  ;;  %v2862_v19 = vpop.f32.mrb[28].mxu1 }
 0x1ec   : > { %2303 = vst.msk [vmem:[#allocation2] sm:$0xff] %vm1153_vm7, %v2271_v40  ;;  %v1945_v30 = vadd.f32 %v2862_v19, %v1670_v44  ;;  %v1833_v24 = vpop.f32.mrb[29].mxu1  ;;  %v2899_v7 = vpop.f32.mrb[18].mxu0 }
 0x1ed   : > { %v1944_v39 = vadd.f32 %v1833_v24, %v1669_v12  ;;  %v2274_v13 = vadd.f32 %v2899_v7, %v1999_v46  ;;  %v2122_v45 = vpop.f32.mrb[19].mxu0  ;;  %v2005_v59 = vld [vmem:[#allocation2 + $0x48] sm:$0xff]  ;;  %v1680_v24 = vld [vmem:[#allocation2 + $0xb8] sm:$0xff] }
 0x1ee   : > { %1977 = vst.msk [vmem:[#allocation2 + $0x68] sm:$0xff] %vm1153_vm7, %v1945_v30  ;;  %v2273_v57 = vadd.f32 %v2122_v45, %v1998_v50  ;;  %v1672_v26 = vld [vmem:[#allocation2 + $0x78] sm:$0xff]  ;;  %v2004_v21 = vld [vmem:[#allocation2 + $0x40] sm:$0xff] }
 0x1ef   : > { %1976 = vst.msk [vmem:[#allocation2 + $0x60] sm:$0xff] %vm1153_vm7, %v1944_v39  ;;  %2306 = vst.msk [vmem:[#allocation2 + $0x18] sm:$0xff] %vm1153_vm7, %v2274_v13  ;;  %v2865_v4 = vpop.f32.mrb[30].mxu1  ;;  %v1671_v25 = vld [vmem:[#allocation2 + $0x70] sm:$0xff] }
 0x1f0   : > { %2305 = vst.msk [vmem:[#allocation2 + $0x10] sm:$0xff] %vm1153_vm7, %v2273_v57  ;;  %v1947_v5 = vadd.f32 %v2865_v4, %v1672_v26  ;;  %v1843_v36 = vpop.f32.mrb[31].mxu1  ;;  %v2902_v42 = vpop.f32.mrb[20].mxu0  ;;  %v1679_v39 = vld [vmem:[#allocation2 + $0xb0] sm:$0xff] }
 0x1f1   : > { %v1946_v61 = vadd.f32 %v1843_v36, %v1671_v25  ;;  %v2276_v37 = vadd.f32 %v2902_v42, %v2001_v34  ;;  %v2132_v38 = vpop.f32.mrb[21].mxu0  ;;  %v2007_v60 = vld [vmem:[#allocation2 + $0x58] sm:$0xff]  ;;  %v1682_v42 = vld [vmem:[#allocation2 + $0xc8] sm:$0xff] }
 0x1f2   : > { %v2336_v9 = vld [vmem:[#allocation2 + $0x8] sm:$0xff]  ;;  %1979 = vst.msk [vmem:[#allocation2 + $0x78] sm:$0xff] %vm1153_vm7, %v1947_v5  ;;  %v2275_v16 = vadd.f32 %v2132_v38, %v2000_v1  ;;  %v2006_v40 = vld [vmem:[#allocation2 + $0x50] sm:$0xff]  ;;  %v1681_v1 = vld [vmem:[#allocation2 + $0xc0] sm:$0xff] }
 0x1f3   : > { %2368 = vst.msk [vmem:[%s4009_s14 + $0x8] sm:$0xff] %vm1153_vm7, %v2336_v9  ;;  %v2335_v41 = vld [vmem:[#allocation2] sm:$0xff]  ;;  %1978 = vst.msk [vmem:[#allocation2 + $0x70] sm:$0xff] %vm1153_vm7, %v1946_v61  ;;  %v2868_v10 = vpop.f32.mrb[32].mxu1 }
 0x1f4   : > { %2308 = vst.msk [vmem:[#allocation2 + $0x28] sm:$0xff] %vm1153_vm7, %v2276_v37  ;;  %2367 = vst.msk [vmem:[%s4009_s14] sm:$0xff] %vm1153_vm7, %v2335_v41  ;;  %v1949_v11 = vadd.f32 %v2868_v10, %v1674_v49  ;;  %v1853_v29 = vpop.f32.mrb[33].mxu1  ;;  %v2905_v47 = vpop.f32.mrb[22].mxu0 }
 0x1f5   : > { %2307 = vst.msk [vmem:[#allocation2 + $0x20] sm:$0xff] %vm1153_vm7, %v2275_v16  ;;  %v1948_v35 = vadd.f32 %v1853_v29, %v1673_v6  ;;  %v2278_v20 = vadd.f32 %v2905_v47, %v2003_v15  ;;  %v2142_v43 = vpop.f32.mrb[23].mxu0  ;;  %v2009_v50 = vld [vmem:[#allocation2 + $0x68] sm:$0xff]  ;;  %v1684_v47 = vld [vmem:[#allocation2 + $0xd8] sm:$0xff] }
 0x1f6   : > { %v2338_v54 = vld [vmem:[#allocation2 + $0x18] sm:$0xff]  ;;  %1981 = vst.msk [vmem:[#allocation2 + $0x88] sm:$0xff] %vm1153_vm7, %v1949_v11  ;;  %v2277_v33 = vadd.f32 %v2142_v43, %v2002_v48  ;;  %v2008_v4 = vld [vmem:[#allocation2 + $0x60] sm:$0xff]  ;;  %v1683_v48 = vld [vmem:[#allocation2 + $0xd0] sm:$0xff] }
 0x1f7   : > { %2370 = vst.msk [vmem:[%s4009_s14 + $0x18] sm:$0xff] %vm1153_vm7, %v2338_v54  ;;  %v2337_v14 = vld [vmem:[#allocation2 + $0x10] sm:$0xff]  ;;  %1980 = vst.msk [vmem:[#allocation2 + $0x80] sm:$0xff] %vm1153_vm7, %v1948_v35  ;;  %v2871_v52 = vpop.f32.mrb[34].mxu1 }
 0x1f8   : > { %2310 = vst.msk [vmem:[#allocation2 + $0x38] sm:$0xff] %vm1153_vm7, %v2278_v20  ;;  %2369 = vst.msk [vmem:[%s4009_s14 + $0x10] sm:$0xff] %vm1153_vm7, %v2337_v14  ;;  %v1951_v2 = vadd.f32 %v2871_v52, %v1676_v53  ;;  %v1863_v17 = vpop.f32.mrb[35].mxu1  ;;  %v2908_v63 = vpop.f32.mrb[24].mxu0 }
 0x1f9   : > { %2309 = vst.msk [vmem:[#allocation2 + $0x30] sm:$0xff] %vm1153_vm7, %v2277_v33  ;;  %v1950_v23 = vadd.f32 %v1863_v17, %v1675_v56  ;;  %v2280_v32 = vadd.f32 %v2908_v63, %v2005_v59  ;;  %v2152_v8 = vpop.f32.mrb[25].mxu0  ;;  %v2011_v9 = vld [vmem:[#allocation2 + $0x78] sm:$0xff]  ;;  %v1686_v63 = vld [vmem:[#allocation2 + $0xe8] sm:$0xff] }
 0x1fa   : > { %1983 = vst.msk [vmem:[#allocation2 + $0x98] sm:$0xff] %vm1153_vm7, %v1951_v2  ;;  %v2279_v31 = vadd.f32 %v2152_v8, %v2004_v21  ;;  %v2010_v10 = vld [vmem:[#allocation2 + $0x70] sm:$0xff]  ;;  %v1685_v21 = vld [vmem:[#allocation2 + $0xe0] sm:$0xff] }
 0x1fb   : > { %v2340_v62 = vld [vmem:[#allocation2 + $0x28] sm:$0xff]  ;;  %1982 = vst.msk [vmem:[#allocation2 + $0x90] sm:$0xff] %vm1153_vm7, %v1950_v23  ;;  %2312 = vst.msk [vmem:[#allocation2 + $0x48] sm:$0xff] %vm1153_vm7, %v2280_v32  ;;  %v2874_v28 = vpop.f32.mrb[36].mxu1 }
 0x1fc   : > { %2372 = vst.msk [vmem:[%s4009_s14 + $0x28] sm:$0xff] %vm1153_vm7, %v2340_v62  ;;  %v2339_v58 = vld [vmem:[#allocation2 + $0x20] sm:$0xff]  ;;  %2311 = vst.msk [vmem:[#allocation2 + $0x40] sm:$0xff] %vm1153_vm7, %v2279_v31  ;;  %v1953_v22 = vadd.f32 %v2874_v28, %v1678_v18  ;;  %v1873_v27 = vpop.f32.mrb[37].mxu1  ;;  %v2911_v55 = vpop.f32.mrb[26].mxu0 }
 0x1fd   : > { %2371 = vst.msk [vmem:[%s4009_s14 + $0x20] sm:$0xff] %vm1153_vm7, %v2339_v58  ;;  %v1952_v51 = vadd.f32 %v1873_v27, %v1677_v0  ;;  %v2282_v3 = vadd.f32 %v2911_v55, %v2007_v60  ;;  %v2162_v44 = vpop.f32.mrb[27].mxu0  ;;  %v2013_v54 = vld [vmem:[#allocation2 + $0x88] sm:$0xff]  ;;  %v1688_v55 = vld [vmem:[#allocation2 + $0xf8] sm:$0xff] }
 0x1fe   : > { %1985 = vst.msk [vmem:[#allocation2 + $0xa8] sm:$0xff] %vm1153_vm7, %v1953_v22  ;;  %v2281_v30 = vadd.f32 %v2162_v44, %v2006_v40  ;;  %v2012_v52 = vld [vmem:[#allocation2 + $0x80] sm:$0xff]  ;;  %v1687_v40 = vld [vmem:[#allocation2 + $0xf0] sm:$0xff] }
 0x1ff   : > { %v2342_v19 = vld [vmem:[#allocation2 + $0x38] sm:$0xff]  ;;  %1984 = vst.msk [vmem:[#allocation2 + $0xa0] sm:$0xff] %vm1153_vm7, %v1952_v51  ;;  %2314 = vst.msk [vmem:[#allocation2 + $0x58] sm:$0xff] %vm1153_vm7, %v2282_v3  ;;  %v2877_v46 = vpop.f32.mrb[38].mxu1 }
 0x200   : > { %2374 = vst.msk [vmem:[%s4009_s14 + $0x38] sm:$0xff] %vm1153_vm7, %v2342_v19  ;;  %v2341_v12 = vld [vmem:[#allocation2 + $0x30] sm:$0xff]  ;;  %2313 = vst.msk [vmem:[#allocation2 + $0x50] sm:$0xff] %vm1153_vm7, %v2281_v30  ;;  %v1955_v7 = vadd.f32 %v2877_v46, %v1680_v24  ;;  %v1883_v13 = vpop.f32.mrb[39].mxu1  ;;  %v2914_v45 = vpop.f32.mrb[28].mxu0 }
 0x201   : > { %2373 = vst.msk [vmem:[%s4009_s14 + $0x30] sm:$0xff] %vm1153_vm7, %v2341_v12  ;;  %v1954_v57 = vadd.f32 %v1883_v13, %v1679_v39  ;;  %v2284_v26 = vadd.f32 %v2914_v45, %v2009_v50  ;;  %v2172_v25 = vpop.f32.mrb[29].mxu0  ;;  %v2015_v62 = vld [vmem:[#allocation2 + $0x98] sm:$0xff] }
 0x202   : > { %v2344_v5 = vld [vmem:[#allocation2 + $0x48] sm:$0xff]  ;;  %1987 = vst.msk [vmem:[#allocation2 + $0xb8] sm:$0xff] %vm1153_vm7, %v1955_v7  ;;  %v2283_v36 = vadd.f32 %v2172_v25, %v2008_v4  ;;  %v2014_v28 = vld [vmem:[#allocation2 + $0x90] sm:$0xff] }
 0x203   : > { %2376 = vst.msk [vmem:[%s4009_s14 + $0x48] sm:$0xff] %vm1153_vm7, %v2344_v5  ;;  %v2343_v34 = vld [vmem:[#allocation2 + $0x40] sm:$0xff]  ;;  %1986 = vst.msk [vmem:[#allocation2 + $0xb0] sm:$0xff] %vm1153_vm7, %v1954_v57  ;;  %v2880_v61 = vpop.f32.mrb[40].mxu1 }
 0x204   : > { %2316 = vst.msk [vmem:[#allocation2 + $0x68] sm:$0xff] %vm1153_vm7, %v2284_v26  ;;  %2375 = vst.msk [vmem:[%s4009_s14 + $0x40] sm:$0xff] %vm1153_vm7, %v2343_v34  ;;  %v1957_v37 = vadd.f32 %v2880_v61, %v1682_v42  ;;  %v1893_v38 = vpop.f32.mrb[41].mxu1  ;;  %v2917_v16 = vpop.f32.mrb[30].mxu0 }
 0x205   : > { %2315 = vst.msk [vmem:[#allocation2 + $0x60] sm:$0xff] %vm1153_vm7, %v2283_v36  ;;  %v1956_v41 = vadd.f32 %v1893_v38, %v1681_v1  ;;  %v2286_v49 = vadd.f32 %v2917_v16, %v2011_v9  ;;  %v2182_v11 = vpop.f32.mrb[31].mxu0  ;;  %v2017_v19 = vld [vmem:[#allocation2 + $0xa8] sm:$0xff] }
 0x206   : > { %v2346_v6 = vld [vmem:[#allocation2 + $0x58] sm:$0xff]  ;;  %1989 = vst.msk [vmem:[#allocation2 + $0xc8] sm:$0xff] %vm1153_vm7, %v1957_v37  ;;  %v2285_v29 = vadd.f32 %v2182_v11, %v2010_v10  ;;  %v2016_v46 = vld [vmem:[#allocation2 + $0xa0] sm:$0xff] }
 0x207   : > { %2378 = vst.msk [vmem:[%s4009_s14 + $0x58] sm:$0xff] %vm1153_vm7, %v2346_v6  ;;  %v2345_v15 = vld [vmem:[#allocation2 + $0x50] sm:$0xff]  ;;  %1988 = vst.msk [vmem:[#allocation2 + $0xc0] sm:$0xff] %vm1153_vm7, %v1956_v41  ;;  %v2883_v35 = vpop.f32.mrb[42].mxu1 }
 0x208   : > { %2318 = vst.msk [vmem:[#allocation2 + $0x78] sm:$0xff] %vm1153_vm7, %v2286_v49  ;;  %2377 = vst.msk [vmem:[%s4009_s14 + $0x50] sm:$0xff] %vm1153_vm7, %v2345_v15  ;;  %v1959_v20 = vadd.f32 %v2883_v35, %v1684_v47  ;;  %v1903_v43 = vpop.f32.mrb[43].mxu1  ;;  %v2920_v33 = vpop.f32.mrb[32].mxu0 }
 0x209   : > { %2317 = vst.msk [vmem:[#allocation2 + $0x70] sm:$0xff] %vm1153_vm7, %v2285_v29  ;;  %v1958_v14 = vadd.f32 %v1903_v43, %v1683_v48  ;;  %v2288_v53 = vadd.f32 %v2920_v33, %v2013_v54  ;;  %v2192_v2 = vpop.f32.mrb[33].mxu0  ;;  %v2019_v45 = vld [vmem:[#allocation2 + $0xb8] sm:$0xff] }
 0x20a   : > { %1991 = vst.msk [vmem:[#allocation2 + $0xd8] sm:$0xff] %vm1153_vm7, %v1959_v20  ;;  %v2287_v17 = vadd.f32 %v2192_v2, %v2012_v52  ;;  %v2018_v4 = vld [vmem:[#allocation2 + $0xb0] sm:$0xff] }
 0x20b   : > { %v2348_v56 = vld [vmem:[#allocation2 + $0x68] sm:$0xff]  ;;  %1990 = vst.msk [vmem:[#allocation2 + $0xd0] sm:$0xff] %vm1153_vm7, %v1958_v14  ;;  %2320 = vst.msk [vmem:[#allocation2 + $0x88] sm:$0xff] %vm1153_vm7, %v2288_v53  ;;  %v2886_v23 = vpop.f32.mrb[44].mxu1 }
 0x20c   : > { %2380 = vst.msk [vmem:[%s4009_s14 + $0x68] sm:$0xff] %vm1153_vm7, %v2348_v56  ;;  %v2347_v59 = vld [vmem:[#allocation2 + $0x60] sm:$0xff]  ;;  %2319 = vst.msk [vmem:[#allocation2 + $0x80] sm:$0xff] %vm1153_vm7, %v2287_v17  ;;  %v1961_v32 = vadd.f32 %v2886_v23, %v1686_v63  ;;  %v1913_v8 = vpop.f32.mrb[45].mxu1  ;;  %v2923_v31 = vpop.f32.mrb[34].mxu0 }
 0x20d   : > { %2379 = vst.msk [vmem:[%s4009_s14 + $0x60] sm:$0xff] %vm1153_vm7, %v2347_v59  ;;  %v1960_v58 = vadd.f32 %v1913_v8, %v1685_v21  ;;  %v2290_v18 = vadd.f32 %v2923_v31, %v2015_v62  ;;  %v2202_v22 = vpop.f32.mrb[35].mxu0  ;;  %v2021_v42 = vld [vmem:[#allocation2 + $0xc8] sm:$0xff] }
 0x20e   : > { %1993 = vst.msk [vmem:[#allocation2 + $0xe8] sm:$0xff] %vm1153_vm7, %v1961_v32  ;;  %v2289_v27 = vadd.f32 %v2202_v22, %v2014_v28  ;;  %v2020_v1 = vld [vmem:[#allocation2 + $0xc0] sm:$0xff] }
 0x20f   : > { %v2350_v0 = vld [vmem:[#allocation2 + $0x78] sm:$0xff]  ;;  %1992 = vst.msk [vmem:[#allocation2 + $0xe0] sm:$0xff] %vm1153_vm7, %v1960_v58  ;;  %2322 = vst.msk [vmem:[#allocation2 + $0x98] sm:$0xff] %vm1153_vm7, %v2290_v18  ;;  %v2889_v51 = vpop.f32.mrb[46].mxu1 }
 0x210   : > { %2382 = vst.msk [vmem:[%s4009_s14 + $0x78] sm:$0xff] %vm1153_vm7, %v2350_v0  ;;  %v2349_v60 = vld [vmem:[#allocation2 + $0x70] sm:$0xff]  ;;  %2321 = vst.msk [vmem:[#allocation2 + $0x90] sm:$0xff] %vm1153_vm7, %v2289_v27  ;;  %v1963_v3 = vadd.f32 %v2889_v51, %v1688_v55  ;;  %v1923_v44 = vpop.f32.mrb[47].mxu1  ;;  %v2926_v30 = vpop.f32.mrb[36].mxu0 }
 0x211   : > { %2381 = vst.msk [vmem:[%s4009_s14 + $0x70] sm:$0xff] %vm1153_vm7, %v2349_v60  ;;  %v1962_v12 = vadd.f32 %v1923_v44, %v1687_v40  ;;  %v2292_v24 = vadd.f32 %v2926_v30, %v2017_v19  ;;  %v2212_v7 = vpop.f32.mrb[37].mxu0  ;;  %v2023_v49 = vld [vmem:[#allocation2 + $0xd8] sm:$0xff] }
 0x212   : > { %v2352_v39 = vld [vmem:[#allocation2 + $0x88] sm:$0xff]  ;;  %1995 = vst.msk [vmem:[#allocation2 + $0xf8] sm:$0xff] %vm1153_vm7, %v1963_v3  ;;  %v2291_v13 = vadd.f32 %v2212_v7, %v2016_v46  ;;  %v2022_v6 = vld [vmem:[#allocation2 + $0xd0] sm:$0xff] }
 0x213   : > { %2384 = vst.msk [vmem:[%s4009_s14 + $0x88] sm:$0xff] %vm1153_vm7, %v2352_v39  ;;  %v2351_v50 = vld [vmem:[#allocation2 + $0x80] sm:$0xff]  ;;  %1994 = vst.msk [vmem:[#allocation2 + $0xf0] sm:$0xff] %vm1153_vm7, %v1962_v12 }
 0x214   : > { %2324 = vst.msk [vmem:[#allocation2 + $0xa8] sm:$0xff] %vm1153_vm7, %v2292_v24  ;;  %2383 = vst.msk [vmem:[%s4009_s14 + $0x80] sm:$0xff] %vm1153_vm7, %v2351_v50  ;;  %v2929_v57 = vpop.f32.mrb[38].mxu0 }
 0x215   : > { %2323 = vst.msk [vmem:[#allocation2 + $0xa0] sm:$0xff] %vm1153_vm7, %v2291_v13  ;;  %v2294_v26 = vadd.f32 %v2929_v57, %v2019_v45  ;;  %v2222_v25 = vpop.f32.mrb[39].mxu0  ;;  %v2025_v20 = vld [vmem:[#allocation2 + $0xe8] sm:$0xff] }
 0x216   : > { %v2354_v5 = vld [vmem:[#allocation2 + $0x98] sm:$0xff]  ;;  %v2293_v36 = vadd.f32 %v2222_v25, %v2018_v4  ;;  %v2024_v54 = vld [vmem:[#allocation2 + $0xe0] sm:$0xff] }
 0x217   : > { %2386 = vst.msk [vmem:[%s4009_s14 + $0x98] sm:$0xff] %vm1153_vm7, %v2354_v5  ;;  %v2353_v34 = vld [vmem:[#allocation2 + $0x90] sm:$0xff]  ;;  %2326 = vst.msk [vmem:[#allocation2 + $0xb8] sm:$0xff] %vm1153_vm7, %v2294_v26 }
 0x218   : > { %2385 = vst.msk [vmem:[%s4009_s14 + $0x90] sm:$0xff] %vm1153_vm7, %v2353_v34  ;;  %2325 = vst.msk [vmem:[#allocation2 + $0xb0] sm:$0xff] %vm1153_vm7, %v2293_v36  ;;  %v2932_v61 = vpop.f32.mrb[40].mxu0 }
 0x219   : > { %v2296_v37 = vadd.f32 %v2932_v61, %v2021_v42  ;;  %v2232_v38 = vpop.f32.mrb[41].mxu0  ;;  %v2027_v2 = vld [vmem:[#allocation2 + $0xf8] sm:$0xff] }
 0x21a   : > { %v2295_v16 = vadd.f32 %v2232_v38, %v2020_v1  ;;  %v2026_v59 = vld [vmem:[#allocation2 + $0xf0] sm:$0xff] }
 0x21b   : > { %v2356_v9 = vld [vmem:[#allocation2 + $0xa8] sm:$0xff]  ;;  %2328 = vst.msk [vmem:[#allocation2 + $0xc8] sm:$0xff] %vm1153_vm7, %v2296_v37 }
 0x21c   : > { %2388 = vst.msk [vmem:[%s4009_s14 + $0xa8] sm:$0xff] %vm1153_vm7, %v2356_v9  ;;  %v2355_v41 = vld [vmem:[#allocation2 + $0xa0] sm:$0xff]  ;;  %2327 = vst.msk [vmem:[#allocation2 + $0xc0] sm:$0xff] %vm1153_vm7, %v2295_v16  ;;  %v2935_v10 = vpop.f32.mrb[42].mxu0 }
 0x21d   : > { %2387 = vst.msk [vmem:[%s4009_s14 + $0xa0] sm:$0xff] %vm1153_vm7, %v2355_v41  ;;  %v2298_v11 = vadd.f32 %v2935_v10, %v2023_v49  ;;  %v2242_v29 = vpop.f32.mrb[43].mxu0 }
 0x21e   : > { %v2358_v15 = vld [vmem:[#allocation2 + $0xb8] sm:$0xff]  ;;  %v2297_v47 = vadd.f32 %v2242_v29, %v2022_v6 }
 0x21f   : > { %2390 = vst.msk [vmem:[%s4009_s14 + $0xb8] sm:$0xff] %vm1153_vm7, %v2358_v15  ;;  %v2357_v35 = vld [vmem:[#allocation2 + $0xb0] sm:$0xff]  ;;  %2330 = vst.msk [vmem:[#allocation2 + $0xd8] sm:$0xff] %vm1153_vm7, %v2298_v11 }
 0x220   : > { %2389 = vst.msk [vmem:[%s4009_s14 + $0xb0] sm:$0xff] %vm1153_vm7, %v2357_v35  ;;  %2329 = vst.msk [vmem:[#allocation2 + $0xd0] sm:$0xff] %vm1153_vm7, %v2297_v47  ;;  %v2938_v48 = vpop.f32.mrb[44].mxu0 }
 0x221   : > { %v2300_v43 = vadd.f32 %v2938_v48, %v2025_v20  ;;  %v2252_v33 = vpop.f32.mrb[45].mxu0 }
 0x222   : > { %v2360_v14 = vld [vmem:[#allocation2 + $0xc8] sm:$0xff]  ;;  %v2299_v53 = vadd.f32 %v2252_v33, %v2024_v54 }
 0x223   : > { %2392 = vst.msk [vmem:[%s4009_s14 + $0xc8] sm:$0xff] %vm1153_vm7, %v2360_v14  ;;  %v2359_v52 = vld [vmem:[#allocation2 + $0xc0] sm:$0xff]  ;;  %2332 = vst.msk [vmem:[#allocation2 + $0xe8] sm:$0xff] %vm1153_vm7, %v2300_v43 }
 0x224   : > { %2391 = vst.msk [vmem:[%s4009_s14 + $0xc0] sm:$0xff] %vm1153_vm7, %v2359_v52  ;;  %2331 = vst.msk [vmem:[#allocation2 + $0xe0] sm:$0xff] %vm1153_vm7, %v2299_v53  ;;  %v2941_v56 = vpop.f32.mrb[46].mxu0 }
 0x225   : > { %v2302_v17 = vadd.f32 %v2941_v56, %v2027_v2  ;;  %v2262_v63 = vpop.f32.mrb[47].mxu0 }
 0x226   : > { %v2362_v23 = vld [vmem:[#allocation2 + $0xd8] sm:$0xff]  ;;  %v2301_v32 = vadd.f32 %v2262_v63, %v2026_v59 }
 0x227   : > { %2394 = vst.msk [vmem:[%s4009_s14 + $0xd8] sm:$0xff] %vm1153_vm7, %v2362_v23  ;;  %v2361_v21 = vld [vmem:[#allocation2 + $0xd0] sm:$0xff]  ;;  %2334 = vst.msk [vmem:[#allocation2 + $0xf8] sm:$0xff] %vm1153_vm7, %v2302_v17 }
 0x228   : > { %2393 = vst.msk [vmem:[%s4009_s14 + $0xd0] sm:$0xff] %vm1153_vm7, %v2361_v21  ;;  %2333 = vst.msk [vmem:[#allocation2 + $0xf0] sm:$0xff] %vm1153_vm7, %v2301_v32 }
 0x22a   : > { %v2364_v8 = vld [vmem:[#allocation2 + $0xe8] sm:$0xff] }
 0x22b   : > { %2396 = vst.msk [vmem:[%s4009_s14 + $0xe8] sm:$0xff] %vm1153_vm7, %v2364_v8  ;;  %v2363_v62 = vld [vmem:[#allocation2 + $0xe0] sm:$0xff] }
 0x22c   : > { %2395 = vst.msk [vmem:[%s4009_s14 + $0xe0] sm:$0xff] %vm1153_vm7, %v2363_v62 }
 0x22e   : > { %v2366_v31 = vld [vmem:[#allocation2 + $0xf8] sm:$0xff] }
 0x22f   : > { %2398 = vst.msk [vmem:[%s4009_s14 + $0xf8] sm:$0xff] %vm1153_vm7, %v2366_v31  ;;  %v2365_v58 = vld [vmem:[#allocation2 + $0xf0] sm:$0xff] }
 0x230   : > { %2397 = vst.msk [vmem:[%s4009_s14 + $0xf0] sm:$0xff] %vm1153_vm7, %v2365_v58 }
 0x231 PF: > { %s15_s22 = sadd.s32 1, %s3043_s22   ;;  %s4146_s18 = smov %s3035_s20 }
 0x232   : > { %p12_p12 = scmp.ge.s32.totalorder %s15_s22, 10   ;;  %s4147_s19 = smov %s3039_s21 }
 0x233   : > { %s4148_s20 = smov %s4151_s23  ;;  %s4149_s21 = smov %s4155_s24 }
 0x234   :  { %14 = sbr.rel (!%p12_p12) target bundleno = 3 (0x3), region = 78 }

</bundles_post_ra>
